<compile_context>
chip_gen: v6e
topology: v6e:2x2x1
jax: 0.10.0
libtpu: 0.0.40
codegen_flags: <defaults>
</compile_context>

<pallas_src>
from functools import partial

import jax
import jax.numpy as jnp
from jax.experimental import pallas as pl
from jax.experimental.pallas import tpu as pltpu


def _round_up(n, m):
    return ((n + m - 1) // m) * m


def vae_kernel(x_ref, eps_ref, wsq_ref, wml_ref, b_ref, recon_ref, stats_ref):
    D = x_ref.shape[1]
    bf = jnp.bfloat16
    b_all = b_ref[...]                              # (11, D) f32, loaded once

    def layer(h_bf16, wi, bi, relu=True):
        y = jnp.dot(h_bf16, wsq_ref[wi], preferred_element_type=jnp.float32)
        y = y + b_all[bi:bi + 1, :]                 # (1, D) f32 broadcast
        return jnp.maximum(y, 0.0) if relu else y

    # ---- Encoder ---- (x arrives pre-cast to bf16)
    h = layer(x_ref[...], 0, 0)
    h = layer(h.astype(bf), 1, 1)
    h = layer(h.astype(bf), 2, 2)
    h = layer(h.astype(bf), 3, 3)

    # ---- Fused mean|logvar: one (tile, D) @ (D, 2D) MXU pass ----
    ml = jnp.dot(h.astype(bf), wml_ref[...], preferred_element_type=jnp.float32)
    mean = ml[:, :D] + b_all[4:5, :]
    logvar = ml[:, D:] + b_all[5:6, :]

    # ---- Reparameterization: latent = eps * exp(0.5*logvar) + mean ----
    latent = eps_ref[...] * jnp.exp(0.5 * logvar) + mean

    # Store stats now (unmasked, 128-lane-aligned slice stores) so the
    # mean/logvar/latent vregs are dead before the decoder matmuls.
    stats_ref[:, 0:D] = latent
    stats_ref[:, D:2 * D] = mean
    stats_ref[:, 2 * D:3 * D] = logvar

    # ---- Decoder ----
    d = layer(latent.astype(bf), 4, 6)
    d = layer(d.astype(bf), 5, 7)
    d = layer(d.astype(bf), 6, 8)
    d = layer(d.astype(bf), 7, 9)
    recon_ref[...] = layer(d.astype(bf), 8, 10, relu=False)


_ENC_SQ = [("w_i2h1", "b_i2h1"), ("w_h1h2", "b_h1h2"),
           ("w_h2h3", "b_h2h3"), ("w_h3h4", "b_h3h4")]
_DEC_SQ = [("w_l2h4", "b_l2h4"), ("w_h4h3", "b_h4h3"), ("w_h3h2", "b_h3h2"),
           ("w_h2h1", "b_h2h1"), ("w_h1o", "b_h1o")]


def pack_params(params):
    """One-time preprocessing (hoisted off the per-call path): pad every layer
    to a uniform lane-dense width D, stack the 9 square layers, pack the
    mean|logvar weights side-by-side into one (D, 2D) block, cast to bf16."""
    max_dim = 0
    for name, arr in params.items():
        if name.startswith("w_"):
            max_dim = max(max_dim, *arr.shape)
    D = _round_up(max_dim, 128)

    def pad_w(w):
        return jnp.zeros((D, D), jnp.float32).at[:w.shape[0], :w.shape[1]].set(w)

    def pad_b(b):
        b = b.reshape(-1)
        return jnp.zeros((D,), jnp.float32).at[:b.shape[0]].set(b)

    w_sq = jnp.stack([pad_w(params[w]) for w, _ in _ENC_SQ + _DEC_SQ]
                     ).astype(jnp.bfloat16)                       # (9, D, D)
    wm, wv = params["w_mean"], params["w_logv"]
    w_ml = jnp.zeros((D, 2 * D), jnp.float32)
    w_ml = w_ml.at[:wm.shape[0], :wm.shape[1]].set(wm)
    w_ml = w_ml.at[:wv.shape[0], D:D + wv.shape[1]].set(wv)
    w_ml = w_ml.astype(jnp.bfloat16)                              # (D, 2D)
    b_rows = ([pad_b(params[b]) for _, b in _ENC_SQ]
              + [pad_b(params["b_mean"]), pad_b(params["b_logv"])]
              + [pad_b(params[b]) for _, b in _DEC_SQ])
    b_all = jnp.stack(b_rows)                                     # (11, D) f32
    return {"w_sq": w_sq, "w_ml": w_ml, "b_all": b_all}


def _pick_batch_tile(B):
    """One grid step per TensorCore: v7x has 2 TCs/chip, v5e/v6e have 1."""
    try:
        kind = jax.devices()[0].device_kind.lower()
    except Exception:
        kind = ""
    n_tc = 2 if ("v7" in kind or "tpu7" in kind) else 1
    steps = n_tc if B >= 16 * n_tc else 1
    return _round_up(-(-B // steps), 8)


@partial(jax.jit, static_argnames=("batch_tile",))
def autoencoder_forward(x, eps, w_sq, w_ml, b_all, *, batch_tile=None):
    """x: (B, input_size) f32, eps: (B, latent_length) f32.
    w_sq/w_ml/b_all: packed parameters from pack_params().
    Returns (x_recon, latent, mean, logvar), all float32."""
    B, input_size = x.shape
    latent_length = eps.shape[1]
    D = w_sq.shape[1]
    n_sq = w_sq.shape[0]

    if batch_tile is None:
        batch_tile = _round_up(B, 8)          # single grid step
    Bp = _round_up(B, batch_tile)

    # Zero-pad batch/features; x goes in as bf16 (MXU operand dtype).
    xp = jnp.zeros((Bp, D), jnp.bfloat16).at[:B, :input_size].set(
        x.astype(jnp.bfloat16))
    ep = jnp.zeros((Bp, D), jnp.float32).at[:B, :latent_length].set(eps)

    grid = (Bp // batch_tile,)

    recon, stats = pl.pallas_call(
        vae_kernel,
        out_shape=[
            jax.ShapeDtypeStruct((Bp, D), jnp.float32),
            jax.ShapeDtypeStruct((Bp, 3 * D), jnp.float32),
        ],
        grid_spec=pltpu.PrefetchScalarGridSpec(
            num_scalar_prefetch=0,
            grid=grid,
            in_specs=[
                pl.BlockSpec((batch_tile, D), lambda i: (i, 0)),        # x bf16
                pl.BlockSpec((batch_tile, D), lambda i: (i, 0)),        # eps f32
                pl.BlockSpec((n_sq, D, D), lambda i: (0, 0, 0)),        # square W
                pl.BlockSpec((D, 2 * D), lambda i: (0, 0)),             # mean|logvar W
                pl.BlockSpec((n_sq + 2, D), lambda i: (0, 0)),          # biases
            ],
            out_specs=[
                pl.BlockSpec((batch_tile, D), lambda i: (i, 0)),
                pl.BlockSpec((batch_tile, 3 * D), lambda i: (i, 0)),
            ],
        ),
        compiler_params=pltpu.CompilerParams(
            dimension_semantics=("parallel",),
            vmem_limit_bytes=32 * 1024 * 1024,
        ),
    )(xp, ep, w_sq, w_ml, b_all)

    x_recon = recon[:B, :input_size]
    latent = stats[:B, 0:latent_length]
    mean = stats[:B, D:D + latent_length]
    logvar = stats[:B, 2 * D:2 * D + latent_length]
    return x_recon, latent, mean, logvar


def make_params(key, input_size, h1, h2, h3, h4, latent_length):
    """Synthetic init; weights stored transposed (in, out) vs torch (out, in)."""
    dims = {
        "w_i2h1": (input_size, h1), "w_h1h2": (h1, h2), "w_h2h3": (h2, h3),
        "w_h3h4": (h3, h4), "w_mean": (h4, latent_length),
        "w_logv": (h4, latent_length),
        "w_l2h4": (latent_length, h4), "w_h4h3": (h4, h3),
        "w_h3h2": (h3, h2), "w_h2h1": (h2, h1), "w_h1o": (h1, input_size),
    }
    params = {}
    keys = jax.random.split(key, 2 * len(dims))
    for i, (name, (fan_in, fan_out)) in enumerate(dims.items()):
        bound = (6.0 / (fan_in + fan_out)) ** 0.5
        params[name] = jax.random.uniform(
            keys[2 * i], (fan_in, fan_out), jnp.float32,
            minval=-bound, maxval=bound)
        params[name.replace("w_", "b_")] = jax.random.uniform(
            keys[2 * i + 1], (fan_out,), jnp.float32, minval=-0.05, maxval=0.05)
    return params


def ref_forward(x, eps, p):
    """Pure-JAX reference with the same bf16-operand / f32-accum math."""
    bf = jnp.bfloat16

    def lin(v, w, b):
        return jnp.dot(v.astype(bf), w.astype(bf),
                       preferred_element_type=jnp.float32) + b

    r = jax.nn.relu
    a = r(lin(x, p["w_i2h1"], p["b_i2h1"]))
    a = r(lin(a, p["w_h1h2"], p["b_h1h2"]))
    a = r(lin(a, p["w_h2h3"], p["b_h2h3"]))
    a = r(lin(a, p["w_h3h4"], p["b_h3h4"]))
    mean = lin(a, p["w_mean"], p["b_mean"])
    logv = lin(a, p["w_logv"], p["b_logv"])
    lat = eps * jnp.exp(0.5 * logv) + mean
    d = r(lin(lat, p["w_l2h4"], p["b_l2h4"]))
    d = r(lin(d, p["w_h4h3"], p["b_h4h3"]))
    d = r(lin(d, p["w_h3h2"], p["b_h3h2"]))
    d = r(lin(d, p["w_h2h1"], p["b_h2h1"]))
    return lin(d, p["w_h1o"], p["b_h1o"]), lat, mean, logv


if __name__ == "__main__":
    # MLP VAE config: x is (batch, input_size).
    B = 512
    input_size, h1, h2, h3, h4, latent_length = 128, 64, 64, 32, 32, 16

    key = jax.random.PRNGKey(0)
    k_x, k_eps, k_p = jax.random.split(key, 3)

    x = jax.random.normal(k_x, (B, input_size), jnp.float32)
    eps = jax.random.normal(k_eps, (B, latent_length), jnp.float32)
    params = make_params(k_p, input_size, h1, h2, h3, h4, latent_length)

    packed = pack_params(params)           # one-time parameter preprocessing
    batch_tile = _pick_batch_tile(B)       # 1 step on v5e/v6e, 2 on v7x

    outs = autoencoder_forward(x, eps, packed["w_sq"], packed["w_ml"],
                               packed["b_all"], batch_tile=batch_tile)
    x_recon, latent, latent_mean, latent_logvar = jax.block_until_ready(outs)

    rr, rl, rm, rv = ref_forward(x, eps, params)
    assert jnp.allclose(x_recon, rr, atol=1e-2, rtol=1e-2), "recon mismatch"
    assert jnp.allclose(latent, rl, atol=1e-2, rtol=1e-2), "latent mismatch"
    assert jnp.allclose(latent_mean, rm, atol=1e-2, rtol=1e-2), "mean mismatch"
    assert jnp.allclose(latent_logvar, rv, atol=1e-2, rtol=1e-2), "logvar mismatch"

    print("KERNEL_OK")
</pallas_src>

<mosaic_0001>
module attributes {stable_mosaic.version = 11 : i64} {
  func.func @vae_kernel(%arg0: i32, %arg1: memref<512x128xbf16, #tpu.memory_space<vmem>>, %arg2: memref<512x128xf32, #tpu.memory_space<vmem>>, %arg3: memref<9x128x128xbf16, #tpu.memory_space<vmem>>, %arg4: memref<128x256xbf16, #tpu.memory_space<vmem>>, %arg5: memref<11x128xf32, #tpu.memory_space<vmem>>, %arg6: memref<512x128xf32, #tpu.memory_space<vmem>>, %arg7: memref<512x384xf32, #tpu.memory_space<vmem>>) attributes {dimension_semantics = [#tpu.dimension_semantics<parallel>], iteration_bounds = array<i64: 1>, scalar_prefetch = 0 : i64, scratch_operands = 0 : i64, tpu.core_type = #tpu.core_type<tc>, window_params = [{transform_indices = @transform_0, window_bounds = array<i64: 512, 128>}, {transform_indices = @transform_1, window_bounds = array<i64: 512, 128>}, {pipeline_mode = #tpu.pipeline_mode<synchronous>, transform_indices = @transform_2, window_bounds = array<i64: 9, 128, 128>}, {pipeline_mode = #tpu.pipeline_mode<synchronous>, transform_indices = @transform_3, window_bounds = array<i64: 128, 256>}, {pipeline_mode = #tpu.pipeline_mode<synchronous>, transform_indices = @transform_4, window_bounds = array<i64: 11, 128>}, {transform_indices = @transform_5, window_bounds = array<i64: 512, 128>}, {transform_indices = @transform_6, window_bounds = array<i64: 512, 384>}]} {
    %c0 = arith.constant 0 : index
    %c0_0 = arith.constant 0 : index
    %0 = vector.load %arg5[%c0, %c0_0] : memref<11x128xf32, #tpu.memory_space<vmem>>, vector<11x128xf32>
    %c0_1 = arith.constant 0 : index
    %c0_2 = arith.constant 0 : index
    %1 = vector.load %arg1[%c0_1, %c0_2] : memref<512x128xbf16, #tpu.memory_space<vmem>>, vector<512x128xbf16>
    %c0_3 = arith.constant 0 : index
    %c0_4 = arith.constant 0 : index
    %c0_5 = arith.constant 0 : index
    %2 = vector.load %arg3[%c0_3, %c0_4, %c0_5] : memref<9x128x128xbf16, #tpu.memory_space<vmem>>, vector<1x128x128xbf16>
    %3 = vector.shape_cast %2 : vector<1x128x128xbf16> to vector<128x128xbf16>
    %cst = arith.constant dense<0.000000e+00> : vector<512x128xf32>
    %4 = tpu.matmul %1, %3, %cst {dimension_numbers = #tpu.dot_dimension_numbers<[1], [0], [0], [1], [0, 0, 1, 1], [], []>} : vector<512x128xbf16>, vector<128x128xbf16>, vector<512x128xf32> -> vector<512x128xf32>
    %5 = vector.extract_strided_slice %0 {offsets = [0, 0], sizes = [1, 128], strides = [1, 1]} : vector<11x128xf32> to vector<1x128xf32>
    %6 = vector.broadcast %5 : vector<1x128xf32> to vector<512x128xf32>
    %7 = arith.addf %4, %6 : vector<512x128xf32>
    %cst_6 = arith.constant 0.000000e+00 : f32
    %8 = vector.broadcast %cst_6 : f32 to vector<512x128xf32>
    %9 = arith.maximumf %7, %8 : vector<512x128xf32>
    %10 = arith.truncf %9 : vector<512x128xf32> to vector<512x128xbf16>
    %c1 = arith.constant 1 : index
    %c0_7 = arith.constant 0 : index
    %c0_8 = arith.constant 0 : index
    %11 = vector.load %arg3[%c1, %c0_7, %c0_8] : memref<9x128x128xbf16, #tpu.memory_space<vmem>>, vector<1x128x128xbf16>
    %12 = vector.shape_cast %11 : vector<1x128x128xbf16> to vector<128x128xbf16>
    %cst_9 = arith.constant dense<0.000000e+00> : vector<512x128xf32>
    %13 = tpu.matmul %10, %12, %cst_9 {dimension_numbers = #tpu.dot_dimension_numbers<[1], [0], [0], [1], [0, 0, 1, 1], [], []>} : vector<512x128xbf16>, vector<128x128xbf16>, vector<512x128xf32> -> vector<512x128xf32>
    %14 = vector.extract_strided_slice %0 {offsets = [1, 0], sizes = [1, 128], strides = [1, 1]} : vector<11x128xf32> to vector<1x128xf32>
    %15 = vector.broadcast %14 : vector<1x128xf32> to vector<512x128xf32>
    %16 = arith.addf %13, %15 : vector<512x128xf32>
    %cst_10 = arith.constant 0.000000e+00 : f32
    %17 = vector.broadcast %cst_10 : f32 to vector<512x128xf32>
    %18 = arith.maximumf %16, %17 : vector<512x128xf32>
    %19 = arith.truncf %18 : vector<512x128xf32> to vector<512x128xbf16>
    %c2 = arith.constant 2 : index
    %c0_11 = arith.constant 0 : index
    %c0_12 = arith.constant 0 : index
    %20 = vector.load %arg3[%c2, %c0_11, %c0_12] : memref<9x128x128xbf16, #tpu.memory_space<vmem>>, vector<1x128x128xbf16>
    %21 = vector.shape_cast %20 : vector<1x128x128xbf16> to vector<128x128xbf16>
    %cst_13 = arith.constant dense<0.000000e+00> : vector<512x128xf32>
    %22 = tpu.matmul %19, %21, %cst_13 {dimension_numbers = #tpu.dot_dimension_numbers<[1], [0], [0], [1], [0, 0, 1, 1], [], []>} : vector<512x128xbf16>, vector<128x128xbf16>, vector<512x128xf32> -> vector<512x128xf32>
    %23 = vector.extract_strided_slice %0 {offsets = [2, 0], sizes = [1, 128], strides = [1, 1]} : vector<11x128xf32> to vector<1x128xf32>
    %24 = vector.broadcast %23 : vector<1x128xf32> to vector<512x128xf32>
    %25 = arith.addf %22, %24 : vector<512x128xf32>
    %cst_14 = arith.constant 0.000000e+00 : f32
    %26 = vector.broadcast %cst_14 : f32 to vector<512x128xf32>
    %27 = arith.maximumf %25, %26 : vector<512x128xf32>
    %28 = arith.truncf %27 : vector<512x128xf32> to vector<512x128xbf16>
    %c3 = arith.constant 3 : index
    %c0_15 = arith.constant 0 : index
    %c0_16 = arith.constant 0 : index
    %29 = vector.load %arg3[%c3, %c0_15, %c0_16] : memref<9x128x128xbf16, #tpu.memory_space<vmem>>, vector<1x128x128xbf16>
    %30 = vector.shape_cast %29 : vector<1x128x128xbf16> to vector<128x128xbf16>
    %cst_17 = arith.constant dense<0.000000e+00> : vector<512x128xf32>
    %31 = tpu.matmul %28, %30, %cst_17 {dimension_numbers = #tpu.dot_dimension_numbers<[1], [0], [0], [1], [0, 0, 1, 1], [], []>} : vector<512x128xbf16>, vector<128x128xbf16>, vector<512x128xf32> -> vector<512x128xf32>
    %32 = vector.extract_strided_slice %0 {offsets = [3, 0], sizes = [1, 128], strides = [1, 1]} : vector<11x128xf32> to vector<1x128xf32>
    %33 = vector.broadcast %32 : vector<1x128xf32> to vector<512x128xf32>
    %34 = arith.addf %31, %33 : vector<512x128xf32>
    %cst_18 = arith.constant 0.000000e+00 : f32
    %35 = vector.broadcast %cst_18 : f32 to vector<512x128xf32>
    %36 = arith.maximumf %34, %35 : vector<512x128xf32>
    %37 = arith.truncf %36 : vector<512x128xf32> to vector<512x128xbf16>
    %c0_19 = arith.constant 0 : index
    %c0_20 = arith.constant 0 : index
    %38 = vector.load %arg4[%c0_19, %c0_20] : memref<128x256xbf16, #tpu.memory_space<vmem>>, vector<128x256xbf16>
    %cst_21 = arith.constant dense<0.000000e+00> : vector<512x256xf32>
    %39 = tpu.matmul %37, %38, %cst_21 {dimension_numbers = #tpu.dot_dimension_numbers<[1], [0], [0], [1], [0, 0, 1, 1], [], []>} : vector<512x128xbf16>, vector<128x256xbf16>, vector<512x256xf32> -> vector<512x256xf32>
    %40 = vector.extract_strided_slice %39 {offsets = [0, 0], sizes = [512, 128], strides = [1, 1]} : vector<512x256xf32> to vector<512x128xf32>
    %41 = vector.extract_strided_slice %0 {offsets = [4, 0], sizes = [1, 128], strides = [1, 1]} : vector<11x128xf32> to vector<1x128xf32>
    %42 = vector.broadcast %41 : vector<1x128xf32> to vector<512x128xf32>
    %43 = arith.addf %40, %42 : vector<512x128xf32>
    %44 = vector.extract_strided_slice %39 {offsets = [0, 128], sizes = [512, 128], strides = [1, 1]} : vector<512x256xf32> to vector<512x128xf32>
    %45 = vector.extract_strided_slice %0 {offsets = [5, 0], sizes = [1, 128], strides = [1, 1]} : vector<11x128xf32> to vector<1x128xf32>
    %46 = vector.broadcast %45 : vector<1x128xf32> to vector<512x128xf32>
    %47 = arith.addf %44, %46 : vector<512x128xf32>
    %c0_22 = arith.constant 0 : index
    %c0_23 = arith.constant 0 : index
    %48 = vector.load %arg2[%c0_22, %c0_23] : memref<512x128xf32, #tpu.memory_space<vmem>>, vector<512x128xf32>
    %cst_24 = arith.constant 5.000000e-01 : f32
    %49 = vector.broadcast %cst_24 : f32 to vector<512x128xf32>
    %50 = arith.mulf %49, %47 : vector<512x128xf32>
    %51 = math.exp %50 : vector<512x128xf32>
    %52 = arith.mulf %48, %51 : vector<512x128xf32>
    %53 = arith.addf %52, %43 : vector<512x128xf32>
    %c0_25 = arith.constant 0 : index
    %c0_26 = arith.constant 0 : index
    %54 = vector.load %arg7[%c0_25, %c0_26] : memref<512x384xf32, #tpu.memory_space<vmem>>, vector<512x128xf32>
    tpu.vector_store %arg7[%c0_25, %c0_26], %53 {strides = array<i32>} : memref<512x384xf32, #tpu.memory_space<vmem>>, vector<512x128xf32>,
    %c0_27 = arith.constant 0 : index
    %c128 = arith.constant 128 : index
    %55 = vector.load %arg7[%c0_27, %c128] : memref<512x384xf32, #tpu.memory_space<vmem>>, vector<512x128xf32>
    tpu.vector_store %arg7[%c0_27, %c128], %43 {strides = array<i32>} : memref<512x384xf32, #tpu.memory_space<vmem>>, vector<512x128xf32>,
    %c0_28 = arith.constant 0 : index
    %c256 = arith.constant 256 : index
    %56 = vector.load %arg7[%c0_28, %c256] : memref<512x384xf32, #tpu.memory_space<vmem>>, vector<512x128xf32>
    tpu.vector_store %arg7[%c0_28, %c256], %47 {strides = array<i32>} : memref<512x384xf32, #tpu.memory_space<vmem>>, vector<512x128xf32>,
    %57 = arith.truncf %53 : vector<512x128xf32> to vector<512x128xbf16>
    %c4 = arith.constant 4 : index
    %c0_29 = arith.constant 0 : index
    %c0_30 = arith.constant 0 : index
    %58 = vector.load %arg3[%c4, %c0_29, %c0_30] : memref<9x128x128xbf16, #tpu.memory_space<vmem>>, vector<1x128x128xbf16>
    %59 = vector.shape_cast %58 : vector<1x128x128xbf16> to vector<128x128xbf16>
    %cst_31 = arith.constant dense<0.000000e+00> : vector<512x128xf32>
    %60 = tpu.matmul %57, %59, %cst_31 {dimension_numbers = #tpu.dot_dimension_numbers<[1], [0], [0], [1], [0, 0, 1, 1], [], []>} : vector<512x128xbf16>, vector<128x128xbf16>, vector<512x128xf32> -> vector<512x128xf32>
    %61 = vector.extract_strided_slice %0 {offsets = [6, 0], sizes = [1, 128], strides = [1, 1]} : vector<11x128xf32> to vector<1x128xf32>
    %62 = vector.broadcast %61 : vector<1x128xf32> to vector<512x128xf32>
    %63 = arith.addf %60, %62 : vector<512x128xf32>
    %cst_32 = arith.constant 0.000000e+00 : f32
    %64 = vector.broadcast %cst_32 : f32 to vector<512x128xf32>
    %65 = arith.maximumf %63, %64 : vector<512x128xf32>
    %66 = arith.truncf %65 : vector<512x128xf32> to vector<512x128xbf16>
    %c5 = arith.constant 5 : index
    %c0_33 = arith.constant 0 : index
    %c0_34 = arith.constant 0 : index
    %67 = vector.load %arg3[%c5, %c0_33, %c0_34] : memref<9x128x128xbf16, #tpu.memory_space<vmem>>, vector<1x128x128xbf16>
    %68 = vector.shape_cast %67 : vector<1x128x128xbf16> to vector<128x128xbf16>
    %cst_35 = arith.constant dense<0.000000e+00> : vector<512x128xf32>
    %69 = tpu.matmul %66, %68, %cst_35 {dimension_numbers = #tpu.dot_dimension_numbers<[1], [0], [0], [1], [0, 0, 1, 1], [], []>} : vector<512x128xbf16>, vector<128x128xbf16>, vector<512x128xf32> -> vector<512x128xf32>
    %70 = vector.extract_strided_slice %0 {offsets = [7, 0], sizes = [1, 128], strides = [1, 1]} : vector<11x128xf32> to vector<1x128xf32>
    %71 = vector.broadcast %70 : vector<1x128xf32> to vector<512x128xf32>
    %72 = arith.addf %69, %71 : vector<512x128xf32>
    %cst_36 = arith.constant 0.000000e+00 : f32
    %73 = vector.broadcast %cst_36 : f32 to vector<512x128xf32>
    %74 = arith.maximumf %72, %73 : vector<512x128xf32>
    %75 = arith.truncf %74 : vector<512x128xf32> to vector<512x128xbf16>
    %c6 = arith.constant 6 : index
    %c0_37 = arith.constant 0 : index
    %c0_38 = arith.constant 0 : index
    %76 = vector.load %arg3[%c6, %c0_37, %c0_38] : memref<9x128x128xbf16, #tpu.memory_space<vmem>>, vector<1x128x128xbf16>
    %77 = vector.shape_cast %76 : vector<1x128x128xbf16> to vector<128x128xbf16>
    %cst_39 = arith.constant dense<0.000000e+00> : vector<512x128xf32>
    %78 = tpu.matmul %75, %77, %cst_39 {dimension_numbers = #tpu.dot_dimension_numbers<[1], [0], [0], [1], [0, 0, 1, 1], [], []>} : vector<512x128xbf16>, vector<128x128xbf16>, vector<512x128xf32> -> vector<512x128xf32>
    %79 = vector.extract_strided_slice %0 {offsets = [8, 0], sizes = [1, 128], strides = [1, 1]} : vector<11x128xf32> to vector<1x128xf32>
    %80 = vector.broadcast %79 : vector<1x128xf32> to vector<512x128xf32>
    %81 = arith.addf %78, %80 : vector<512x128xf32>
    %cst_40 = arith.constant 0.000000e+00 : f32
    %82 = vector.broadcast %cst_40 : f32 to vector<512x128xf32>
    %83 = arith.maximumf %81, %82 : vector<512x128xf32>
    %84 = arith.truncf %83 : vector<512x128xf32> to vector<512x128xbf16>
    %c7 = arith.constant 7 : index
    %c0_41 = arith.constant 0 : index
    %c0_42 = arith.constant 0 : index
    %85 = vector.load %arg3[%c7, %c0_41, %c0_42] : memref<9x128x128xbf16, #tpu.memory_space<vmem>>, vector<1x128x128xbf16>
    %86 = vector.shape_cast %85 : vector<1x128x128xbf16> to vector<128x128xbf16>
    %cst_43 = arith.constant dense<0.000000e+00> : vector<512x128xf32>
    %87 = tpu.matmul %84, %86, %cst_43 {dimension_numbers = #tpu.dot_dimension_numbers<[1], [0], [0], [1], [0, 0, 1, 1], [], []>} : vector<512x128xbf16>, vector<128x128xbf16>, vector<512x128xf32> -> vector<512x128xf32>
    %88 = vector.extract_strided_slice %0 {offsets = [9, 0], sizes = [1, 128], strides = [1, 1]} : vector<11x128xf32> to vector<1x128xf32>
    %89 = vector.broadcast %88 : vector<1x128xf32> to vector<512x128xf32>
    %90 = arith.addf %87, %89 : vector<512x128xf32>
    %cst_44 = arith.constant 0.000000e+00 : f32
    %91 = vector.broadcast %cst_44 : f32 to vector<512x128xf32>
    %92 = arith.maximumf %90, %91 : vector<512x128xf32>
    %93 = arith.truncf %92 : vector<512x128xf32> to vector<512x128xbf16>
    %c8 = arith.constant 8 : index
    %c0_45 = arith.constant 0 : index
    %c0_46 = arith.constant 0 : index
    %94 = vector.load %arg3[%c8, %c0_45, %c0_46] : memref<9x128x128xbf16, #tpu.memory_space<vmem>>, vector<1x128x128xbf16>
    %95 = vector.shape_cast %94 : vector<1x128x128xbf16> to vector<128x128xbf16>
    %cst_47 = arith.constant dense<0.000000e+00> : vector<512x128xf32>
    %96 = tpu.matmul %93, %95, %cst_47 {dimension_numbers = #tpu.dot_dimension_numbers<[1], [0], [0], [1], [0, 0, 1, 1], [], []>} : vector<512x128xbf16>, vector<128x128xbf16>, vector<512x128xf32> -> vector<512x128xf32>
    %97 = vector.extract_strided_slice %0 {offsets = [10, 0], sizes = [1, 128], strides = [1, 1]} : vector<11x128xf32> to vector<1x128xf32>
    %98 = vector.broadcast %97 : vector<1x128xf32> to vector<512x128xf32>
    %99 = arith.addf %96, %98 : vector<512x128xf32>
    %c0_48 = arith.constant 0 : index
    %c0_49 = arith.constant 0 : index
    %100 = vector.load %arg6[%c0_48, %c0_49] : memref<512x128xf32, #tpu.memory_space<vmem>>, vector<512x128xf32>
    tpu.vector_store %arg6[%c0_48, %c0_49], %99 {strides = array<i32>} : memref<512x128xf32, #tpu.memory_space<vmem>>, vector<512x128xf32>,
    return
  }
  func.func @transform_0(%arg0: i32) -> (i32, i32) {
    %c0_i32 = arith.constant 0 : i32
    %c0_i32_0 = arith.constant 0 : i32
    return %arg0, %c0_i32 : i32, i32
  }
  func.func @transform_1(%arg0: i32) -> (i32, i32) {
    %c0_i32 = arith.constant 0 : i32
    %c0_i32_0 = arith.constant 0 : i32
    return %arg0, %c0_i32 : i32, i32
  }
  func.func @transform_2(%arg0: i32) -> (i32, i32, i32) {
    %c0_i32 = arith.constant 0 : i32
    %c0_i32_0 = arith.constant 0 : i32
    %c0_i32_1 = arith.constant 0 : i32
    %c0_i32_2 = arith.constant 0 : i32
    return %c0_i32, %c0_i32_0, %c0_i32_1 : i32, i32, i32
  }
  func.func @transform_3(%arg0: i32) -> (i32, i32) {
    %c0_i32 = arith.constant 0 : i32
    %c0_i32_0 = arith.constant 0 : i32
    %c0_i32_1 = arith.constant 0 : i32
    return %c0_i32, %c0_i32_0 : i32, i32
  }
  func.func @transform_4(%arg0: i32) -> (i32, i32) {
    %c0_i32 = arith.constant 0 : i32
    %c0_i32_0 = arith.constant 0 : i32
    %c0_i32_1 = arith.constant 0 : i32
    return %c0_i32, %c0_i32_0 : i32, i32
  }
  func.func @transform_5(%arg0: i32) -> (i32, i32) {
    %c0_i32 = arith.constant 0 : i32
    %c0_i32_0 = arith.constant 0 : i32
    return %arg0, %c0_i32 : i32, i32
  }
  func.func @transform_6(%arg0: i32) -> (i32, i32) {
    %c0_i32 = arith.constant 0 : i32
    %c0_i32_0 = arith.constant 0 : i32
    return %arg0, %c0_i32 : i32, i32
  }
}

</mosaic_0001>

<bundles_post_ra>
// kernel: autoencoder_forward.1
= control target key start
LH: loop header
LB: loop body
LE: loop exit
PB: predicated region body
PF: predicated region fallthrough
CT: control target
= control target key end

     0   :  { %s9495_s0 = inlined_call_operand.vmem [shape: bf16[512,128], index: 0, kind: input, shape index: {}]   ;;  %s9496_s1 = inlined_call_operand.vmem [shape: f32[512,128], index: 1, kind: input, shape index: {}]   ;;  %s9497_s2 = inlined_call_operand.vmem [shape: bf16[9,128,128], index: 2, kind: input, shape index: {}]   ;;  %s9498_s3 = inlined_call_operand.vmem [shape: bf16[128,256], index: 3, kind: input, shape index: {}]   ;;  %s9499_s4 = inlined_call_operand.vmem [shape: f32[11,128], index: 4, kind: input, shape index: {}]   ;;  %s9500_s5 = inlined_call_operand.hbm [shape: f32[512,128], index: 5, kind: output, shape index: {0}]   ;;  %s9501_s6 = inlined_call_operand.vmem [shape: f32[512,384], index: 6, kind: output, shape index: {1}]  }
   0x1   :  { %v6896_v0 = vld [vmem:[%s9497_s2 + $0x38] sm:$0xff]   ;;  %v6897_v1 = vld [vmem:[%s9497_s2 + $0x30] sm:$0xff]   ;;  %v6898_v2 = vld [vmem:[%s9497_s2 + $0x28] sm:$0xff]  }
   0x2   :  { %6156 = vmatprep.subr.bf16.mxu0 %v6896_v0  ;;  %6876 = vmatprep.subr.bf16.mxu1 %v6896_v0  ;;  %v6899_v3 = vld [vmem:[%s9497_s2 + $0x20] sm:$0xff]   ;;  %v6900_v5 = vld [vmem:[%s9497_s2 + $0x18] sm:$0xff]   ;;  %v6901_v6 = vld [vmem:[%s9497_s2 + $0x10] sm:$0xff]  }
   0x3   :  { %6157 = vmatpush3.bf16.msra.mxu0 %v6896_v0  ;;  %6884 = vmatpush3.bf16.msra.mxu1 %v6896_v0  ;;  %v6904_v4 = vld [vmem:[%s9495_s0] sm:$0xff]   ;;  %v6902_v7 = vld [vmem:[%s9497_s2 + $0x8] sm:$0xff]   ;;  %v6906_v11 = vld [vmem:[%s9495_s0 + $0x10] sm:$0xff]  }
   0x4   :  { %6158 = vmatprep.subr.bf16.mxu0 %v6897_v1  ;;  %6877 = vmatprep.subr.bf16.mxu1 %v6897_v1  ;;  %v6903_v8 = vld [vmem:[%s9497_s2] sm:$0xff]   ;;  %v6905_v10 = vld [vmem:[%s9495_s0 + $0x8] sm:$0xff]   ;;  %v6922_v13 = vld [vmem:[%s9495_s0 + $0x90] sm:$0xff]  }
   0x5   :  { %6172 = vmatprep.mubr.bf16.mxu0 %v6904_v4  ;;  %v6920_v9 = vld [vmem:[%s9495_s0 + $0x80] sm:$0xff]   ;;  %v6921_v12 = vld [vmem:[%s9495_s0 + $0x88] sm:$0xff]   ;;  %v6928_v14 = vld [vmem:[%s9497_s2 + $0x78] sm:$0xff]  }
   0x6   :  { %6204 = vmatprep.mubr.bf16.mxu1 %v6920_v9  ;;  %v6931_v15 = vld [vmem:[%s9497_s2 + $0x70] sm:$0xff]   ;;  %v6907_v16 = vld [vmem:[%s9495_s0 + $0x18] sm:$0xff]   ;;  %v6908_v17 = vld [vmem:[%s9495_s0 + $0x20] sm:$0xff]  }
   0x7   :  { %6159 = vmatpush3.bf16.msra.mxu0 %v6897_v1  ;;  %6885 = vmatpush3.bf16.msra.mxu1 %v6897_v1  ;;  %v6923_v18 = vld [vmem:[%s9495_s0 + $0x98] sm:$0xff]   ;;  %v6924_v19 = vld [vmem:[%s9495_s0 + $0xa0] sm:$0xff]   ;;  %v6934_v20 = vld [vmem:[%s9497_s2 + $0x68] sm:$0xff]  }
   0x8   :  { %6160 = vmatprep.subr.bf16.mxu0 %v6898_v2  ;;  %6878 = vmatprep.subr.bf16.mxu1 %v6898_v2  ;;  %v6937_v21 = vld [vmem:[%s9497_s2 + $0x60] sm:$0xff]   ;;  %v6909_v22 = vld [vmem:[%s9495_s0 + $0x28] sm:$0xff]   ;;  %v6910_v23 = vld [vmem:[%s9495_s0 + $0x30] sm:$0xff]  }
   0x9   :  { %v6925_v24 = vld [vmem:[%s9495_s0 + $0xa8] sm:$0xff]   ;;  %v6926_v25 = vld [vmem:[%s9495_s0 + $0xb0] sm:$0xff]   ;;  %v6940_v26 = vld [vmem:[%s9497_s2 + $0x58] sm:$0xff]  }
   0xa   :  { %v6941_v27 = vld [vmem:[%s9497_s2 + $0x50] sm:$0xff]   ;;  %v6911_v28 = vld [vmem:[%s9495_s0 + $0x38] sm:$0xff]   ;;  %v6912_v30 = vld [vmem:[%s9495_s0 + $0x40] sm:$0xff]  }
   0xb   :  { %6161 = vmatpush3.bf16.msra.mxu0 %v6898_v2  ;;  %6886 = vmatpush3.bf16.msra.mxu1 %v6898_v2  ;;  %v6927_v29 = vld [vmem:[%s9495_s0 + $0xb8] sm:$0xff]   ;;  %v6929_v31 = vld [vmem:[%s9495_s0 + $0xc0] sm:$0xff]   ;;  %v6942_v32 = vld [vmem:[%s9497_s2 + $0x48] sm:$0xff]  }
   0xc   :  { %6162 = vmatprep.subr.bf16.mxu0 %v6899_v3  ;;  %6879 = vmatprep.subr.bf16.mxu1 %v6899_v3  ;;  %v6913_v33 = vld [vmem:[%s9495_s0 + $0x48] sm:$0xff]   ;;  %v6914_v35 = vld [vmem:[%s9495_s0 + $0x50] sm:$0xff]   ;;  %v6915_v37 = vld [vmem:[%s9495_s0 + $0x58] sm:$0xff]  }
   0xd   :  { %v6930_v34 = vld [vmem:[%s9495_s0 + $0xc8] sm:$0xff]   ;;  %v6932_v36 = vld [vmem:[%s9495_s0 + $0xd0] sm:$0xff]   ;;  %v6933_v38 = vld [vmem:[%s9495_s0 + $0xd8] sm:$0xff]  }
   0xe   :  { %v6916_v39 = vld [vmem:[%s9495_s0 + $0x60] sm:$0xff]   ;;  %v6917_v41 = vld [vmem:[%s9495_s0 + $0x68] sm:$0xff]   ;;  %v6918_v43 = vld [vmem:[%s9495_s0 + $0x70] sm:$0xff]  }
   0xf   :  { %6163 = vmatpush3.bf16.msra.mxu0 %v6899_v3  ;;  %6887 = vmatpush3.bf16.msra.mxu1 %v6899_v3  ;;  %v6935_v40 = vld [vmem:[%s9495_s0 + $0xe0] sm:$0xff]   ;;  %v6936_v42 = vld [vmem:[%s9495_s0 + $0xe8] sm:$0xff]   ;;  %v6938_v44 = vld [vmem:[%s9495_s0 + $0xf0] sm:$0xff]  }
  0x10   :  { %6164 = vmatprep.subr.bf16.mxu0 %v6900_v5  ;;  %6880 = vmatprep.subr.bf16.mxu1 %v6900_v5  ;;  %v6919_v45 = vld [vmem:[%s9495_s0 + $0x78] sm:$0xff]  }
  0x11   :  { %v6939_v46 = vld [vmem:[%s9495_s0 + $0xf8] sm:$0xff]  }
  0x13   :  { %6165 = vmatpush3.bf16.msra.mxu0 %v6900_v5  ;;  %6888 = vmatpush3.bf16.msra.mxu1 %v6900_v5 }
  0x14   :  { %6166 = vmatprep.subr.bf16.mxu0 %v6901_v6  ;;  %6881 = vmatprep.subr.bf16.mxu1 %v6901_v6 }
  0x17   :  { %6167 = vmatpush3.bf16.msra.mxu0 %v6901_v6  ;;  %6889 = vmatpush3.bf16.msra.mxu1 %v6901_v6 }
  0x18   :  { %6168 = vmatprep.subr.bf16.mxu0 %v6902_v7  ;;  %6882 = vmatprep.subr.bf16.mxu1 %v6902_v7 }
  0x1b   :  { %6169 = vmatpush3.bf16.msra.mxu0 %v6902_v7  ;;  %6890 = vmatpush3.bf16.msra.mxu1 %v6902_v7 }
  0x1c   :  { %6170 = vmatprep.subr.bf16.mxu0 %v6903_v8  ;;  %6883 = vmatprep.subr.bf16.mxu1 %v6903_v8 }
  0x1f   :  { %6171 = vmatpush3.bf16.msra.mxu0 %v6903_v8  ;;  %6891 = vmatpush3.bf16.msra.mxu1 %v6903_v8 }
  0x20   :  { %6236 = vmatprep.subr.bf16.mxu1 %v6928_v14 }
  0x22   :  { %6173 = vmatmul.mubr.bf16.vlgmr.msra.gmra.mxu0 %v6905_v10  ;;  %6205 = vmatmul.mubr.bf16.vlgmr.msra.gmra.mxu1 %v6921_v12 }
  0x23   :  { %6176 = vmatprep.mubr.bf16.mxu0 %v6906_v11  ;;  %6208 = vmatprep.mubr.bf16.mxu1 %v6922_v13 }
  0x24   :  { %6237 = vmatpush3.bf16.msra.mxu1 %v6928_v14 }
  0x25   :  { %6238 = vmatprep.subr.bf16.mxu1 %v6931_v15 }
  0x28   :  { %6239 = vmatpush3.bf16.msra.mxu1 %v6931_v15 }
  0x29   :  { %6240 = vmatprep.subr.bf16.mxu1 %v6934_v20 }
  0x2a   :  { %6177 = vmatmul.mubr.bf16.gmra.mxu0 %v6907_v16  ;;  %6209 = vmatmul.mubr.bf16.gmra.mxu1 %v6923_v18 }
  0x2b   :  { %6180 = vmatprep.mubr.bf16.mxu0 %v6908_v17  ;;  %6212 = vmatprep.mubr.bf16.mxu1 %v6924_v19 }
  0x2c   :  { %6241 = vmatpush3.bf16.msra.mxu1 %v6934_v20 }
  0x2d   :  { %6242 = vmatprep.subr.bf16.mxu1 %v6937_v21 }
  0x30   :  { %6243 = vmatpush3.bf16.msra.mxu1 %v6937_v21 }
  0x31   :  { %6244 = vmatprep.subr.bf16.mxu1 %v6940_v26 }
  0x32   :  { %6181 = vmatmul.mubr.bf16.gmra.mxu0 %v6909_v22  ;;  %6213 = vmatmul.mubr.bf16.gmra.mxu1 %v6925_v24 }
  0x33   :  { %6184 = vmatprep.mubr.bf16.mxu0 %v6910_v23  ;;  %6216 = vmatprep.mubr.bf16.mxu1 %v6926_v25 }
  0x34   :  { %6245 = vmatpush3.bf16.msra.mxu1 %v6940_v26 }
  0x35   :  { %6246 = vmatprep.subr.bf16.mxu1 %v6941_v27 }
  0x38   :  { %6247 = vmatpush3.bf16.msra.mxu1 %v6941_v27 }
  0x39   :  { %6248 = vmatprep.subr.bf16.mxu1 %v6942_v32 }
  0x3a   :  { %6185 = vmatmul.mubr.bf16.gmra.mxu0 %v6911_v28  ;;  %6217 = vmatmul.mubr.bf16.gmra.mxu1 %v6927_v29 }
  0x3b   :  { %6188 = vmatprep.mubr.bf16.mxu0 %v6912_v30  ;;  %6220 = vmatprep.mubr.bf16.mxu1 %v6929_v31 }
  0x3c   :  { %6249 = vmatpush3.bf16.msra.mxu1 %v6942_v32 }
  0x42   :  { %6189 = vmatmul.mubr.bf16.gmra.mxu0 %v6913_v33  ;;  %6221 = vmatmul.mubr.bf16.gmra.mxu1 %v6930_v34 }
  0x43   :  { %6192 = vmatprep.mubr.bf16.mxu0 %v6914_v35  ;;  %6224 = vmatprep.mubr.bf16.mxu1 %v6932_v36 }
  0x4a   :  { %6193 = vmatmul.mubr.bf16.gmra.mxu0 %v6915_v37  ;;  %6225 = vmatmul.mubr.bf16.gmra.mxu1 %v6933_v38 }
  0x4b   :  { %6196 = vmatprep.mubr.bf16.mxu0 %v6916_v39  ;;  %6228 = vmatprep.mubr.bf16.mxu1 %v6935_v40 }
  0x52   :  { %6197 = vmatmul.mubr.bf16.gmra.mxu0 %v6917_v41  ;;  %6229 = vmatmul.mubr.bf16.gmra.mxu1 %v6936_v42 }
  0x53   :  { %6200 = vmatprep.mubr.bf16.mxu0 %v6918_v43  ;;  %6232 = vmatprep.mubr.bf16.mxu1 %v6938_v44 }
  0x5a   :  { %6201 = vmatmul.mubr.bf16.gmra.mxu0 %v6919_v45  ;;  %6233 = vmatmul.mubr.bf16.gmra.mxu1 %v6939_v46 }
  0x5b   :  { %12 = vsyncpa [#allocation3], 0  ;;  %v6943_v47 = vld [vmem:[%s9497_s2 + $0x40] sm:$0xff]   ;;  %v6944_v48 = vld [vmem:[%s9497_s2 + $0xb8] sm:$0xff]   ;;  %v106_v50 = vlaneseq }
  0x5c   :  { %6250 = vmatprep.subr.bf16.mxu1 %v6943_v47  ;;  %6316 = vmatprep.subr.bf16.mxu0 %v6944_v48  ;;  %v6945_v49 = vld [vmem:[%s9497_s2 + $0xb0] sm:$0xff]   ;;  %v6946_v51 = vld [vmem:[%s9497_s2 + $0xa8] sm:$0xff]   ;;  %v6947_v54 = vld [vmem:[%s9497_s2 + $0xa0] sm:$0xff]  }
  0x5d   :  { %6251 = vmatpush3.bf16.msra.mxu1 %v6943_v47  ;;  %6317 = vmatpush3.bf16.msra.mxu0 %v6944_v48  ;;  %v7370_v52 = vshrl.u32 %v106_v50, 7  ;;  %v7379_v55 = vld [vmem:[%s9499_s4] sm:$0xff]  ;;  %v6948_v4 = vld [vmem:[%s9497_s2 + $0x98] sm:$0xff]   ;;  %v6949_v5 = vld [vmem:[%s9497_s2 + $0x90] sm:$0xff]  }
  0x5e   :  { %6318 = vmatprep.subr.bf16.mxu0 %v6945_v49  ;;  %v6950_v16 = vld [vmem:[%s9497_s2 + $0x88] sm:$0xff]  }
  0x5f   :  { %v108_v53 = vsub.s32 0, %v7370_v52 }
  0x61   :  { %6319 = vmatpush3.bf16.msra.mxu0 %v6945_v49  ;;  %v7386_v58 = vrot.slane %v7379_v55, %v108_v53 }
  0x62   :  { %6320 = vmatprep.subr.bf16.mxu0 %v6946_v51 }
  0x65   :  { %6321 = vmatpush3.bf16.msra.mxu0 %v6946_v51 }
  0x66   :  { %6322 = vmatprep.subr.bf16.mxu0 %v6947_v54 }
  0x69   :  { %6323 = vmatpush3.bf16.msra.mxu0 %v6947_v54 }
  0x6a   :  { %6324 = vmatprep.subr.bf16.mxu0 %v6948_v4 }
  0x6d   :  { %6325 = vmatpush3.bf16.msra.mxu0 %v6948_v4 }
  0x6e   :  { %6326 = vmatprep.subr.bf16.mxu0 %v6949_v5 }
  0x71   :  { %6327 = vmatpush3.bf16.msra.mxu0 %v6949_v5 }
  0x72   :  { %6328 = vmatprep.subr.bf16.mxu0 %v6950_v16 }
  0x75   :  { %6329 = vmatpush3.bf16.msra.mxu0 %v6950_v16 }
  0xe2   :  { %v6174_v56 = vpop.f32.mrf.mxu0  ;;  %v7381_v57 = vpop.f32.mrf.mxu1 }
  0xe3   :  { %v393_v1 = vadd.f32 %v6174_v56, %v7386_v58 }
  0xe4   :  { %v384_v59 = vpop.f32.mrf.mxu0  ;;  %v7388_v60 = vpop.f32.mrf.mxu1 }
  0xe5   :  { %v385_v63 = vadd.f32 %v384_v59, %v7386_v58  ;;  %v641_v12 = vmax.f32 %v393_v1, 0.0 }
  0xe6   :  { %v6175_v61 = vpop.f32.mrf.mxu0  ;;  %v7390_v62 = vpop.f32.mrf.mxu1 }
  0xe7   :  { %v396_v0 = vadd.f32 %v6175_v61, %v7386_v58  ;;  %v639_v10 = vmax.f32 %v385_v63, 0.0 }
  0xe8   :  { %v387_v2 = vpop.f32.mrf.mxu0  ;;  %v7395_v3 = vpop.f32.mrf.mxu1 }
  0xe9   :  { %v388_v6 = vadd.f32 %v387_v2, %v7386_v58  ;;  %v642_v7 = vmax.f32 %v396_v0, 0.0 }
  0xea   :  { %v6178_v8 = vpop.f32.mrf.mxu0  ;;  %v7404_v9 = vpop.f32.mrf.mxu1 }
  0xeb   :  { %v640_v11 = vmax.f32 %v388_v6, 0.0  ;;  %v409_v13 = vadd.f32 %v6178_v8, %v7386_v58  ;;  %v704_v19 = vpack.c.bf16 %v642_v7, %v641_v12 }
  0xec   :  { %v400_v14 = vpop.f32.mrf.mxu0  ;;  %v7407_v15 = vpop.f32.mrf.mxu1 }
  0xed   :  { %v401_v17 = vadd.f32 %v400_v14, %v7386_v58  ;;  %v703_v18 = vpack.c.bf16 %v640_v11, %v639_v10  ;;  %v645_v22 = vmax.f32 %v409_v13, 0.0 }
  0xee   :  { %v6179_v20 = vpop.f32.mrf.mxu0  ;;  %v7414_v24 = vpop.f32.mrf.mxu1 }
  0xef   :  { %v412_v21 = vadd.f32 %v6179_v20, %v7386_v58  ;;  %6252 = vmatprep.mubr.bf16.mxu1 %v703_v18  ;;  %v643_v25 = vmax.f32 %v401_v17, 0.0 }
  0xf0   :  { %v403_v23 = vpop.f32.mrf.mxu0  ;;  %6253 = vmatmul.mubr.bf16.vlgmr.msra.gmra.mxu1 %v704_v19  ;;  %v7418_v33 = vpop.f32.mrf.mxu1 }
  0xf1   :  { %v646_v26 = vmax.f32 %v412_v21, 0.0  ;;  %v404_v27 = vadd.f32 %v403_v23, %v7386_v58 }
  0xf2   :  { %v6182_v28 = vpop.f32.mrf.mxu0  ;;  %v7421_v37 = vpop.f32.mrf.mxu1 }
  0xf3   :  { %v644_v29 = vmax.f32 %v404_v27, 0.0  ;;  %v706_v30 = vpack.c.bf16 %v646_v26, %v645_v22  ;;  %v425_v31 = vadd.f32 %v6182_v28, %v7386_v58 }
  0xf4   :  { %v416_v32 = vpop.f32.mrf.mxu0  ;;  %v7425_v45 = vpop.f32.mrf.mxu1 }
  0xf5   :  { %v417_v34 = vadd.f32 %v416_v32, %v7386_v58  ;;  %v705_v35 = vpack.c.bf16 %v644_v29, %v643_v25  ;;  %v649_v39 = vmax.f32 %v425_v31, 0.0 }
  0xf6   :  { %v6183_v36 = vpop.f32.mrf.mxu0  ;;  %v7429_v56 = vpop.f32.mrf.mxu1 }
  0xf7   :  { %v428_v38 = vadd.f32 %v6183_v36, %v7386_v58  ;;  %6256 = vmatprep.mubr.bf16.mxu1 %v705_v35  ;;  %v647_v41 = vmax.f32 %v417_v34, 0.0 }
  0xf8   :  { %v419_v40 = vpop.f32.mrf.mxu0  ;;  %6257 = vmatmul.mubr.bf16.gmra.mxu1 %v706_v30  ;;  %v7433_v5 = vpop.f32.mrf.mxu1 }
  0xf9   :  { %v650_v42 = vmax.f32 %v428_v38, 0.0  ;;  %v420_v43 = vadd.f32 %v419_v40, %v7386_v58 }
  0xfa   :  { %v6186_v44 = vpop.f32.mrf.mxu0  ;;  %v7437_v14 = vpop.f32.mrf.mxu1 }
  0xfb   :  { %v648_v46 = vmax.f32 %v420_v43, 0.0  ;;  %v708_v47 = vpack.c.bf16 %v650_v42, %v649_v39  ;;  %v441_v48 = vadd.f32 %v6186_v44, %v7386_v58 }
  0xfc   :  { %v432_v49 = vpop.f32.mrf.mxu0  ;;  %v7441_v23 = vpop.f32.mrf.mxu1 }
  0xfd   :  { %v433_v50 = vadd.f32 %v432_v49, %v7386_v58  ;;  %v707_v51 = vpack.c.bf16 %v648_v46, %v647_v41  ;;  %v653_v61 = vmax.f32 %v441_v48, 0.0 }
  0xfe   :  { %v6187_v54 = vpop.f32.mrf.mxu0  ;;  %v7445_v32 = vpop.f32.mrf.mxu1 }
  0xff   :  { %v444_v59 = vadd.f32 %v6187_v54, %v7386_v58  ;;  %6260 = vmatprep.mubr.bf16.mxu1 %v707_v51  ;;  %v651_v0 = vmax.f32 %v433_v50, 0.0 }
 0x100   :  { %v435_v63 = vpop.f32.mrf.mxu0  ;;  %6261 = vmatmul.mubr.bf16.gmra.mxu1 %v708_v47  ;;  %v7449_v42 = vpop.f32.mrf.mxu1 }
 0x101   :  { %v654_v1 = vmax.f32 %v444_v59, 0.0  ;;  %v436_v2 = vadd.f32 %v435_v63, %v7386_v58 }
 0x102   :  { %v6190_v4 = vpop.f32.mrf.mxu0  ;;  %v7453_v51 = vpop.f32.mrf.mxu1 }
 0x103   :  { %v652_v6 = vmax.f32 %v436_v2, 0.0  ;;  %v710_v7 = vpack.c.bf16 %v654_v1, %v653_v61  ;;  %v457_v8 = vadd.f32 %v6190_v4, %v7386_v58 }
 0x104   :  { %v448_v10 = vpop.f32.mrf.mxu0  ;;  %v7457_v4 = vpop.f32.mrf.mxu1 }
 0x105   :  { %v709_v11 = vpack.c.bf16 %v652_v6, %v651_v0  ;;  %v449_v12 = vadd.f32 %v448_v10, %v7386_v58  ;;  %v657_v17 = vmax.f32 %v457_v8, 0.0 }
 0x106   :  { %v6191_v13 = vpop.f32.mrf.mxu0 }
 0x107   :  { %6264 = vmatprep.mubr.bf16.mxu1 %v709_v11  ;;  %v460_v16 = vadd.f32 %v6191_v13, %v7386_v58  ;;  %v655_v19 = vmax.f32 %v449_v12, 0.0  ;;  %v513_v11 = vadd.f32 %v7388_v60, %v7386_v58 }
 0x108   :  { %6265 = vmatmul.mubr.bf16.gmra.mxu1 %v710_v7  ;;  %v451_v18 = vpop.f32.mrf.mxu0 }
 0x109   :  { %v658_v20 = vmax.f32 %v460_v16, 0.0  ;;  %v452_v21 = vadd.f32 %v451_v18, %v7386_v58  ;;  %v516_v16 = vadd.f32 %v7395_v3, %v7386_v58  ;;  %v7465_v18 = vpop.f32.mrf.mxu1  ;;  %v521_v3 = vadd.f32 %v7381_v57, %v7386_v58 }
 0x10a   :  { %v6194_v22 = vpop.f32.mrf.mxu0 }
 0x10b   :  { %v656_v25 = vmax.f32 %v452_v21, 0.0  ;;  %v712_v26 = vpack.c.bf16 %v658_v20, %v657_v17  ;;  %v473_v27 = vadd.f32 %v6194_v22, %v7386_v58  ;;  %v671_v22 = vmax.f32 %v513_v11, 0.0 }
 0x10c   :  { %v464_v28 = vpop.f32.mrf.mxu0 }
 0x10d   :  { %v711_v29 = vpack.c.bf16 %v656_v25, %v655_v19  ;;  %v465_v30 = vadd.f32 %v464_v28, %v7386_v58  ;;  %v661_v35 = vmax.f32 %v473_v27, 0.0  ;;  %v672_v27 = vmax.f32 %v516_v16, 0.0  ;;  %v579_v28 = vpop.f32.mrf.mxu1 }
 0x10e   :  { %v6195_v31 = vpop.f32.mrf.mxu0  ;;  %v580_v16 = vadd.f32 %v579_v28, %v7386_v58 }
 0x10f   :  { %6268 = vmatprep.mubr.bf16.mxu1 %v711_v29  ;;  %v476_v34 = vadd.f32 %v6195_v31, %v7386_v58  ;;  %v659_v38 = vmax.f32 %v465_v30, 0.0  ;;  %v524_v31 = vadd.f32 %v7390_v62, %v7386_v58  ;;  %v537_v62 = vadd.f32 %v7404_v9, %v7386_v58 }
 0x110   :  { %6269 = vmatmul.mubr.bf16.gmra.mxu1 %v712_v26  ;;  %v467_v36 = vpop.f32.mrf.mxu0  ;;  %v553_v9 = vadd.f32 %v7421_v37, %v7386_v58 }
 0x111   :  { %v662_v39 = vmax.f32 %v476_v34, 0.0  ;;  %v468_v40 = vadd.f32 %v467_v36, %v7386_v58  ;;  %v529_v36 = vadd.f32 %v7407_v15, %v7386_v58  ;;  %v540_v15 = vadd.f32 %v7414_v24, %v7386_v58 }
 0x112   :  { %v6198_v41 = vpop.f32.mrf.mxu0  ;;  %v556_v24 = vadd.f32 %v7429_v56, %v7386_v58 }
 0x113   :  { %v660_v43 = vmax.f32 %v468_v40, 0.0  ;;  %v714_v44 = vpack.c.bf16 %v662_v39, %v661_v35  ;;  %v489_v46 = vadd.f32 %v6198_v41, %v7386_v58  ;;  %v719_v35 = vpack.c.bf16 %v672_v27, %v671_v22  ;;  %v7477_v39 = vpop.f32.mrf.mxu1 }
 0x114   :  { %v480_v47 = vpop.f32.mrf.mxu0  ;;  %v673_v40 = vmax.f32 %v521_v3, 0.0  ;;  %v674_v41 = vmax.f32 %v524_v31, 0.0  ;;  %v688_v22 = vmax.f32 %v580_v16, 0.0 }
 0x115   :  { %v713_v48 = vpack.c.bf16 %v660_v43, %v659_v38  ;;  %v481_v49 = vadd.f32 %v480_v47, %v7386_v58  ;;  %v665_v59 = vmax.f32 %v489_v46, 0.0  ;;  %v532_v38 = vadd.f32 %v7418_v33, %v7386_v58 }
 0x116   :  { %v6199_v50 = vpop.f32.mrf.mxu0  ;;  %v675_v43 = vmax.f32 %v529_v36, 0.0  ;;  %v720_v46 = vpack.c.bf16 %v674_v41, %v673_v40  ;;  %v545_v33 = vadd.f32 %v7425_v45, %v7386_v58  ;;  %v561_v45 = vadd.f32 %v7441_v23, %v7386_v58 }
 0x117   :  { %6272 = vmatprep.mubr.bf16.mxu1 %v713_v48  ;;  %v492_v54 = vadd.f32 %v6199_v50, %v7386_v58  ;;  %v663_v63 = vmax.f32 %v481_v49, 0.0  ;;  %v676_v57 = vmax.f32 %v532_v38, 0.0  ;;  %v548_v48 = vadd.f32 %v7433_v5, %v7386_v58 }
 0x118   :  { %6273 = vmatmul.mubr.bf16.gmra.mxu1 %v714_v44  ;;  %v483_v61 = vpop.f32.mrf.mxu0  ;;  %v592_v44 = vpop.f32.mrf.mxu1  ;;  %v677_v50 = vmax.f32 %v537_v62, 0.0  ;;  %v564_v5 = vadd.f32 %v7449_v42, %v7386_v58  ;;  %v569_v23 = vadd.f32 %v7437_v14, %v7386_v58  ;;  %v572_v42 = vadd.f32 %v7445_v32, %v7386_v58 }
 0x119   :  { %v666_v0 = vmax.f32 %v492_v54, 0.0  ;;  %v484_v1 = vadd.f32 %v483_v61, %v7386_v58  ;;  %v721_v47 = vpack.c.bf16 %v676_v57, %v675_v43  ;;  %v678_v54 = vmax.f32 %v540_v15, 0.0 }
 0x11a   :  { %v6202_v2 = vpop.f32.mrf.mxu0  ;;  %v6227_v49 = vpop.f32.mrf.mxu1  ;;  %v680_v61 = vmax.f32 %v548_v48, 0.0  ;;  %v684_v37 = vmax.f32 %v564_v5, 0.0  ;;  %v585_v14 = vadd.f32 %v7453_v51, %v7386_v58  ;;  %v588_v32 = vadd.f32 %v7465_v18, %v7386_v58 }
 0x11b   :  { %v664_v6 = vmax.f32 %v484_v1, 0.0  ;;  %v716_v7 = vpack.c.bf16 %v666_v0, %v665_v59  ;;  %v505_v8 = vadd.f32 %v6202_v2, %v7386_v58  ;;  %v679_v59 = vmax.f32 %v545_v33, 0.0 }
 0x11c   :  { %v496_v10 = vpop.f32.mrf.mxu0  ;;  %v722_v0 = vpack.c.bf16 %v678_v54, %v677_v50  ;;  %v601_v51 = vadd.f32 %v7477_v39, %v7386_v58  ;;  %v604_v36 = vadd.f32 %v6227_v49, %v7386_v58 }
 0x11d   :  { %v715_v12 = vpack.c.bf16 %v664_v6, %v663_v63  ;;  %v497_v13 = vadd.f32 %v496_v10, %v7386_v58  ;;  %v669_v20 = vmax.f32 %v505_v8, 0.0  ;;  %v595_v63 = vpop.f32.mrf.mxu1  ;;  %v723_v1 = vpack.c.bf16 %v680_v61, %v679_v59  ;;  %v6951_v8 = vld [vmem:[%s9497_s2 + $0x80] sm:$0xff]  }
 0x11e   :  { %v6203_v17 = vpop.f32.mrf.mxu0  ;;  %v681_v6 = vmax.f32 %v553_v9, 0.0  ;;  %v683_v10 = vmax.f32 %v561_v45, 0.0  ;;  %6330 = vmatprep.subr.bf16.mxu0 %v6951_v8  ;;  %v596_v27 = vadd.f32 %v595_v63, %v7386_v58  ;;  %v693_v43 = vmax.f32 %v601_v51, 0.0 }
 0x11f   :  { %6276 = vmatprep.mubr.bf16.mxu1 %v715_v12  ;;  %v508_v19 = vadd.f32 %v6203_v17, %v7386_v58  ;;  %v667_v25 = vmax.f32 %v497_v13, 0.0  ;;  %v6230_v2 = vpop.f32.mrf.mxu1  ;;  %6331 = vmatpush3.bf16.msra.mxu0 %v6951_v8  ;;  %v577_v12 = vadd.f32 %v7457_v4, %v7386_v58  ;;  %v593_v4 = vadd.f32 %v592_v44, %v7386_v58  ;;  %v6956_v8 = vld [vmem:[%s9497_s2 + $0xd8] sm:$0xff]  }
 0x120   :  { %6277 = vmatmul.mubr.bf16.gmra.mxu1 %v716_v7  ;;  %v499_v21 = vpop.f32.mrf.mxu0  ;;  %v682_v7 = vmax.f32 %v556_v24, 0.0  ;;  %v725_v13 = vpack.c.bf16 %v684_v37, %v683_v10  ;;  %v692_v31 = vmax.f32 %v596_v27, 0.0  ;;  %v694_v57 = vmax.f32 %v604_v36, 0.0  ;;  %v6957_v10 = vld [vmem:[%s9497_s2 + $0xd0] sm:$0xff]  }
 0x121   :  { %v670_v26 = vmax.f32 %v508_v19, 0.0  ;;  %v500_v60 = vadd.f32 %v499_v21, %v7386_v58  ;;  %v608_v11 = vpop.f32.mrf.mxu1  ;;  %v685_v19 = vmax.f32 %v569_v23, 0.0  ;;  %v687_v21 = vmax.f32 %v577_v12, 0.0 }
 0x122   :  { %v724_v56 = vpack.c.bf16 %v682_v7, %v681_v6  ;;  %v691_v3 = vmax.f32 %v593_v4, 0.0  ;;  %v609_v18 = vadd.f32 %v608_v11, %v7386_v58  ;;  %v730_v15 = vpack.c.bf16 %v694_v57, %v693_v43  ;;  %v6953_v6 = vld [vmem:[%s9497_s2 + $0xf0] sm:$0xff]   ;;  %v6955_v7 = vld [vmem:[%s9497_s2 + $0xe0] sm:$0xff]  }
 0x123   :  { %v668_v29 = vmax.f32 %v500_v60, 0.0  ;;  %v718_v30 = vpack.c.bf16 %v670_v26, %v669_v20  ;;  %v6231_v17 = vpop.f32.mrf.mxu1  ;;  %v686_v20 = vmax.f32 %v572_v42, 0.0  ;;  %v727_v60 = vpack.c.bf16 %v688_v22, %v687_v21 }
 0x124   :  { %v729_v38 = vpack.c.bf16 %v692_v31, %v691_v3  ;;  %v695_v44 = vmax.f32 %v609_v18, 0.0  ;;  %v620_v39 = vadd.f32 %v6231_v17, %v7386_v58  ;;  %v754_v37 = vsub.s32 1, %v7370_v52 }
 0x125   :  { %v717_v34 = vpack.c.bf16 %v668_v29, %v667_v25  ;;  %v611_v25 = vpop.f32.mrf.mxu1  ;;  %v726_v26 = vpack.c.bf16 %v686_v20, %v685_v19  ;;  %v689_v29 = vmax.f32 %v585_v14, 0.0  ;;  %v6958_v19 = vld [vmem:[%s9497_s2 + $0xc8] sm:$0xff]   ;;  %v6959_v20 = vld [vmem:[%s9497_s2 + $0xc0] sm:$0xff]  }
 0x126   :  { %v612_v40 = vadd.f32 %v611_v25, %v7386_v58  ;;  %v698_v54 = vmax.f32 %v620_v39, 0.0 }
 0x127   :  { %6280 = vmatprep.mubr.bf16.mxu1 %v717_v34  ;;  %v6234_v28 = vpop.f32.mrf.mxu1 }
 0x128   :  { %6281 = vmatmul.mubr.bf16.gmra.mxu1 %v718_v30  ;;  %v690_v30 = vmax.f32 %v588_v32, 0.0 }
 0x129   :  { %6284 = vmatprep.mubr.bf16.mxu1 %v719_v35  ;;  %v624_v34 = vpop.f32.mrf.mxu1 }
 0x12a   :  { %v728_v35 = vpack.c.bf16 %v690_v30, %v689_v29  ;;  %v625_v33 = vadd.f32 %v624_v34, %v7386_v58 }
 0x12b   :  { %v6235_v41 = vpop.f32.mrf.mxu1 }
 0x12c   :  { %v699_v59 = vmax.f32 %v625_v33, 0.0  ;;  %v636_v9 = vadd.f32 %v6235_v41, %v7386_v58 }
 0x12d   :  { %v627_v62 = vpop.f32.mrf.mxu1 }
 0x12e   :  { %v628_v49 = vadd.f32 %v627_v62, %v7386_v58 }
 0x130   :  { %6285 = vmatmul.mubr.bf16.gmra.mxu1 %v720_v46  ;;  %v696_v46 = vmax.f32 %v612_v40, 0.0  ;;  %v700_v61 = vmax.f32 %v628_v49, 0.0 }
 0x131   :  { %6288 = vmatprep.mubr.bf16.mxu1 %v721_v47  ;;  %v617_v47 = vadd.f32 %v6230_v2, %v7386_v58  ;;  %v6952_v2 = vld [vmem:[%s9497_s2 + $0xf8] sm:$0xff]  }
 0x132   :  { %v731_v48 = vpack.c.bf16 %v696_v46, %v695_v44  ;;  %v733_v24 = vpack.c.bf16 %v700_v61, %v699_v59  ;;  %6396 = vmatprep.subr.bf16.mxu1 %v6952_v2 }
 0x133   :  { %v697_v50 = vmax.f32 %v617_v47, 0.0  ;;  %6397 = vmatpush3.bf16.msra.mxu1 %v6952_v2 }
 0x134   :  { %6398 = vmatprep.subr.bf16.mxu1 %v6953_v6 }
 0x135   :  { %v732_v63 = vpack.c.bf16 %v698_v54, %v697_v50 }
 0x137   :  { %6399 = vmatpush3.bf16.msra.mxu1 %v6953_v6 }
 0x138   :  { %6289 = vmatmul.mubr.bf16.gmra.mxu1 %v722_v0  ;;  %v633_v0 = vadd.f32 %v6234_v28, %v7386_v58  ;;  %v6954_v58 = vld [vmem:[%s9497_s2 + $0xe8] sm:$0xff]  }
 0x139   :  { %6292 = vmatprep.mubr.bf16.mxu1 %v723_v1  ;;  %v702_v1 = vmax.f32 %v636_v9, 0.0  ;;  %6400 = vmatprep.subr.bf16.mxu1 %v6954_v58 }
 0x13a   :  { %v701_v45 = vmax.f32 %v633_v0, 0.0 }
 0x13b   :  { %6401 = vmatpush3.bf16.msra.mxu1 %v6954_v58 }
 0x13c   :  { %v734_v5 = vpack.c.bf16 %v702_v1, %v701_v45  ;;  %6402 = vmatprep.subr.bf16.mxu1 %v6955_v7 }
 0x13f   :  { %6403 = vmatpush3.bf16.msra.mxu1 %v6955_v7 }
 0x140   :  { %6293 = vmatmul.mubr.bf16.gmra.mxu1 %v724_v56  ;;  %6404 = vmatprep.subr.bf16.mxu1 %v6956_v8  ;;  %v7544_v56 = vrot.slane %v7379_v55, %v754_v37 }
 0x141   :  { %6296 = vmatprep.mubr.bf16.mxu1 %v725_v13 }
 0x143   :  { %6405 = vmatpush3.bf16.msra.mxu1 %v6956_v8 }
 0x144   :  { %6406 = vmatprep.subr.bf16.mxu1 %v6957_v10 }
 0x147   :  { %6407 = vmatpush3.bf16.msra.mxu1 %v6957_v10 }
 0x148   :  { %6297 = vmatmul.mubr.bf16.gmra.mxu1 %v726_v26  ;;  %6408 = vmatprep.subr.bf16.mxu1 %v6958_v19 }
 0x149   :  { %6300 = vmatprep.mubr.bf16.mxu1 %v727_v60 }
 0x14b   :  { %6409 = vmatpush3.bf16.msra.mxu1 %v6958_v19 }
 0x14c   :  { %6410 = vmatprep.subr.bf16.mxu1 %v6959_v20 }
 0x14f   :  { %6411 = vmatpush3.bf16.msra.mxu1 %v6959_v20 }
 0x150   :  { %6301 = vmatmul.mubr.bf16.gmra.mxu1 %v728_v35 }
 0x151   :  { %6304 = vmatprep.mubr.bf16.mxu1 %v729_v38 }
 0x158   :  { %6305 = vmatmul.mubr.bf16.gmra.mxu1 %v730_v15 }
 0x159   :  { %6308 = vmatprep.mubr.bf16.mxu1 %v731_v48 }
 0x160   :  { %6309 = vmatmul.mubr.bf16.gmra.mxu1 %v732_v63 }
 0x161   :  { %6312 = vmatprep.mubr.bf16.mxu1 %v733_v24 }
 0x168   :  { %6313 = vmatmul.mubr.bf16.gmra.mxu1 %v734_v5 }
 0x1b0   :  { %v6254_v11 = vpop.f32.mrf.mxu1 }
 0x1b1   :  { %v847_v16 = vadd.f32 %v6254_v11, %v7544_v56 }
 0x1b2   :  { %v838_v23 = vpop.f32.mrf.mxu1 }
 0x1b3   :  { %v839_v12 = vadd.f32 %v838_v23, %v7544_v56  ;;  %v1095_v14 = vmax.f32 %v847_v16, 0.0 }
 0x1b4   :  { %v6255_v42 = vpop.f32.mrf.mxu1 }
 0x1b5   :  { %v850_v13 = vadd.f32 %v6255_v42, %v7544_v56  ;;  %v1093_v25 = vmax.f32 %v839_v12, 0.0 }
 0x1b6   :  { %v841_v17 = vpop.f32.mrf.mxu1 }
 0x1b7   :  { %v842_v55 = vadd.f32 %v841_v17, %v7544_v56  ;;  %v1096_v21 = vmax.f32 %v850_v13, 0.0 }
 0x1b8   :  { %v6258_v22 = vpop.f32.mrf.mxu1 }
 0x1b9   :  { %v1094_v26 = vmax.f32 %v842_v55, 0.0  ;;  %v1158_v60 = vpack.c.bf16 %v1096_v21, %v1095_v14  ;;  %v863_v30 = vadd.f32 %v6258_v22, %v7544_v56 }
 0x1ba   :  { %v854_v32 = vpop.f32.mrf.mxu1 }
 0x1bb   :  { %v1157_v4 = vpack.c.bf16 %v1094_v26, %v1093_v25  ;;  %v855_v28 = vadd.f32 %v854_v32, %v7544_v56  ;;  %v1099_v18 = vmax.f32 %v863_v30, 0.0 }
 0x1bc   :  { %v6259_v27 = vpop.f32.mrf.mxu1 }
 0x1bd   :  { %v866_v29 = vadd.f32 %v6259_v27, %v7544_v56  ;;  %6332 = vmatprep.mubr.bf16.mxu0 %v1157_v4  ;;  %v1097_v51 = vmax.f32 %v855_v28, 0.0 }
 0x1be   :  { %v857_v3 = vpop.f32.mrf.mxu1  ;;  %6333 = vmatmul.mubr.bf16.vlgmr.msra.gmra.mxu0 %v1158_v60 }
 0x1bf   :  { %v858_v31 = vadd.f32 %v857_v3, %v7544_v56  ;;  %v1100_v34 = vmax.f32 %v866_v29, 0.0 }
 0x1c0   :  { %v6262_v35 = vpop.f32.mrf.mxu1 }
 0x1c1   :  { %v1098_v36 = vmax.f32 %v858_v31, 0.0  ;;  %v879_v38 = vadd.f32 %v6262_v35, %v7544_v56  ;;  %v1160_v57 = vpack.c.bf16 %v1100_v34, %v1099_v18 }
 0x1c2   :  { %v870_v40 = vpop.f32.mrf.mxu1 }
 0x1c3   :  { %v871_v41 = vadd.f32 %v870_v40, %v7544_v56  ;;  %v1159_v43 = vpack.c.bf16 %v1098_v36, %v1097_v51  ;;  %v1103_v62 = vmax.f32 %v879_v38, 0.0 }
 0x1c4   :  { %v6263_v44 = vpop.f32.mrf.mxu1 }
 0x1c5   :  { %v882_v46 = vadd.f32 %v6263_v44, %v7544_v56  ;;  %6336 = vmatprep.mubr.bf16.mxu0 %v1159_v43  ;;  %v1101_v47 = vmax.f32 %v871_v41, 0.0 }
 0x1c6   :  { %v873_v15 = vpop.f32.mrf.mxu1  ;;  %6337 = vmatmul.mubr.bf16.gmra.mxu0 %v1160_v57 }
 0x1c7   :  { %v1104_v39 = vmax.f32 %v882_v46, 0.0  ;;  %v874_v33 = vadd.f32 %v873_v15, %v7544_v56 }
 0x1c8   :  { %v6266_v48 = vpop.f32.mrf.mxu1 }
 0x1c9   :  { %v1102_v49 = vmax.f32 %v874_v33, 0.0  ;;  %v1162_v50 = vpack.c.bf16 %v1104_v39, %v1103_v62  ;;  %v895_v54 = vadd.f32 %v6266_v48, %v7544_v56 }
 0x1ca   :  { %v886_v59 = vpop.f32.mrf.mxu1 }
 0x1cb   :  { %v887_v61 = vadd.f32 %v886_v59, %v7544_v56  ;;  %v1161_v63 = vpack.c.bf16 %v1102_v49, %v1101_v47  ;;  %v1107_v24 = vmax.f32 %v895_v54, 0.0 }
 0x1cc   :  { %v6267_v0 = vpop.f32.mrf.mxu1 }
 0x1cd   :  { %v898_v9 = vadd.f32 %v6267_v0, %v7544_v56  ;;  %6340 = vmatprep.mubr.bf16.mxu0 %v1161_v63  ;;  %v1105_v1 = vmax.f32 %v887_v61, 0.0 }
 0x1ce   :  { %v889_v45 = vpop.f32.mrf.mxu1  ;;  %6341 = vmatmul.mubr.bf16.gmra.mxu0 %v1162_v50 }
 0x1cf   :  { %v1108_v5 = vmax.f32 %v898_v9, 0.0  ;;  %v890_v2 = vadd.f32 %v889_v45, %v7544_v56 }
 0x1d0   :  { %v6270_v6 = vpop.f32.mrf.mxu1 }
 0x1d1   :  { %v1106_v58 = vmax.f32 %v890_v2, 0.0  ;;  %v1164_v7 = vpack.c.bf16 %v1108_v5, %v1107_v24  ;;  %v911_v8 = vadd.f32 %v6270_v6, %v7544_v56 }
 0x1d2   :  { %v902_v10 = vpop.f32.mrf.mxu1 }
 0x1d3   :  { %v1163_v11 = vpack.c.bf16 %v1106_v58, %v1105_v1  ;;  %v903_v23 = vadd.f32 %v902_v10, %v7544_v56  ;;  %v1111_v13 = vmax.f32 %v911_v8, 0.0 }
 0x1d4   :  { %v6271_v42 = vpop.f32.mrf.mxu1 }
 0x1d5   :  { %6344 = vmatprep.mubr.bf16.mxu0 %v1163_v11  ;;  %v914_v12 = vadd.f32 %v6271_v42, %v7544_v56  ;;  %v1109_v17 = vmax.f32 %v903_v23, 0.0 }
 0x1d6   :  { %6345 = vmatmul.mubr.bf16.gmra.mxu0 %v1164_v7  ;;  %v905_v16 = vpop.f32.mrf.mxu1 }
 0x1d7   :  { %v1112_v19 = vmax.f32 %v914_v12, 0.0  ;;  %v906_v20 = vadd.f32 %v905_v16, %v7544_v56 }
 0x1d8   :  { %v6274_v55 = vpop.f32.mrf.mxu1 }
 0x1d9   :  { %v1110_v21 = vmax.f32 %v906_v20, 0.0  ;;  %v1166_v22 = vpack.c.bf16 %v1112_v19, %v1111_v13  ;;  %v927_v25 = vadd.f32 %v6274_v55, %v7544_v56 }
 0x1da   :  { %v918_v26 = vpop.f32.mrf.mxu1 }
 0x1db   :  { %v1165_v14 = vpack.c.bf16 %v1110_v21, %v1109_v17  ;;  %v919_v32 = vadd.f32 %v918_v26, %v7544_v56  ;;  %v1115_v27 = vmax.f32 %v927_v25, 0.0 }
 0x1dc   :  { %v6275_v4 = vpop.f32.mrf.mxu1 }
 0x1dd   :  { %6348 = vmatprep.mubr.bf16.mxu0 %v1165_v14  ;;  %v930_v60 = vadd.f32 %v6275_v4, %v7544_v56  ;;  %v1113_v29 = vmax.f32 %v919_v32, 0.0 }
 0x1de   :  { %6349 = vmatmul.mubr.bf16.gmra.mxu0 %v1166_v22  ;;  %v921_v28 = vpop.f32.mrf.mxu1 }
 0x1df   :  { %v1116_v30 = vmax.f32 %v930_v60, 0.0  ;;  %v922_v3 = vadd.f32 %v921_v28, %v7544_v56 }
 0x1e0   :  { %v6278_v31 = vpop.f32.mrf.mxu1 }
 0x1e1   :  { %v1114_v34 = vmax.f32 %v922_v3, 0.0  ;;  %v1168_v35 = vpack.c.bf16 %v1116_v30, %v1115_v27  ;;  %v943_v51 = vadd.f32 %v6278_v31, %v7544_v56 }
 0x1e2   :  { %v934_v36 = vpop.f32.mrf.mxu1 }
 0x1e3   :  { %v1167_v18 = vpack.c.bf16 %v1114_v34, %v1113_v29  ;;  %v935_v38 = vadd.f32 %v934_v36, %v7544_v56  ;;  %v1119_v43 = vmax.f32 %v943_v51, 0.0 }
 0x1e4   :  { %v6279_v40 = vpop.f32.mrf.mxu1 }
 0x1e5   :  { %6352 = vmatprep.mubr.bf16.mxu0 %v1167_v18  ;;  %v946_v41 = vadd.f32 %v6279_v40, %v7544_v56  ;;  %v1117_v44 = vmax.f32 %v935_v38, 0.0 }
 0x1e6   :  { %6353 = vmatmul.mubr.bf16.gmra.mxu0 %v1168_v35  ;;  %v937_v57 = vpop.f32.mrf.mxu1 }
 0x1e7   :  { %v1120_v46 = vmax.f32 %v946_v41, 0.0  ;;  %v938_v62 = vadd.f32 %v937_v57, %v7544_v56 }
 0x1e8   :  { %v6282_v15 = vpop.f32.mrf.mxu1 }
 0x1e9   :  { %v1118_v47 = vmax.f32 %v938_v62, 0.0  ;;  %v1170_v39 = vpack.c.bf16 %v1120_v46, %v1119_v43  ;;  %v959_v33 = vadd.f32 %v6282_v15, %v7544_v56 }
 0x1ea   :  { %v950_v48 = vpop.f32.mrf.mxu1 }
 0x1eb   :  { %v1169_v49 = vpack.c.bf16 %v1118_v47, %v1117_v44  ;;  %v951_v50 = vadd.f32 %v950_v48, %v7544_v56  ;;  %v1123_v61 = vmax.f32 %v959_v33, 0.0 }
 0x1ec   :  { %v6283_v54 = vpop.f32.mrf.mxu1 }
 0x1ed   :  { %6356 = vmatprep.mubr.bf16.mxu0 %v1169_v49  ;;  %v962_v59 = vadd.f32 %v6283_v54, %v7544_v56  ;;  %v1121_v0 = vmax.f32 %v951_v50, 0.0 }
 0x1ee   :  { %6357 = vmatmul.mubr.bf16.gmra.mxu0 %v1170_v39  ;;  %v953_v63 = vpop.f32.mrf.mxu1 }
 0x1ef   :  { %v1124_v9 = vmax.f32 %v962_v59, 0.0  ;;  %v954_v24 = vadd.f32 %v953_v63, %v7544_v56 }
 0x1f0   :  { %v6286_v45 = vpop.f32.mrf.mxu1 }
 0x1f1   :  { %v1122_v1 = vmax.f32 %v954_v24, 0.0  ;;  %v1172_v5 = vpack.c.bf16 %v1124_v9, %v1123_v61  ;;  %v975_v2 = vadd.f32 %v6286_v45, %v7544_v56 }
 0x1f2   :  { %v966_v6 = vpop.f32.mrf.mxu1 }
 0x1f3   :  { %v1171_v58 = vpack.c.bf16 %v1122_v1, %v1121_v0  ;;  %v967_v7 = vadd.f32 %v966_v6, %v7544_v56  ;;  %v1127_v11 = vmax.f32 %v975_v2, 0.0 }
 0x1f4   :  { %v6287_v8 = vpop.f32.mrf.mxu1 }
 0x1f5   :  { %6360 = vmatprep.mubr.bf16.mxu0 %v1171_v58  ;;  %v978_v10 = vadd.f32 %v6287_v8, %v7544_v56  ;;  %v1125_v42 = vmax.f32 %v967_v7, 0.0 }
 0x1f6   :  { %6361 = vmatmul.mubr.bf16.gmra.mxu0 %v1172_v5  ;;  %v969_v23 = vpop.f32.mrf.mxu1 }
 0x1f7   :  { %v1128_v12 = vmax.f32 %v978_v10, 0.0  ;;  %v970_v13 = vadd.f32 %v969_v23, %v7544_v56 }
 0x1f8   :  { %v6290_v16 = vpop.f32.mrf.mxu1 }
 0x1f9   :  { %v1126_v17 = vmax.f32 %v970_v13, 0.0  ;;  %v1174_v19 = vpack.c.bf16 %v1128_v12, %v1127_v11  ;;  %v991_v20 = vadd.f32 %v6290_v16, %v7544_v56 }
 0x1fa   :  { %v982_v55 = vpop.f32.mrf.mxu1 }
 0x1fb   :  { %v1173_v21 = vpack.c.bf16 %v1126_v17, %v1125_v42  ;;  %v983_v22 = vadd.f32 %v982_v55, %v7544_v56  ;;  %v1131_v14 = vmax.f32 %v991_v20, 0.0 }
 0x1fc   :  { %v6291_v25 = vpop.f32.mrf.mxu1 }
 0x1fd   :  { %6364 = vmatprep.mubr.bf16.mxu0 %v1173_v21  ;;  %v994_v26 = vadd.f32 %v6291_v25, %v7544_v56  ;;  %v1129_v4 = vmax.f32 %v983_v22, 0.0 }
 0x1fe   :  { %6365 = vmatmul.mubr.bf16.gmra.mxu0 %v1174_v19  ;;  %v985_v32 = vpop.f32.mrf.mxu1 }
 0x1ff   :  { %v1132_v60 = vmax.f32 %v994_v26, 0.0  ;;  %v986_v27 = vadd.f32 %v985_v32, %v7544_v56 }
 0x200   :  { %v6294_v28 = vpop.f32.mrf.mxu1 }
 0x201   :  { %v1130_v29 = vmax.f32 %v986_v27, 0.0  ;;  %v1176_v30 = vpack.c.bf16 %v1132_v60, %v1131_v14  ;;  %v1007_v3 = vadd.f32 %v6294_v28, %v7544_v56 }
 0x202   :  { %v998_v31 = vpop.f32.mrf.mxu1 }
 0x203   :  { %v1175_v34 = vpack.c.bf16 %v1130_v29, %v1129_v4  ;;  %v999_v35 = vadd.f32 %v998_v31, %v7544_v56  ;;  %v1135_v18 = vmax.f32 %v1007_v3, 0.0 }
 0x204   :  { %v6295_v51 = vpop.f32.mrf.mxu1 }
 0x205   :  { %6368 = vmatprep.mubr.bf16.mxu0 %v1175_v34  ;;  %v1010_v36 = vadd.f32 %v6295_v51, %v7544_v56  ;;  %v1133_v40 = vmax.f32 %v999_v35, 0.0 }
 0x206   :  { %6369 = vmatmul.mubr.bf16.gmra.mxu0 %v1176_v30  ;;  %v1001_v38 = vpop.f32.mrf.mxu1 }
 0x207   :  { %v1136_v41 = vmax.f32 %v1010_v36, 0.0  ;;  %v1002_v43 = vadd.f32 %v1001_v38, %v7544_v56 }
 0x208   :  { %v6298_v57 = vpop.f32.mrf.mxu1 }
 0x209   :  { %v1134_v44 = vmax.f32 %v1002_v43, 0.0  ;;  %v1178_v46 = vpack.c.bf16 %v1136_v41, %v1135_v18  ;;  %v1023_v62 = vadd.f32 %v6298_v57, %v7544_v56 }
 0x20a   :  { %v1014_v15 = vpop.f32.mrf.mxu1 }
 0x20b   :  { %v1015_v47 = vadd.f32 %v1014_v15, %v7544_v56  ;;  %v1177_v39 = vpack.c.bf16 %v1134_v44, %v1133_v40  ;;  %v1139_v49 = vmax.f32 %v1023_v62, 0.0 }
 0x20c   :  { %v6299_v33 = vpop.f32.mrf.mxu1 }
 0x20d   :  { %v1026_v48 = vadd.f32 %v6299_v33, %v7544_v56  ;;  %6372 = vmatprep.mubr.bf16.mxu0 %v1177_v39  ;;  %v1137_v54 = vmax.f32 %v1015_v47, 0.0 }
 0x20e   :  { %v1017_v50 = vpop.f32.mrf.mxu1  ;;  %6373 = vmatmul.mubr.bf16.gmra.mxu0 %v1178_v46 }
 0x20f   :  { %v1140_v59 = vmax.f32 %v1026_v48, 0.0  ;;  %v1018_v61 = vadd.f32 %v1017_v50, %v7544_v56 }
 0x210   :  { %v6302_v63 = vpop.f32.mrf.mxu1 }
 0x211   :  { %v1138_v0 = vmax.f32 %v1018_v61, 0.0  ;;  %v1180_v9 = vpack.c.bf16 %v1140_v59, %v1139_v49  ;;  %v1039_v24 = vadd.f32 %v6302_v63, %v7544_v56  ;;  %v6960_v61 = vld [vmem:[%s9498_s3 + $0x70] ss:$8 sps:$4 sm:$0xff]   ;;  %v6962_v63 = vld [vmem:[%s9498_s3 + $0x74] ss:$8 sps:$4 sm:$0xff]  }
 0x212   :  { %v1030_v45 = vpop.f32.mrf.mxu1  ;;  %2193 = vmatprep.subr.bf16.mxu0 %v6962_v63 }
 0x213   :  { %v1031_v1 = vadd.f32 %v1030_v45, %v7544_v56  ;;  %v1179_v5 = vpack.c.bf16 %v1138_v0, %v1137_v54  ;;  %v1143_v58 = vmax.f32 %v1039_v24, 0.0  ;;  %2194 = vmatpush1.bf16.msra.mxu0 %v6960_v61  ;;  %v6963_v0 = vld [vmem:[%s9498_s3 + $0x60] ss:$8 sps:$4 sm:$0xff]   ;;  %v6968_v24 = vld [vmem:[%s9498_s3 + $0x54] ss:$8 sps:$4 sm:$0xff]  }
 0x214   :  { %v6303_v2 = vpop.f32.mrf.mxu1  ;;  %v6969_v45 = vld [vmem:[%s9498_s3 + $0x40] ss:$8 sps:$4 sm:$0xff]  }
 0x215   :  { %v1042_v6 = vadd.f32 %v6303_v2, %v7544_v56  ;;  %6376 = vmatprep.mubr.bf16.mxu0 %v1179_v5  ;;  %v1141_v8 = vmax.f32 %v1031_v1, 0.0  ;;  %v6971_v1 = vld [vmem:[%s9498_s3 + $0x44] ss:$8 sps:$4 sm:$0xff]   ;;  %v6972_v5 = vld [vmem:[%s9498_s3 + $0x30] ss:$8 sps:$4 sm:$0xff]  }
 0x216   :  { %v1033_v7 = vpop.f32.mrf.mxu1  ;;  %6377 = vmatmul.mubr.bf16.gmra.mxu0 %v1180_v9  ;;  %v6966_v9 = vld [vmem:[%s9498_s3 + $0x50] ss:$8 sps:$4 sm:$0xff]   ;;  %v6974_v2 = vld [vmem:[%s9498_s3 + $0x34] ss:$8 sps:$4 sm:$0xff]  }
 0x217   :  { %v1144_v10 = vmax.f32 %v1042_v6, 0.0  ;;  %v1034_v11 = vadd.f32 %v1033_v7, %v7544_v56  ;;  %v6975_v6 = vld [vmem:[%s9498_s3 + $0x20] ss:$8 sps:$4 sm:$0xff]   ;;  %v1208_v7 = vsub.s32 2, %v7370_v52 }
 0x218   :  { %v6306_v23 = vpop.f32.mrf.mxu1 }
 0x219   :  { %v1142_v42 = vmax.f32 %v1034_v11, 0.0  ;;  %v1182_v12 = vpack.c.bf16 %v1144_v10, %v1143_v58  ;;  %v1055_v13 = vadd.f32 %v6306_v23, %v7544_v56  ;;  %v6977_v58 = vld [vmem:[%s9498_s3 + $0x24] ss:$8 sps:$4 sm:$0xff]  }
 0x21a   :  { %v1046_v16 = vpop.f32.mrf.mxu1  ;;  %v7656_v10 = vld [vmem:[%s9499_s4] sm:$0xff] }
 0x21b   :  { %v1047_v17 = vadd.f32 %v1046_v16, %v7544_v56  ;;  %v1181_v19 = vpack.c.bf16 %v1142_v42, %v1141_v8  ;;  %v1147_v21 = vmax.f32 %v1055_v13, 0.0  ;;  %v7661_v11 = vrot.slane %v7656_v10, %v1208_v7 }
 0x21c   :  { %v6307_v20 = vpop.f32.mrf.mxu1 }
 0x21d   :  { %v1058_v55 = vadd.f32 %v6307_v20, %v7544_v56  ;;  %6380 = vmatprep.mubr.bf16.mxu0 %v1181_v19  ;;  %v1145_v25 = vmax.f32 %v1047_v17, 0.0  ;;  %v6978_v19 = vld [vmem:[%s9498_s3 + $0x10] ss:$8 sps:$4 sm:$0xff]   ;;  %v6980_v20 = vld [vmem:[%s9498_s3 + $0x14] ss:$8 sps:$4 sm:$0xff]  }
 0x21e   :  { %v1049_v22 = vpop.f32.mrf.mxu1  ;;  %6381 = vmatmul.mubr.bf16.gmra.mxu0 %v1182_v12 }
 0x21f   :  { %v1148_v26 = vmax.f32 %v1058_v55, 0.0  ;;  %v1050_v14 = vadd.f32 %v1049_v22, %v7544_v56 }
 0x220   :  { %v6310_v32 = vpop.f32.mrf.mxu1 }
 0x221   :  { %v1146_v4 = vmax.f32 %v1050_v14, 0.0  ;;  %v1184_v60 = vpack.c.bf16 %v1148_v26, %v1147_v21  ;;  %v1071_v27 = vadd.f32 %v6310_v32, %v7544_v56  ;;  %v6983_v21 = vld [vmem:[%s9498_s3 + $0x4] ss:$8 sps:$4 sm:$0xff]   ;;  %v6981_v32 = vld [vmem:[%s9498_s3] ss:$8 sps:$4 sm:$0xff]  }
 0x222   :  { %v1062_v28 = vpop.f32.mrf.mxu1 }
 0x223   :  { %v1063_v29 = vadd.f32 %v1062_v28, %v7544_v56  ;;  %v1183_v30 = vpack.c.bf16 %v1146_v4, %v1145_v25  ;;  %v1151_v34 = vmax.f32 %v1071_v27, 0.0 }
 0x224   :  { %v6311_v3 = vpop.f32.mrf.mxu1 }
 0x225   :  { %v1074_v31 = vadd.f32 %v6311_v3, %v7544_v56  ;;  %6384 = vmatprep.mubr.bf16.mxu0 %v1183_v30  ;;  %v1149_v51 = vmax.f32 %v1063_v29, 0.0 }
 0x226   :  { %v1065_v35 = vpop.f32.mrf.mxu1  ;;  %6385 = vmatmul.mubr.bf16.gmra.mxu0 %v1184_v60 }
 0x227   :  { %v1152_v36 = vmax.f32 %v1074_v31, 0.0  ;;  %v1066_v18 = vadd.f32 %v1065_v35, %v7544_v56 }
 0x228   :  { %v6314_v38 = vpop.f32.mrf.mxu1 }
 0x229   :  { %v1150_v40 = vmax.f32 %v1066_v18, 0.0  ;;  %v1186_v41 = vpack.c.bf16 %v1152_v36, %v1151_v34  ;;  %v1087_v43 = vadd.f32 %v6314_v38, %v7544_v56 }
 0x22a   :  { %v1078_v57 = vpop.f32.mrf.mxu1 }
 0x22b   :  { %v1079_v44 = vadd.f32 %v1078_v57, %v7544_v56  ;;  %v1185_v46 = vpack.c.bf16 %v1150_v40, %v1149_v51  ;;  %v1155_v47 = vmax.f32 %v1087_v43, 0.0 }
 0x22c   :  { %v6315_v62 = vpop.f32.mrf.mxu1 }
 0x22d   :  { %v1090_v15 = vadd.f32 %v6315_v62, %v7544_v56  ;;  %6388 = vmatprep.mubr.bf16.mxu0 %v1185_v46  ;;  %v1153_v33 = vmax.f32 %v1079_v44, 0.0 }
 0x22e   :  { %v1081_v39 = vpop.f32.mrf.mxu1  ;;  %6389 = vmatmul.mubr.bf16.gmra.mxu0 %v1186_v41 }
 0x22f   :  { %v1156_v48 = vmax.f32 %v1090_v15, 0.0  ;;  %v1082_v49 = vadd.f32 %v1081_v39, %v7544_v56  ;;  %v6965_v56 = vld [vmem:[%s9498_s3 + $0x64] ss:$8 sps:$4 sm:$0xff]  }
 0x230   :  { %2195 = vmatprep.subr.bf16.mxu0 %v6965_v56 }
 0x231   :  { %v1154_v50 = vmax.f32 %v1082_v49, 0.0  ;;  %v1188_v54 = vpack.c.bf16 %v1156_v48, %v1155_v47  ;;  %2196 = vmatpush1.bf16.msra.mxu0 %v6963_v0 }
 0x232   :  { %2197 = vmatprep.subr.bf16.mxu0 %v6968_v24 }
 0x233   :  { %v1187_v59 = vpack.c.bf16 %v1154_v50, %v1153_v33 }
 0x235   :  { %6392 = vmatprep.mubr.bf16.mxu0 %v1187_v59  ;;  %2198 = vmatpush1.bf16.msra.mxu0 %v6966_v9 }
 0x236   :  { %6393 = vmatmul.mubr.bf16.gmra.mxu0 %v1188_v54  ;;  %2199 = vmatprep.subr.bf16.mxu0 %v6971_v1 }
 0x239   :  { %2200 = vmatpush1.bf16.msra.mxu0 %v6969_v45 }
 0x23a   :  { %2201 = vmatprep.subr.bf16.mxu0 %v6974_v2 }
 0x23d   :  { %2202 = vmatpush1.bf16.msra.mxu0 %v6972_v5 }
 0x23e   :  { %2203 = vmatprep.subr.bf16.mxu0 %v6977_v58 }
 0x241   :  { %2204 = vmatpush1.bf16.msra.mxu0 %v6975_v6 }
 0x242   :  { %2205 = vmatprep.subr.bf16.mxu0 %v6980_v20 }
 0x245   :  { %2206 = vmatpush1.bf16.msra.mxu0 %v6978_v19 }
 0x246   :  { %2207 = vmatprep.subr.bf16.mxu0 %v6983_v21 }
 0x249   :  { %2208 = vmatpush1.bf16.msra.mxu0 %v6981_v32 }
 0x27e   :  { %v6334_v8 = vpop.f32.mrf.mxu0 }
 0x27f   :  { %v1301_v16 = vadd.f32 %v6334_v8, %v7661_v11 }
 0x280   :  { %v1292_v23 = vpop.f32.mrf.mxu0 }
 0x281   :  { %v1293_v12 = vadd.f32 %v1292_v23, %v7661_v11  ;;  %v1549_v4 = vmax.f32 %v1301_v16, 0.0 }
 0x282   :  { %v6335_v42 = vpop.f32.mrf.mxu0 }
 0x283   :  { %v1304_v13 = vadd.f32 %v6335_v42, %v7661_v11  ;;  %v1547_v26 = vmax.f32 %v1293_v12, 0.0 }
 0x284   :  { %v1295_v17 = vpop.f32.mrf.mxu0 }
 0x285   :  { %v1296_v55 = vadd.f32 %v1295_v17, %v7661_v11  ;;  %v1550_v22 = vmax.f32 %v1304_v13, 0.0 }
 0x286   :  { %v6338_v25 = vpop.f32.mrf.mxu0 }
 0x287   :  { %v1548_v14 = vmax.f32 %v1296_v55, 0.0  ;;  %v1612_v28 = vpack.c.bf16 %v1550_v22, %v1549_v4  ;;  %v1317_v31 = vadd.f32 %v6338_v25, %v7661_v11 }
 0x288   :  { %v1308_v60 = vpop.f32.mrf.mxu0 }
 0x289   :  { %v1611_v27 = vpack.c.bf16 %v1548_v14, %v1547_v26  ;;  %v1309_v30 = vadd.f32 %v1308_v60, %v7661_v11  ;;  %v1553_v40 = vmax.f32 %v1317_v31, 0.0 }
 0x28a   :  { %v6339_v29 = vpop.f32.mrf.mxu0 }
 0x28b   :  { %v1320_v3 = vadd.f32 %v6339_v29, %v7661_v11  ;;  %6412 = vmatprep.mubr.bf16.mxu1 %v1611_v27  ;;  %v1551_v18 = vmax.f32 %v1309_v30, 0.0 }
 0x28c   :  { %v1311_v34 = vpop.f32.mrf.mxu0  ;;  %6413 = vmatmul.mubr.bf16.vlgmr.msra.gmra.mxu1 %v1612_v28 }
 0x28d   :  { %v1312_v35 = vadd.f32 %v1311_v34, %v7661_v11  ;;  %v1554_v51 = vmax.f32 %v1320_v3, 0.0 }
 0x28e   :  { %v6342_v36 = vpop.f32.mrf.mxu0 }
 0x28f   :  { %v1552_v38 = vmax.f32 %v1312_v35, 0.0  ;;  %v1614_v57 = vpack.c.bf16 %v1554_v51, %v1553_v40  ;;  %v1333_v15 = vadd.f32 %v6342_v36, %v7661_v11 }
 0x290   :  { %v1324_v41 = vpop.f32.mrf.mxu0 }
 0x291   :  { %v1613_v43 = vpack.c.bf16 %v1552_v38, %v1551_v18  ;;  %v1325_v46 = vadd.f32 %v1324_v41, %v7661_v11  ;;  %v1557_v54 = vmax.f32 %v1333_v15, 0.0 }
 0x292   :  { %v6343_v44 = vpop.f32.mrf.mxu0 }
 0x293   :  { %v1336_v62 = vadd.f32 %v6343_v44, %v7661_v11  ;;  %6416 = vmatprep.mubr.bf16.mxu1 %v1613_v43  ;;  %v1555_v49 = vmax.f32 %v1325_v46, 0.0 }
 0x294   :  { %v1327_v47 = vpop.f32.mrf.mxu0  ;;  %6417 = vmatmul.mubr.bf16.gmra.mxu1 %v1614_v57 }
 0x295   :  { %v1328_v39 = vadd.f32 %v1327_v47, %v7661_v11  ;;  %v1558_v33 = vmax.f32 %v1336_v62, 0.0 }
 0x296   :  { %v6346_v48 = vpop.f32.mrf.mxu0 }
 0x297   :  { %v1556_v50 = vmax.f32 %v1328_v39, 0.0  ;;  %v1349_v59 = vadd.f32 %v6346_v48, %v7661_v11  ;;  %v1616_v56 = vpack.c.bf16 %v1558_v33, %v1557_v54 }
 0x298   :  { %v1340_v61 = vpop.f32.mrf.mxu0 }
 0x299   :  { %v1341_v63 = vadd.f32 %v1340_v61, %v7661_v11  ;;  %v1615_v0 = vpack.c.bf16 %v1556_v50, %v1555_v49  ;;  %v1561_v45 = vmax.f32 %v1349_v59, 0.0 }
 0x29a   :  { %v6347_v9 = vpop.f32.mrf.mxu0 }
 0x29b   :  { %v1352_v24 = vadd.f32 %v6347_v9, %v7661_v11  ;;  %6420 = vmatprep.mubr.bf16.mxu1 %v1615_v0  ;;  %v1559_v5 = vmax.f32 %v1341_v63, 0.0 }
 0x29c   :  { %v1343_v1 = vpop.f32.mrf.mxu0  ;;  %6421 = vmatmul.mubr.bf16.gmra.mxu1 %v1616_v56 }
 0x29d   :  { %v1562_v2 = vmax.f32 %v1352_v24, 0.0  ;;  %v1344_v6 = vadd.f32 %v1343_v1, %v7661_v11 }
 0x29e   :  { %v6350_v58 = vpop.f32.mrf.mxu0 }
 0x29f   :  { %v1560_v8 = vmax.f32 %v1344_v6, 0.0  ;;  %v1618_v23 = vpack.c.bf16 %v1562_v2, %v1561_v45  ;;  %v1365_v42 = vadd.f32 %v6350_v58, %v7661_v11 }
 0x2a0   :  { %v1356_v12 = vpop.f32.mrf.mxu0 }
 0x2a1   :  { %v1617_v13 = vpack.c.bf16 %v1560_v8, %v1559_v5  ;;  %v1357_v16 = vadd.f32 %v1356_v12, %v7661_v11  ;;  %v1565_v20 = vmax.f32 %v1365_v42, 0.0 }
 0x2a2   :  { %v6351_v17 = vpop.f32.mrf.mxu0 }
 0x2a3   :  { %6424 = vmatprep.mubr.bf16.mxu1 %v1617_v13  ;;  %v1368_v19 = vadd.f32 %v6351_v17, %v7661_v11  ;;  %v1563_v21 = vmax.f32 %v1357_v16, 0.0 }
 0x2a4   :  { %6425 = vmatmul.mubr.bf16.gmra.mxu1 %v1618_v23  ;;  %v1359_v55 = vpop.f32.mrf.mxu0 }
 0x2a5   :  { %v1566_v22 = vmax.f32 %v1368_v19, 0.0  ;;  %v1360_v25 = vadd.f32 %v1359_v55, %v7661_v11 }
 0x2a6   :  { %v6354_v26 = vpop.f32.mrf.mxu0 }
 0x2a7   :  { %v1564_v14 = vmax.f32 %v1360_v25, 0.0  ;;  %v1620_v32 = vpack.c.bf16 %v1566_v22, %v1565_v20  ;;  %v1381_v4 = vadd.f32 %v6354_v26, %v7661_v11 }
 0x2a8   :  { %v1372_v60 = vpop.f32.mrf.mxu0 }
 0x2a9   :  { %v1619_v27 = vpack.c.bf16 %v1564_v14, %v1563_v21  ;;  %v1373_v28 = vadd.f32 %v1372_v60, %v7661_v11  ;;  %v1569_v3 = vmax.f32 %v1381_v4, 0.0 }
 0x2aa   :  { %v6355_v29 = vpop.f32.mrf.mxu0 }
 0x2ab   :  { %6428 = vmatprep.mubr.bf16.mxu1 %v1619_v27  ;;  %v1384_v30 = vadd.f32 %v6355_v29, %v7661_v11  ;;  %v1567_v34 = vmax.f32 %v1373_v28, 0.0 }
 0x2ac   :  { %6429 = vmatmul.mubr.bf16.gmra.mxu1 %v1620_v32  ;;  %v1375_v31 = vpop.f32.mrf.mxu0 }
 0x2ad   :  { %v1570_v35 = vmax.f32 %v1384_v30, 0.0  ;;  %v1376_v51 = vadd.f32 %v1375_v31, %v7661_v11 }
 0x2ae   :  { %v6358_v36 = vpop.f32.mrf.mxu0 }
 0x2af   :  { %v1568_v18 = vmax.f32 %v1376_v51, 0.0  ;;  %v1622_v38 = vpack.c.bf16 %v1570_v35, %v1569_v3  ;;  %v1397_v40 = vadd.f32 %v6358_v36, %v7661_v11 }
 0x2b0   :  { %v1388_v41 = vpop.f32.mrf.mxu0 }
 0x2b1   :  { %v1621_v43 = vpack.c.bf16 %v1568_v18, %v1567_v34  ;;  %v1389_v57 = vadd.f32 %v1388_v41, %v7661_v11  ;;  %v1573_v62 = vmax.f32 %v1397_v40, 0.0 }
 0x2b2   :  { %v6359_v44 = vpop.f32.mrf.mxu0 }
 0x2b3   :  { %6432 = vmatprep.mubr.bf16.mxu1 %v1621_v43  ;;  %v1400_v46 = vadd.f32 %v6359_v44, %v7661_v11  ;;  %v1571_v47 = vmax.f32 %v1389_v57, 0.0 }
 0x2b4   :  { %6433 = vmatmul.mubr.bf16.gmra.mxu1 %v1622_v38  ;;  %v1391_v15 = vpop.f32.mrf.mxu0 }
 0x2b5   :  { %v1574_v39 = vmax.f32 %v1400_v46, 0.0  ;;  %v1392_v33 = vadd.f32 %v1391_v15, %v7661_v11 }
 0x2b6   :  { %v6362_v48 = vpop.f32.mrf.mxu0 }
 0x2b7   :  { %v1572_v49 = vmax.f32 %v1392_v33, 0.0  ;;  %v1624_v50 = vpack.c.bf16 %v1574_v39, %v1573_v62  ;;  %v1413_v54 = vadd.f32 %v6362_v48, %v7661_v11 }
 0x2b8   :  { %v1404_v59 = vpop.f32.mrf.mxu0 }
 0x2b9   :  { %v1623_v61 = vpack.c.bf16 %v1572_v49, %v1571_v47  ;;  %v1405_v63 = vadd.f32 %v1404_v59, %v7661_v11  ;;  %v1577_v9 = vmax.f32 %v1413_v54, 0.0  ;;  %v7178_v54 = vmov 0  }
 0x2ba   :  { %v6363_v0 = vpop.f32.mrf.mxu0  ;;  %2225 = vmatprep.mubr.bf16.mxu0 %v7178_v54 }
 0x2bb   :  { %6436 = vmatprep.mubr.bf16.mxu1 %v1623_v61  ;;  %v1416_v56 = vadd.f32 %v6363_v0, %v7661_v11  ;;  %v1575_v45 = vmax.f32 %v1405_v63, 0.0 }
 0x2bc   :  { %6437 = vmatmul.mubr.bf16.gmra.mxu1 %v1624_v50  ;;  %v1407_v24 = vpop.f32.mrf.mxu0 }
 0x2bd   :  { %v1578_v1 = vmax.f32 %v1416_v56, 0.0  ;;  %v1408_v5 = vadd.f32 %v1407_v24, %v7661_v11 }
 0x2be   :  { %v6366_v2 = vpop.f32.mrf.mxu0 }
 0x2bf   :  { %v1576_v6 = vmax.f32 %v1408_v5, 0.0  ;;  %v1626_v58 = vpack.c.bf16 %v1578_v1, %v1577_v9  ;;  %v1429_v8 = vadd.f32 %v6366_v2, %v7661_v11 }
 0x2c0   :  { %v1420_v23 = vpop.f32.mrf.mxu0 }
 0x2c1   :  { %v1625_v42 = vpack.c.bf16 %v1576_v6, %v1575_v45  ;;  %v1421_v12 = vadd.f32 %v1420_v23, %v7661_v11  ;;  %v1581_v17 = vmax.f32 %v1429_v8, 0.0 }
 0x2c2   :  { %v6367_v13 = vpop.f32.mrf.mxu0 }
 0x2c3   :  { %6440 = vmatprep.mubr.bf16.mxu1 %v1625_v42  ;;  %v1432_v16 = vadd.f32 %v6367_v13, %v7661_v11  ;;  %v1579_v20 = vmax.f32 %v1421_v12, 0.0 }
 0x2c4   :  { %6441 = vmatmul.mubr.bf16.gmra.mxu1 %v1626_v58  ;;  %v1423_v19 = vpop.f32.mrf.mxu0 }
 0x2c5   :  { %v1582_v55 = vmax.f32 %v1432_v16, 0.0  ;;  %v1424_v21 = vadd.f32 %v1423_v19, %v7661_v11 }
 0x2c6   :  { %v6370_v22 = vpop.f32.mrf.mxu0 }
 0x2c7   :  { %v1580_v25 = vmax.f32 %v1424_v21, 0.0  ;;  %v1628_v26 = vpack.c.bf16 %v1582_v55, %v1581_v17  ;;  %v1445_v14 = vadd.f32 %v6370_v22, %v7661_v11 }
 0x2c8   :  { %v1436_v32 = vpop.f32.mrf.mxu0 }
 0x2c9   :  { %v1627_v4 = vpack.c.bf16 %v1580_v25, %v1579_v20  ;;  %v1437_v60 = vadd.f32 %v1436_v32, %v7661_v11  ;;  %v1585_v29 = vmax.f32 %v1445_v14, 0.0 }
 0x2ca   :  { %v6371_v27 = vpop.f32.mrf.mxu0 }
 0x2cb   :  { %6444 = vmatprep.mubr.bf16.mxu1 %v1627_v4  ;;  %v1448_v28 = vadd.f32 %v6371_v27, %v7661_v11  ;;  %v1583_v3 = vmax.f32 %v1437_v60, 0.0 }
 0x2cc   :  { %6445 = vmatmul.mubr.bf16.gmra.mxu1 %v1628_v26  ;;  %v1439_v30 = vpop.f32.mrf.mxu0 }
 0x2cd   :  { %v1586_v31 = vmax.f32 %v1448_v28, 0.0  ;;  %v1440_v34 = vadd.f32 %v1439_v30, %v7661_v11 }
 0x2ce   :  { %v6374_v35 = vpop.f32.mrf.mxu0 }
 0x2cf   :  { %v1584_v51 = vmax.f32 %v1440_v34, 0.0  ;;  %v1630_v36 = vpack.c.bf16 %v1586_v31, %v1585_v29  ;;  %v1461_v18 = vadd.f32 %v6374_v35, %v7661_v11 }
 0x2d0   :  { %v1452_v38 = vpop.f32.mrf.mxu0 }
 0x2d1   :  { %v1629_v40 = vpack.c.bf16 %v1584_v51, %v1583_v3  ;;  %v1453_v41 = vadd.f32 %v1452_v38, %v7661_v11  ;;  %v1589_v44 = vmax.f32 %v1461_v18, 0.0 }
 0x2d2   :  { %v6375_v43 = vpop.f32.mrf.mxu0 }
 0x2d3   :  { %6448 = vmatprep.mubr.bf16.mxu1 %v1629_v40  ;;  %v1464_v57 = vadd.f32 %v6375_v43, %v7661_v11  ;;  %v1587_v62 = vmax.f32 %v1453_v41, 0.0 }
 0x2d4   :  { %6449 = vmatmul.mubr.bf16.gmra.mxu1 %v1630_v36  ;;  %v1455_v46 = vpop.f32.mrf.mxu0 }
 0x2d5   :  { %v1590_v15 = vmax.f32 %v1464_v57, 0.0  ;;  %v1456_v47 = vadd.f32 %v1455_v46, %v7661_v11 }
 0x2d6   :  { %v6378_v39 = vpop.f32.mrf.mxu0 }
 0x2d7   :  { %v1588_v33 = vmax.f32 %v1456_v47, 0.0  ;;  %v1632_v48 = vpack.c.bf16 %v1590_v15, %v1589_v44  ;;  %v1477_v49 = vadd.f32 %v6378_v39, %v7661_v11 }
 0x2d8   :  { %v1468_v50 = vpop.f32.mrf.mxu0 }
 0x2d9   :  { %v1469_v59 = vadd.f32 %v1468_v50, %v7661_v11  ;;  %v1631_v61 = vpack.c.bf16 %v1588_v33, %v1587_v62  ;;  %v1593_v56 = vmax.f32 %v1477_v49, 0.0 }
 0x2da   :  { %v6379_v63 = vpop.f32.mrf.mxu0 }
 0x2db   :  { %v1480_v0 = vadd.f32 %v6379_v63, %v7661_v11  ;;  %6452 = vmatprep.mubr.bf16.mxu1 %v1631_v61  ;;  %v1591_v24 = vmax.f32 %v1469_v59, 0.0 }
 0x2dc   :  { %v1471_v9 = vpop.f32.mrf.mxu0  ;;  %6453 = vmatmul.mubr.bf16.gmra.mxu1 %v1632_v48 }
 0x2dd   :  { %v1594_v45 = vmax.f32 %v1480_v0, 0.0  ;;  %v1472_v1 = vadd.f32 %v1471_v9, %v7661_v11 }
 0x2de   :  { %v6382_v5 = vpop.f32.mrf.mxu0 }
 0x2df   :  { %v1592_v2 = vmax.f32 %v1472_v1, 0.0  ;;  %v1634_v6 = vpack.c.bf16 %v1594_v45, %v1593_v56  ;;  %v1493_v58 = vadd.f32 %v6382_v5, %v7661_v11 }
 0x2e0   :  { %v1484_v8 = vpop.f32.mrf.mxu0 }
 0x2e1   :  { %v1485_v23 = vadd.f32 %v1484_v8, %v7661_v11  ;;  %v1633_v42 = vpack.c.bf16 %v1592_v2, %v1591_v24  ;;  %v1597_v16 = vmax.f32 %v1493_v58, 0.0 }
 0x2e2   :  { %v6383_v12 = vpop.f32.mrf.mxu0 }
 0x2e3   :  { %v1496_v13 = vadd.f32 %v6383_v12, %v7661_v11  ;;  %6456 = vmatprep.mubr.bf16.mxu1 %v1633_v42  ;;  %v1595_v19 = vmax.f32 %v1485_v23, 0.0 }
 0x2e4   :  { %v1487_v17 = vpop.f32.mrf.mxu0  ;;  %6457 = vmatmul.mubr.bf16.gmra.mxu1 %v1634_v6  ;;  %v1662_v6 = vsub.s32 3, %v7370_v52 }
 0x2e5   :  { %v1598_v20 = vmax.f32 %v1496_v13, 0.0  ;;  %v1488_v55 = vadd.f32 %v1487_v17, %v7661_v11 }
 0x2e6   :  { %v6386_v21 = vpop.f32.mrf.mxu0  ;;  %v7742_v23 = vrot.slane %v7656_v10, %v1662_v6 }
 0x2e7   :  { %v1596_v22 = vmax.f32 %v1488_v55, 0.0  ;;  %v1636_v25 = vpack.c.bf16 %v1598_v20, %v1597_v16  ;;  %v1509_v26 = vadd.f32 %v6386_v21, %v7661_v11 }
 0x2e8   :  { %v1500_v14 = vpop.f32.mrf.mxu0 }
 0x2e9   :  { %v1501_v32 = vadd.f32 %v1500_v14, %v7661_v11  ;;  %v1635_v4 = vpack.c.bf16 %v1596_v22, %v1595_v19  ;;  %v1601_v28 = vmax.f32 %v1509_v26, 0.0 }
 0x2ea   :  { %v6387_v60 = vpop.f32.mrf.mxu0 }
 0x2eb   :  { %v1512_v27 = vadd.f32 %v6387_v60, %v7661_v11  ;;  %6460 = vmatprep.mubr.bf16.mxu1 %v1635_v4  ;;  %v1599_v30 = vmax.f32 %v1501_v32, 0.0 }
 0x2ec   :  { %v1503_v29 = vpop.f32.mrf.mxu0  ;;  %6461 = vmatmul.mubr.bf16.gmra.mxu1 %v1636_v25 }
 0x2ed   :  { %v1602_v3 = vmax.f32 %v1512_v27, 0.0  ;;  %v1504_v31 = vadd.f32 %v1503_v29, %v7661_v11 }
 0x2ee   :  { %v6390_v34 = vpop.f32.mrf.mxu0 }
 0x2ef   :  { %v1600_v35 = vmax.f32 %v1504_v31, 0.0  ;;  %v1638_v51 = vpack.c.bf16 %v1602_v3, %v1601_v28  ;;  %v1525_v36 = vadd.f32 %v6390_v34, %v7661_v11 }
 0x2f0   :  { %v1516_v18 = vpop.f32.mrf.mxu0 }
 0x2f1   :  { %v1517_v38 = vadd.f32 %v1516_v18, %v7661_v11  ;;  %v1637_v40 = vpack.c.bf16 %v1600_v35, %v1599_v30  ;;  %v1605_v57 = vmax.f32 %v1525_v36, 0.0 }
 0x2f2   :  { %v6391_v41 = vpop.f32.mrf.mxu0 }
 0x2f3   :  { %v1528_v43 = vadd.f32 %v6391_v41, %v7661_v11  ;;  %6464 = vmatprep.mubr.bf16.mxu1 %v1637_v40  ;;  %v1603_v46 = vmax.f32 %v1517_v38, 0.0 }
 0x2f4   :  { %v1519_v44 = vpop.f32.mrf.mxu0  ;;  %6465 = vmatmul.mubr.bf16.gmra.mxu1 %v1638_v51 }
 0x2f5   :  { %v1606_v62 = vmax.f32 %v1528_v43, 0.0  ;;  %v1520_v15 = vadd.f32 %v1519_v44, %v7661_v11 }
 0x2f6   :  { %v6394_v47 = vpop.f32.mrf.mxu0 }
 0x2f7   :  { %v1604_v39 = vmax.f32 %v1520_v15, 0.0  ;;  %v1640_v33 = vpack.c.bf16 %v1606_v62, %v1605_v57  ;;  %v1541_v48 = vadd.f32 %v6394_v47, %v7661_v11 }
 0x2f8   :  { %v1532_v49 = vpop.f32.mrf.mxu0 }
 0x2f9   :  { %v1533_v50 = vadd.f32 %v1532_v49, %v7661_v11  ;;  %v1639_v59 = vpack.c.bf16 %v1604_v39, %v1603_v46  ;;  %v1609_v0 = vmax.f32 %v1541_v48, 0.0 }
 0x2fa   :  { %v6395_v61 = vpop.f32.mrf.mxu0 }
 0x2fb   :  { %v1544_v63 = vadd.f32 %v6395_v61, %v7661_v11  ;;  %6468 = vmatprep.mubr.bf16.mxu1 %v1639_v59  ;;  %v1607_v9 = vmax.f32 %v1533_v50, 0.0 }
 0x2fc   :  { %v1535_v56 = vpop.f32.mrf.mxu0  ;;  %6469 = vmatmul.mubr.bf16.gmra.mxu1 %v1640_v33 }
 0x2fd   :  { %v1610_v24 = vmax.f32 %v1544_v63, 0.0  ;;  %v1536_v45 = vadd.f32 %v1535_v56, %v7661_v11 }
 0x2ff   :  { %v1608_v1 = vmax.f32 %v1536_v45, 0.0  ;;  %v1642_v5 = vpack.c.bf16 %v1610_v24, %v1609_v0 }
 0x301   :  { %v1641_v2 = vpack.c.bf16 %v1608_v1, %v1607_v9 }
 0x303   :  { %6472 = vmatprep.mubr.bf16.mxu1 %v1641_v2 }
 0x304   :  { %6473 = vmatmul.mubr.bf16.gmra.mxu1 %v1642_v5 }
 0x34c   :  { %v6414_v58 = vpop.f32.mrf.mxu1 }
 0x34d   :  { %v1755_v25 = vadd.f32 %v6414_v58, %v7742_v23 }
 0x34e   :  { %v1746_v8 = vpop.f32.mrf.mxu1 }
 0x34f   :  { %v1747_v12 = vadd.f32 %v1746_v8, %v7742_v23  ;;  %v2003_v14 = vmax.f32 %v1755_v25, 0.0 }
 0x350   :  { %v6415_v42 = vpop.f32.mrf.mxu1 }
 0x351   :  { %v2001_v11 = vmax.f32 %v1747_v12, 0.0  ;;  %v1758_v55 = vadd.f32 %v6415_v42, %v7742_v23 }
 0x352   :  { %v1749_v13 = vpop.f32.mrf.mxu1 }
 0x353   :  { %v1750_v16 = vadd.f32 %v1749_v13, %v7742_v23  ;;  %v2004_v10 = vmax.f32 %v1758_v55, 0.0 }
 0x354   :  { %v6418_v17 = vpop.f32.mrf.mxu1 }
 0x355   :  { %v2002_v19 = vmax.f32 %v1750_v16, 0.0  ;;  %v2066_v32 = vpack.c.bf16 %v2004_v10, %v2003_v14  ;;  %v1771_v35 = vadd.f32 %v6418_v17, %v7742_v23 }
 0x356   :  { %v1762_v20 = vpop.f32.mrf.mxu1 }
 0x357   :  { %v2065_v21 = vpack.c.bf16 %v2002_v19, %v2001_v11  ;;  %v1763_v27 = vadd.f32 %v1762_v20, %v7742_v23  ;;  %v2007_v18 = vmax.f32 %v1771_v35, 0.0 }
 0x358   :  { %v6419_v22 = vpop.f32.mrf.mxu1 }
 0x359   :  { %2226 = vmatmul.mubr.bf16.vlgmr.msra.gmra.mxu0 %v2065_v21  ;;  %v2005_v30 = vmax.f32 %v1763_v27, 0.0  ;;  %v1774_v3 = vadd.f32 %v6419_v22, %v7742_v23 }
 0x35a   :  { %2235 = vmatprep.mubr.bf16.mxu0 %v7178_v54  ;;  %v1765_v26 = vpop.f32.mrf.mxu1 }
 0x35b   :  { %v1766_v4 = vadd.f32 %v1765_v26, %v7742_v23  ;;  %v2008_v51 = vmax.f32 %v1774_v3, 0.0 }
 0x35c   :  { %v6422_v60 = vpop.f32.mrf.mxu1 }
 0x35d   :  { %v2006_v28 = vmax.f32 %v1766_v4, 0.0  ;;  %v2068_v38 = vpack.c.bf16 %v2008_v51, %v2007_v18  ;;  %v1787_v39 = vadd.f32 %v6422_v60, %v7742_v23  ;;  %v6984_v60 = vld [vmem:[%s9497_s2 + $0x138] sm:$0xff]   ;;  %v6986_v51 = vld [vmem:[%s9497_s2 + $0x128] sm:$0xff]  }
 0x35e   :  { %v1778_v29 = vpop.f32.mrf.mxu1  ;;  %6476 = vmatprep.subr.bf16.mxu1 %v6984_v60 }
 0x35f   :  { %v2067_v31 = vpack.c.bf16 %v2006_v28, %v2005_v30  ;;  %v1779_v43 = vadd.f32 %v1778_v29, %v7742_v23  ;;  %v2011_v49 = vmax.f32 %v1787_v39, 0.0  ;;  %6477 = vmatpush3.bf16.msra.mxu1 %v6984_v60  ;;  %v6985_v30 = vld [vmem:[%s9497_s2 + $0x130] sm:$0xff]  }
 0x360   :  { %v6423_v34 = vpop.f32.mrf.mxu1  ;;  %6478 = vmatprep.subr.bf16.mxu1 %v6985_v30  ;;  %v6989_v39 = vld [vmem:[%s9497_s2 + $0x110] sm:$0xff]  }
 0x361   :  { %2236 = vmatmul.mubr.bf16.gmra.mxu0 %v2066_v32  ;;  %v2009_v46 = vmax.f32 %v1779_v43, 0.0  ;;  %v1790_v62 = vadd.f32 %v6423_v34, %v7742_v23 }
 0x362   :  { %2245 = vmatprep.mubr.bf16.mxu0 %v7178_v54  ;;  %v1781_v36 = vpop.f32.mrf.mxu1 }
 0x363   :  { %v1782_v40 = vadd.f32 %v1781_v36, %v7742_v23  ;;  %v2012_v33 = vmax.f32 %v1790_v62, 0.0  ;;  %6479 = vmatpush3.bf16.msra.mxu1 %v6985_v30 }
 0x364   :  { %v6426_v41 = vpop.f32.mrf.mxu1  ;;  %6480 = vmatprep.subr.bf16.mxu1 %v6986_v51 }
 0x365   :  { %v2010_v57 = vmax.f32 %v1782_v40, 0.0  ;;  %v2070_v50 = vpack.c.bf16 %v2012_v33, %v2011_v49  ;;  %v1803_v24 = vadd.f32 %v6426_v41, %v7742_v23  ;;  %v6987_v40 = vld [vmem:[%s9497_s2 + $0x120] sm:$0xff]  }
 0x366   :  { %v1794_v44 = vpop.f32.mrf.mxu1 }
 0x367   :  { %v2069_v15 = vpack.c.bf16 %v2010_v57, %v2009_v46  ;;  %v1795_v63 = vadd.f32 %v1794_v44, %v7742_v23  ;;  %v2015_v2 = vmax.f32 %v1803_v24, 0.0  ;;  %6481 = vmatpush3.bf16.msra.mxu1 %v6986_v51  ;;  %v6988_v46 = vld [vmem:[%s9497_s2 + $0x118] sm:$0xff]  }
 0x368   :  { %v6427_v47 = vpop.f32.mrf.mxu1  ;;  %6482 = vmatprep.subr.bf16.mxu1 %v6987_v40 }
 0x369   :  { %2246 = vmatmul.mubr.bf16.gmra.mxu0 %v2067_v31  ;;  %v2013_v9 = vmax.f32 %v1795_v63, 0.0  ;;  %v1806_v45 = vadd.f32 %v6427_v47, %v7742_v23 }
 0x36a   :  { %2255 = vmatprep.mubr.bf16.mxu0 %v7178_v54  ;;  %v1797_v48 = vpop.f32.mrf.mxu1 }
 0x36b   :  { %v1798_v59 = vadd.f32 %v1797_v48, %v7742_v23  ;;  %v2016_v6 = vmax.f32 %v1806_v45, 0.0  ;;  %6483 = vmatpush3.bf16.msra.mxu1 %v6987_v40 }
 0x36c   :  { %v6430_v61 = vpop.f32.mrf.mxu1  ;;  %6484 = vmatprep.subr.bf16.mxu1 %v6988_v46 }
 0x36d   :  { %v2014_v0 = vmax.f32 %v1798_v59, 0.0  ;;  %v2072_v8 = vpack.c.bf16 %v2016_v6, %v2015_v2  ;;  %v1819_v19 = vadd.f32 %v6430_v61, %v7742_v23  ;;  %v6990_v59 = vld [vmem:[%s9497_s2 + $0x108] sm:$0xff]  }
 0x36e   :  { %v1810_v56 = vpop.f32.mrf.mxu1 }
 0x36f   :  { %v2071_v1 = vpack.c.bf16 %v2014_v0, %v2013_v9  ;;  %v1811_v42 = vadd.f32 %v1810_v56, %v7742_v23  ;;  %v2019_v22 = vmax.f32 %v1819_v19, 0.0  ;;  %6485 = vmatpush3.bf16.msra.mxu1 %v6988_v46  ;;  %v6991_v56 = vld [vmem:[%s9497_s2 + $0x100] sm:$0xff]  }
 0x370   :  { %v6431_v5 = vpop.f32.mrf.mxu1  ;;  %6486 = vmatprep.subr.bf16.mxu1 %v6989_v39 }
 0x371   :  { %2256 = vmatmul.mubr.bf16.gmra.mxu0 %v2068_v38  ;;  %v2017_v16 = vmax.f32 %v1811_v42, 0.0  ;;  %v1822_v20 = vadd.f32 %v6431_v5, %v7742_v23 }
 0x372   :  { %2265 = vmatprep.mubr.bf16.mxu0 %v7178_v54  ;;  %v1813_v58 = vpop.f32.mrf.mxu1 }
 0x373   :  { %v1814_v12 = vadd.f32 %v1813_v58, %v7742_v23  ;;  %v2020_v25 = vmax.f32 %v1822_v20, 0.0  ;;  %6487 = vmatpush3.bf16.msra.mxu1 %v6989_v39 }
 0x374   :  { %v6434_v13 = vpop.f32.mrf.mxu1  ;;  %6488 = vmatprep.subr.bf16.mxu1 %v6990_v59 }
 0x375   :  { %v2018_v17 = vmax.f32 %v1814_v12, 0.0  ;;  %v2074_v26 = vpack.c.bf16 %v2020_v25, %v2019_v22  ;;  %v1835_v3 = vadd.f32 %v6434_v13, %v7742_v23 }
 0x376   :  { %v1826_v11 = vpop.f32.mrf.mxu1 }
 0x377   :  { %v2073_v55 = vpack.c.bf16 %v2018_v17, %v2017_v16  ;;  %v1827_v14 = vadd.f32 %v1826_v11, %v7742_v23  ;;  %v2023_v36 = vmax.f32 %v1835_v3, 0.0  ;;  %6489 = vmatpush3.bf16.msra.mxu1 %v6990_v59 }
 0x378   :  { %v6435_v21 = vpop.f32.mrf.mxu1  ;;  %6490 = vmatprep.subr.bf16.mxu1 %v6991_v56 }
 0x379   :  { %2266 = vmatmul.mubr.bf16.gmra.mxu0 %v2069_v15  ;;  %v2021_v27 = vmax.f32 %v1827_v14, 0.0  ;;  %v1838_v31 = vadd.f32 %v6435_v21, %v7742_v23 }
 0x37a   :  { %2275 = vmatprep.mubr.bf16.mxu0 %v7178_v54  ;;  %v1829_v10 = vpop.f32.mrf.mxu1 }
 0x37b   :  { %v1830_v32 = vadd.f32 %v1829_v10, %v7742_v23  ;;  %v2024_v18 = vmax.f32 %v1838_v31, 0.0  ;;  %6491 = vmatpush3.bf16.msra.mxu1 %v6991_v56 }
 0x37c   :  { %v6438_v4 = vpop.f32.mrf.mxu1 }
 0x37d   :  { %v2022_v28 = vmax.f32 %v1830_v32, 0.0  ;;  %v2076_v41 = vpack.c.bf16 %v2024_v18, %v2023_v36  ;;  %v1851_v33 = vadd.f32 %v6438_v4, %v7742_v23 }
 0x37e   :  { %v1842_v29 = vpop.f32.mrf.mxu1 }
 0x37f   :  { %v2075_v34 = vpack.c.bf16 %v2022_v28, %v2021_v27  ;;  %v1843_v43 = vadd.f32 %v1842_v29, %v7742_v23  ;;  %v2027_v61 = vmax.f32 %v1851_v33, 0.0 }
 0x380   :  { %v6439_v35 = vpop.f32.mrf.mxu1 }
 0x381   :  { %2276 = vmatmul.mubr.bf16.gmra.mxu0 %v2070_v50  ;;  %v2025_v62 = vmax.f32 %v1843_v43, 0.0  ;;  %v1854_v48 = vadd.f32 %v6439_v35, %v7742_v23 }
 0x382   :  { %2285 = vmatprep.mubr.bf16.mxu0 %v7178_v54  ;;  %v1845_v38 = vpop.f32.mrf.mxu1 }
 0x383   :  { %v1846_v57 = vadd.f32 %v1845_v38, %v7742_v23  ;;  %v2028_v63 = vmax.f32 %v1854_v48, 0.0 }
 0x384   :  { %v6442_v44 = vpop.f32.mrf.mxu1 }
 0x385   :  { %v2026_v15 = vmax.f32 %v1846_v57, 0.0  ;;  %v2078_v9 = vpack.c.bf16 %v2028_v63, %v2027_v61  ;;  %v1867_v58 = vadd.f32 %v6442_v44, %v7742_v23 }
 0x386   :  { %v1858_v47 = vpop.f32.mrf.mxu1 }
 0x387   :  { %v2077_v49 = vpack.c.bf16 %v2026_v15, %v2025_v62  ;;  %v1859_v24 = vadd.f32 %v1858_v47, %v7742_v23  ;;  %v2031_v13 = vmax.f32 %v1867_v58, 0.0 }
 0x388   :  { %v6443_v50 = vpop.f32.mrf.mxu1 }
 0x389   :  { %2286 = vmatmul.mubr.bf16.gmra.mxu0 %v2071_v1  ;;  %v2029_v5 = vmax.f32 %v1859_v24, 0.0 }
 0x38a   :  { %2295 = vmatprep.mubr.bf16.mxu0 %v7178_v54  ;;  %v1861_v0 = vpop.f32.mrf.mxu1 }
 0x38b   :  { %v1862_v45 = vadd.f32 %v1861_v0, %v7742_v23 }
 0x38c   :  { %v6446_v1 = vpop.f32.mrf.mxu1 }
 0x38d   :  { %v2030_v2 = vmax.f32 %v1862_v45, 0.0  ;;  %v1883_v10 = vadd.f32 %v6446_v1, %v7742_v23 }
 0x38e   :  { %v1874_v6 = vpop.f32.mrf.mxu1 }
 0x38f   :  { %v2079_v42 = vpack.c.bf16 %v2030_v2, %v2029_v5  ;;  %v1875_v19 = vadd.f32 %v1874_v6, %v7742_v23  ;;  %v2035_v4 = vmax.f32 %v1883_v10, 0.0  ;;  %v7153_v10 = vld [vmem:[%s9499_s4] sm:$0xff] }
 0x390   :  { %v6447_v12 = vpop.f32.mrf.mxu1 }
 0x391   :  { %2296 = vmatmul.mubr.bf16.gmra.mxu0 %v2072_v8  ;;  %v1870_v8 = vadd.f32 %v6443_v50, %v7742_v23  ;;  %v2033_v21 = vmax.f32 %v1875_v19, 0.0 }
 0x392   :  { %2305 = vmatprep.mubr.bf16.mxu0 %v7178_v54  ;;  %v1877_v17 = vpop.f32.mrf.mxu1 }
 0x393   :  { %v2032_v16 = vmax.f32 %v1870_v8, 0.0  ;;  %v1878_v20 = vadd.f32 %v1877_v17, %v7742_v23 }
 0x395   :  { %v2080_v11 = vpack.c.bf16 %v2032_v16, %v2031_v13  ;;  %v2034_v22 = vmax.f32 %v1878_v20, 0.0  ;;  %v2548_v20 = vsub.s32 4, %v7370_v52 }
 0x397   :  { %v2081_v14 = vpack.c.bf16 %v2034_v22, %v2033_v21 }
 0x399   :  { %2306 = vmatmul.mubr.bf16.gmra.mxu0 %v2073_v55  ;;  %v6450_v55 = vpop.f32.mrf.mxu1 }
 0x39a   :  { %2315 = vmatprep.mubr.bf16.mxu0 %v7178_v54  ;;  %v1899_v51 = vadd.f32 %v6450_v55, %v7742_v23 }
 0x39b   :  { %v1890_v25 = vpop.f32.mrf.mxu1 }
 0x39c   :  { %v1891_v29 = vadd.f32 %v1890_v25, %v7742_v23  ;;  %v2039_v40 = vmax.f32 %v1899_v51, 0.0  ;;  %v2616_v25 = vsub.s32 5, %v7370_v52 }
 0x39d   :  { %v6451_v32 = vpop.f32.mrf.mxu1 }
 0x39e   :  { %v2037_v31 = vmax.f32 %v1891_v29, 0.0  ;;  %v1902_v36 = vadd.f32 %v6451_v32, %v7742_v23 }
 0x39f   :  { %v1893_v27 = vpop.f32.mrf.mxu1 }
 0x3a0   :  { %v1894_v30 = vadd.f32 %v1893_v27, %v7742_v23  ;;  %v7851_v27 = vrot.slane %v7153_v10, %v2616_v25 }
 0x3a1   :  { %2316 = vmatmul.mubr.bf16.gmra.mxu0 %v2074_v26  ;;  %v1886_v26 = vadd.f32 %v6447_v12, %v7742_v23  ;;  %v6454_v3 = vpop.f32.mrf.mxu1 }
 0x3a2   :  { %2325 = vmatprep.mubr.bf16.mxu0 %v7178_v54  ;;  %v1915_v33 = vadd.f32 %v6454_v3, %v7742_v23 }
 0x3a3   :  { %v2036_v60 = vmax.f32 %v1886_v26, 0.0  ;;  %v1906_v35 = vpop.f32.mrf.mxu1  ;;  %v7847_v26 = vrot.slane %v7153_v10, %v2548_v20  ;;  %v2682_v20 = vld [vmem:[%s9496_s1] sm:$0xff] }
 0x3a4   :  { %v1907_v44 = vadd.f32 %v1906_v35, %v7742_v23  ;;  %v2043_v59 = vmax.f32 %v1915_v33, 0.0 }
 0x3a5   :  { %v2082_v28 = vpack.c.bf16 %v2036_v60, %v2035_v4  ;;  %v6455_v38 = vpop.f32.mrf.mxu1 }
 0x3a6   :  { %v2041_v15 = vmax.f32 %v1907_v44, 0.0  ;;  %v1918_v48 = vadd.f32 %v6455_v38, %v7742_v23 }
 0x3a7   :  { %v1909_v43 = vpop.f32.mrf.mxu1 }
 0x3a8   :  { %v1910_v46 = vadd.f32 %v1909_v43, %v7742_v23  ;;  %v2044_v61 = vmax.f32 %v1918_v48, 0.0 }
 0x3a9   :  { %2326 = vmatmul.mubr.bf16.gmra.mxu0 %v2075_v34  ;;  %v2038_v34 = vmax.f32 %v1894_v30, 0.0  ;;  %v6458_v62 = vpop.f32.mrf.mxu1 }
 0x3aa   :  { %2335 = vmatprep.mubr.bf16.mxu0 %v7178_v54  ;;  %v2042_v47 = vmax.f32 %v1910_v46, 0.0  ;;  %v2086_v0 = vpack.c.bf16 %v2044_v61, %v2043_v59  ;;  %v1931_v2 = vadd.f32 %v6458_v62, %v7742_v23 }
 0x3ab   :  { %v2083_v18 = vpack.c.bf16 %v2038_v34, %v2037_v31  ;;  %v1922_v39 = vpop.f32.mrf.mxu1 }
 0x3ac   :  { %v1923_v56 = vadd.f32 %v1922_v39, %v7742_v23 }
 0x3ad   :  { %v6459_v50 = vpop.f32.mrf.mxu1 }
 0x3ae   :  { %v2045_v45 = vmax.f32 %v1923_v56, 0.0  ;;  %v1934_v6 = vadd.f32 %v6459_v50, %v7742_v23 }
 0x3af   :  { %v1925_v63 = vpop.f32.mrf.mxu1 }
 0x3b0   :  { %v2048_v12 = vmax.f32 %v1934_v6, 0.0 }
 0x3b1   :  { %2336 = vmatmul.mubr.bf16.gmra.mxu0 %v2076_v41  ;;  %v2040_v41 = vmax.f32 %v1902_v36, 0.0  ;;  %v6462_v24 = vpop.f32.mrf.mxu1 }
 0x3b2   :  { %2345 = vmatprep.mubr.bf16.mxu0 %v7178_v54 }
 0x3b3   :  { %v2084_v57 = vpack.c.bf16 %v2040_v41, %v2039_v40  ;;  %v1938_v5 = vpop.f32.mrf.mxu1 }
 0x3b4   :  { %v1939_v17 = vadd.f32 %v1938_v5, %v7742_v23 }
 0x3b5   :  { %v6463_v8 = vpop.f32.mrf.mxu1 }
 0x3b6   :  { %v2049_v55 = vmax.f32 %v1939_v17, 0.0  ;;  %v1950_v32 = vadd.f32 %v6463_v8, %v7742_v23 }
 0x3b7   :  { %v1941_v13 = vpop.f32.mrf.mxu1 }
 0x3b8   :  { %v2052_v3 = vmax.f32 %v1950_v32, 0.0 }
 0x3b9   :  { %2346 = vmatmul.mubr.bf16.gmra.mxu0 %v2077_v49  ;;  %v2085_v49 = vpack.c.bf16 %v2042_v47, %v2041_v15  ;;  %v6466_v19 = vpop.f32.mrf.mxu1 }
 0x3ba   :  { %2355 = vmatprep.mubr.bf16.mxu0 %v7178_v54  ;;  %v1963_v56 = vadd.f32 %v6466_v19, %v7742_v23 }
 0x3bb   :  { %v1954_v22 = vpop.f32.mrf.mxu1 }
 0x3bc   :  { %v1955_v40 = vadd.f32 %v1954_v22, %v7742_v23 }
 0x3bd   :  { %v6467_v60 = vpop.f32.mrf.mxu1 }
 0x3be   :  { %v2053_v39 = vmax.f32 %v1955_v40, 0.0 }
 0x3bf   :  { %v1957_v34 = vpop.f32.mrf.mxu1 }
 0x3c0   :  { %v1958_v41 = vadd.f32 %v1957_v34, %v7742_v23 }
 0x3c1   :  { %2356 = vmatmul.mubr.bf16.gmra.mxu0 %v2078_v9  ;;  %v1926_v9 = vadd.f32 %v1925_v63, %v7742_v23 }
 0x3c2   :  { %2365 = vmatprep.mubr.bf16.mxu0 %v7178_v54  ;;  %v2054_v33 = vmax.f32 %v1958_v41, 0.0 }
 0x3c3   :  { %v2046_v1 = vmax.f32 %v1926_v9, 0.0  ;;  %v1966_v9 = vadd.f32 %v6467_v60, %v7742_v23 }
 0x3c5   :  { %v2087_v58 = vpack.c.bf16 %v2046_v1, %v2045_v45 }
 0x3c9   :  { %2366 = vmatmul.mubr.bf16.gmra.mxu0 %v2079_v42  ;;  %v2047_v42 = vmax.f32 %v1931_v2, 0.0 }
 0x3ca   :  { %2375 = vmatprep.mubr.bf16.mxu0 %v7178_v54 }
 0x3cb   :  { %v2088_v16 = vpack.c.bf16 %v2048_v12, %v2047_v42  ;;  %v2055_v42 = vmax.f32 %v1963_v56, 0.0  ;;  %v2056_v12 = vmax.f32 %v1966_v9, 0.0 }
 0x3cd   :  { %v2092_v25 = vpack.c.bf16 %v2056_v12, %v2055_v42 }
 0x3d1   :  { %2376 = vmatmul.mubr.bf16.gmra.mxu0 %v2080_v11  ;;  %v1942_v11 = vadd.f32 %v1941_v13, %v7742_v23 }
 0x3d2   :  { %2385 = vmatprep.mubr.bf16.mxu0 %v7178_v54 }
 0x3d3   :  { %v2050_v21 = vmax.f32 %v1942_v11, 0.0 }
 0x3d5   :  { %v2089_v4 = vpack.c.bf16 %v2050_v21, %v2049_v55 }
 0x3d9   :  { %2386 = vmatmul.mubr.bf16.gmra.mxu0 %v2081_v14  ;;  %v1947_v14 = vadd.f32 %v6462_v24, %v7742_v23  ;;  %v2091_v24 = vpack.c.bf16 %v2054_v33, %v2053_v39 }
 0x3da   :  { %2395 = vmatprep.mubr.bf16.mxu0 %v7178_v54 }
 0x3db   :  { %v2051_v30 = vmax.f32 %v1947_v14, 0.0 }
 0x3dd   :  { %v2090_v38 = vpack.c.bf16 %v2052_v3, %v2051_v30 }
 0x3e1   :  { %2396 = vmatmul.mubr.bf16.gmra.mxu0 %v2082_v28 }
 0x3e2   :  { %2405 = vmatprep.mubr.bf16.mxu0 %v7178_v54 }
 0x3e9   :  { %2406 = vmatmul.mubr.bf16.gmra.mxu0 %v2083_v18 }
 0x3ea   :  { %2415 = vmatprep.mubr.bf16.mxu0 %v7178_v54 }
 0x3f1   :  { %2416 = vmatmul.mubr.bf16.gmra.mxu0 %v2084_v57  ;;  %v7870_v57 = vpop.f32.mrf.mxu1 }
 0x3f2   :  { %2425 = vmatprep.mubr.bf16.mxu0 %v7178_v54 }
 0x3f9   :  { %2426 = vmatmul.mubr.bf16.gmra.mxu0 %v2085_v49  ;;  %v1970_v49 = vpop.f32.mrf.mxu1 }
 0x3fa   :  { %2435 = vmatprep.mubr.bf16.mxu0 %v7178_v54  ;;  %v1971_v10 = vadd.f32 %v1970_v49, %v7742_v23 }
 0x3fb   :  { %v6471_v1 = vpop.f32.mrf.mxu1 }
 0x401   :  { %2436 = vmatmul.mubr.bf16.gmra.mxu0 %v2086_v0 }
 0x402   :  { %2445 = vmatprep.mubr.bf16.mxu0 %v7178_v54 }
 0x409   :  { %2446 = vmatmul.mubr.bf16.gmra.mxu0 %v2087_v58 }
 0x40a   :  { %2455 = vmatprep.mubr.bf16.mxu0 %v7178_v54 }
 0x411   :  { %2456 = vmatmul.mubr.bf16.gmra.mxu0 %v2088_v16  ;;  %v1973_v16 = vpop.f32.mrf.mxu1 }
 0x412   :  { %2465 = vmatprep.mubr.bf16.mxu0 %v7178_v54  ;;  %v1974_v14 = vadd.f32 %v1973_v16, %v7742_v23 }
 0x414   :  { %v2058_v40 = vmax.f32 %v1974_v14, 0.0 }
 0x419   :  { %v2227_v28 = vpop.f32.mrf.mxu0  ;;  %2466 = vmatmul.mubr.bf16.gmra.mxu0 %v2089_v4  ;;  %v7925_v4 = vpop.f32.mrf.mxu1 }
 0x41a   :  { %v7854_v29 = vadd.f32 %v7847_v26, %v2227_v28  ;;  %2475 = vmatprep.mubr.bf16.mxu0 %v7178_v54 }
 0x41b   :  { %v2229_v31 = vpop.f32.mrf.mxu0 }
 0x41c   :  { %3130 = vst [vmem:[%s9501_s6 + $0x8] sm:$0xff] %v7854_v29  ;;  %v2618_v35 = vadd.f32 %v7851_v27, %v2229_v31  ;;  %v2683_v31 = vld [vmem:[%s9496_s1 + $0x8] sm:$0xff] }
 0x41d   :  { %v2231_v51 = vpop.f32.mrf.mxu0 }
 0x41e   :  { %v2746_v36 = vmul.f32 0.5, %v2618_v35  ;;  %3194 = vst [vmem:[%s9501_s6 + $0x10] sm:$0xff] %v2618_v35  ;;  %v7866_v18 = vadd.f32 %v7847_v26, %v2231_v51 }
 0x41f   :  { %v2233_v43 = vpop.f32.mrf.mxu0 }
 0x420   :  { %v2810_v44 = vmul.f32 1.442695, %v2746_v36  ;;  %3131 = vst [vmem:[%s9501_s6 + $0x20] sm:$0xff] %v7866_v18  ;;  %v2619_v46 = vadd.f32 %v7851_v27, %v2233_v43  ;;  %v1986_v43 = vpop.f32.mrf.mxu1 }
 0x421   :  { %v2237_v62 = vpop.f32.mrf.mxu0  ;;  %2476 = vmatmul.mubr.bf16.gmra.mxu0 %v2090_v38  ;;  %v2057_v38 = vmax.f32 %v1971_v10, 0.0 }
 0x422   :  { %7024 = vpow2.f32 %v2810_v44  ;;  %v2747_v15 = vmul.f32 0.5, %v2619_v46  ;;  %3195 = vst [vmem:[%s9501_s6 + $0x28] sm:$0xff] %v2619_v46  ;;  %v7881_v47 = vadd.f32 %v7847_v26, %v2237_v62  ;;  %2485 = vmatprep.mubr.bf16.mxu0 %v7178_v54  ;;  %v7964_v56 = vpop.f32.mrf.mxu1 }
 0x423   :  { %v2239_v48 = vpop.f32.mrf.mxu0 }
 0x424   :  { %v2812_v50 = vmul.f32 1.442695, %v2747_v15  ;;  %3132 = vst [vmem:[%s9501_s6 + $0x38] sm:$0xff] %v7881_v47  ;;  %v2620_v59 = vadd.f32 %v7851_v27, %v2239_v48  ;;  %v1989_v16 = vpop.f32.mrf.mxu1 }
 0x425   :  { %v2241_v61 = vpop.f32.mrf.mxu0 }
 0x426   :  { %7026 = vpow2.f32 %v2812_v50  ;;  %v2748_v63 = vmul.f32 0.5, %v2620_v59  ;;  %3196 = vst [vmem:[%s9501_s6 + $0x40] sm:$0xff] %v2620_v59  ;;  %v7893_v0 = vadd.f32 %v7847_v26, %v2241_v61  ;;  %v1979_v50 = vadd.f32 %v7870_v57, %v7742_v23  ;;  %v2685_v57 = vld [vmem:[%s9496_s1 + $0x18] sm:$0xff] }
 0x427   :  { %v2243_v45 = vpop.f32.mrf.mxu0  ;;  %v1982_v59 = vadd.f32 %v6471_v1, %v7742_v23  ;;  %v2093_v61 = vpack.c.bf16 %v2058_v40, %v2057_v38 }
 0x428   :  { %v2814_v5 = vmul.f32 1.442695, %v2748_v63  ;;  %3133 = vst [vmem:[%s9501_s6 + $0x50] sm:$0xff] %v7893_v0  ;;  %v2621_v2 = vadd.f32 %v7851_v27, %v2243_v45  ;;  %v2059_v42 = vmax.f32 %v1979_v50, 0.0 }
 0x429   :  { %v2247_v6 = vpop.f32.mrf.mxu0  ;;  %2486 = vmatmul.mubr.bf16.gmra.mxu0 %v2091_v24  ;;  %v2060_v12 = vmax.f32 %v1982_v59, 0.0 }
 0x42a   :  { %7028 = vpow2.f32 %v2814_v5  ;;  %v2749_v58 = vmul.f32 0.5, %v2621_v2  ;;  %3197 = vst [vmem:[%s9501_s6 + $0x58] sm:$0xff] %v2621_v2  ;;  %v7906_v8 = vadd.f32 %v7847_v26, %v2247_v6  ;;  %2495 = vmatprep.mubr.bf16.mxu0 %v7178_v54 }
 0x42b   :  { %v2249_v13 = vpop.f32.mrf.mxu0  ;;  %v2094_v14 = vpack.c.bf16 %v2060_v12, %v2059_v42 }
 0x42c   :  { %v2816_v17 = vmul.f32 1.442695, %v2749_v58  ;;  %3134 = vst [vmem:[%s9501_s6 + $0x68] sm:$0xff] %v7906_v8  ;;  %v2622_v11 = vadd.f32 %v7851_v27, %v2249_v13 }
 0x42d   :  { %v2251_v19 = vpop.f32.mrf.mxu0 }
 0x42e   :  { %7030 = vpow2.f32 %v2816_v17  ;;  %v2750_v55 = vmul.f32 0.5, %v2622_v11  ;;  %3198 = vst [vmem:[%s9501_s6 + $0x70] sm:$0xff] %v2622_v11  ;;  %v7921_v21 = vadd.f32 %v7847_v26, %v2251_v19 }
 0x42f   :  { %v7025_v22 = vpop.eup %7024  ;;  %v2253_v32 = vpop.f32.mrf.mxu0 }
 0x430   :  { %v2818_v60 = vmul.f32 1.442695, %v2750_v55  ;;  %3135 = vst [vmem:[%s9501_s6 + $0x80] sm:$0xff] %v7921_v21  ;;  %v2623_v28 = vadd.f32 %v7851_v27, %v2253_v32  ;;  %v2938_v30 = vmul.f32 %v7025_v22, %v2682_v20  ;;  %v1987_v32 = vadd.f32 %v1986_v43, %v7742_v23 }
 0x431   :  { %v2257_v3 = vpop.f32.mrf.mxu0  ;;  %2496 = vmatmul.mubr.bf16.gmra.mxu0 %v2092_v25 }
 0x432   :  { %7032 = vpow2.f32 %v2818_v60  ;;  %v2751_v34 = vmul.f32 0.5, %v2623_v28  ;;  %3199 = vst [vmem:[%s9501_s6 + $0x88] sm:$0xff] %v2623_v28  ;;  %v7939_v35 = vadd.f32 %v7847_v26, %v2257_v3  ;;  %2505 = vmatprep.mubr.bf16.mxu0 %v7178_v54  ;;  %v3002_v51 = vadd.f32 %v2938_v30, %v7854_v29  ;;  %v2684_v29 = vld [vmem:[%s9496_s1 + $0x10] sm:$0xff] }
 0x433   :  { %v7027_v36 = vpop.eup %7026  ;;  %v2259_v41 = vpop.f32.mrf.mxu0  ;;  %v1990_v60 = vadd.f32 %v1989_v16, %v7742_v23  ;;  %v2061_v43 = vmax.f32 %v1987_v32, 0.0 }
 0x434   :  { %v2820_v44 = vmul.f32 1.442695, %v2751_v34  ;;  %3136 = vst [vmem:[%s9501_s6 + $0x98] sm:$0xff] %v7939_v35  ;;  %v2624_v46 = vadd.f32 %v7851_v27, %v2259_v41  ;;  %v2939_v62 = vmul.f32 %v7027_v36, %v2683_v31  ;;  %3066 = vst [vmem:[%s9501_s6] sm:$0xff] %v3002_v51 }
 0x435   :  { %v2261_v15 = vpop.f32.mrf.mxu0 }
 0x436   :  { %7034 = vpow2.f32 %v2820_v44  ;;  %v2752_v39 = vmul.f32 0.5, %v2624_v46  ;;  %3200 = vst [vmem:[%s9501_s6 + $0xa0] sm:$0xff] %v2624_v46  ;;  %v7958_v33 = vadd.f32 %v7847_v26, %v2261_v15  ;;  %v3003_v48 = vadd.f32 %v2939_v62, %v7866_v18 }
 0x437   :  { %v7029_v49 = vpop.eup %7028  ;;  %v2263_v63 = vpop.f32.mrf.mxu0  ;;  %v2062_v44 = vmax.f32 %v1990_v60, 0.0 }
 0x438   :  { %v2940_v9 = vmul.f32 %v7029_v49, %v2684_v29  ;;  %v2822_v24 = vmul.f32 1.442695, %v2752_v39  ;;  %3137 = vst [vmem:[%s9501_s6 + $0xb0] sm:$0xff] %v7958_v33  ;;  %v2625_v45 = vadd.f32 %v7851_v27, %v2263_v63  ;;  %3067 = vst [vmem:[%s9501_s6 + $0x18] sm:$0xff] %v3003_v48  ;;  %v3258_v18 = vpack.c.bf16 %v3003_v48, %v3002_v51  ;;  %v2687_v51 = vld [vmem:[%s9496_s1 + $0x28] sm:$0xff] }
 0x439   :  { %v2267_v1 = vpop.f32.mrf.mxu0  ;;  %2506 = vmatmul.mubr.bf16.gmra.mxu0 %v2093_v61  ;;  %v1995_v61 = vadd.f32 %v7925_v4, %v7742_v23  ;;  %v1998_v63 = vadd.f32 %v7964_v56, %v7742_v23  ;;  %v2689_v23 = vld [vmem:[%s9496_s1 + $0x38] sm:$0xff] }
 0x43a   :  { %7036 = vpow2.f32 %v2822_v24  ;;  %v2753_v5 = vmul.f32 0.5, %v2625_v45  ;;  %3201 = vst [vmem:[%s9501_s6 + $0xb8] sm:$0xff] %v2625_v45  ;;  %v7981_v2 = vadd.f32 %v7847_v26, %v2267_v1  ;;  %6492 = vmatprep.mubr.bf16.mxu1 %v3258_v18  ;;  %2515 = vmatprep.mubr.bf16.mxu0 %v7178_v54  ;;  %v3004_v6 = vadd.f32 %v2940_v9, %v7881_v47  ;;  %v2686_v47 = vld [vmem:[%s9496_s1 + $0x20] sm:$0xff] }
 0x43b   :  { %v7031_v58 = vpop.eup %7030  ;;  %v2269_v13 = vpop.f32.mrf.mxu0  ;;  %v2095_v9 = vpack.c.bf16 %v2062_v44, %v2061_v43  ;;  %v2064_v42 = vmax.f32 %v1998_v63, 0.0 }
 0x43c   :  { %v2941_v17 = vmul.f32 %v7031_v58, %v2685_v57  ;;  %v2824_v11 = vmul.f32 1.442695, %v2753_v5  ;;  %3138 = vst [vmem:[%s9501_s6 + $0xc8] sm:$0xff] %v7981_v2  ;;  %v2626_v19 = vadd.f32 %v7851_v27, %v2269_v13  ;;  %3068 = vst [vmem:[%s9501_s6 + $0x30] sm:$0xff] %v3004_v6  ;;  %v2063_v58 = vmax.f32 %v1995_v61, 0.0 }
 0x43d   :  { %v2271_v20 = vpop.f32.mrf.mxu0 }
 0x43e   :  { %7038 = vpow2.f32 %v2824_v11  ;;  %v2754_v55 = vmul.f32 0.5, %v2626_v19  ;;  %3202 = vst [vmem:[%s9501_s6 + $0xd0] sm:$0xff] %v2626_v19  ;;  %v8000_v22 = vadd.f32 %v7847_v26, %v2271_v20  ;;  %v3005_v25 = vadd.f32 %v2941_v17, %v7893_v0 }
 0x43f   :  { %v7033_v10 = vpop.eup %7032  ;;  %v2273_v28 = vpop.f32.mrf.mxu0 }
 0x440   :  { %v2826_v30 = vmul.f32 1.442695, %v2754_v55  ;;  %3139 = vst [vmem:[%s9501_s6 + $0xe0] sm:$0xff] %v8000_v22  ;;  %v2627_v3 = vadd.f32 %v7851_v27, %v2273_v28  ;;  %3069 = vst [vmem:[%s9501_s6 + $0x48] sm:$0xff] %v3005_v25  ;;  %v3259_v0 = vpack.c.bf16 %v3005_v25, %v3004_v6  ;;  %v2942_v31 = vmul.f32 %v7033_v10, %v2686_v47 }
 0x441   :  { %v2277_v34 = vpop.f32.mrf.mxu0  ;;  %2516 = vmatmul.mubr.bf16.gmra.mxu0 %v2094_v14  ;;  %v2096_v55 = vpack.c.bf16 %v2064_v42, %v2063_v58 }
 0x442   :  { %7040 = vpow2.f32 %v2826_v30  ;;  %v2755_v36 = vmul.f32 0.5, %v2627_v3  ;;  %3203 = vst [vmem:[%s9501_s6 + $0xe8] sm:$0xff] %v2627_v3  ;;  %v8020_v38 = vadd.f32 %v7847_v26, %v2277_v34  ;;  %6493 = vmatmul.mubr.bf16.vlgmr.msra.gmra.mxu1 %v3259_v0  ;;  %2525 = vmatprep.mubr.bf16.mxu0 %v7178_v54  ;;  %v3006_v40 = vadd.f32 %v2942_v31, %v7906_v8  ;;  %v2688_v8 = vld [vmem:[%s9496_s1 + $0x30] sm:$0xff] }
 0x443   :  { %v7035_v41 = vpop.eup %7034  ;;  %v2279_v46 = vpop.f32.mrf.mxu0 }
 0x444   :  { %v2828_v62 = vmul.f32 1.442695, %v2755_v36  ;;  %3140 = vst [vmem:[%s9501_s6 + $0xf8] sm:$0xff] %v8020_v38  ;;  %v2628_v29 = vadd.f32 %v7851_v27, %v2279_v46  ;;  %v2943_v15 = vmul.f32 %v7035_v41, %v2687_v51  ;;  %3070 = vst [vmem:[%s9501_s6 + $0x60] sm:$0xff] %v3006_v40 }
 0x445   :  { %v2281_v39 = vpop.f32.mrf.mxu0 }
 0x446   :  { %7042 = vpow2.f32 %v2828_v62  ;;  %v2756_v48 = vmul.f32 0.5, %v2628_v29  ;;  %3204 = vst [vmem:[%s9501_s6 + $0x100] sm:$0xff] %v2628_v29  ;;  %v8039_v49 = vadd.f32 %v7847_v26, %v2281_v39  ;;  %v3007_v50 = vadd.f32 %v2943_v15, %v7921_v21 }
 0x447   :  { %v7037_v59 = vpop.eup %7036  ;;  %v2283_v24 = vpop.f32.mrf.mxu0 }
 0x448   :  { %v2830_v45 = vmul.f32 1.442695, %v2756_v48  ;;  %3141 = vst [vmem:[%s9501_s6 + $0x110] sm:$0xff] %v8039_v49  ;;  %v2629_v18 = vadd.f32 %v7851_v27, %v2283_v24  ;;  %3071 = vst [vmem:[%s9501_s6 + $0x78] sm:$0xff] %v3007_v50  ;;  %v3260_v21 = vpack.c.bf16 %v3007_v50, %v3006_v40  ;;  %v2944_v57 = vmul.f32 %v7037_v59, %v2688_v8 }
 0x449   :  { %v2287_v4 = vpop.f32.mrf.mxu0  ;;  %2526 = vmatmul.mubr.bf16.gmra.mxu0 %v2095_v9 }
 0x44a   :  { %7044 = vpow2.f32 %v2830_v45  ;;  %v2757_v56 = vmul.f32 0.5, %v2629_v18  ;;  %3205 = vst [vmem:[%s9501_s6 + $0x118] sm:$0xff] %v2629_v18  ;;  %v8061_v1 = vadd.f32 %v7847_v26, %v2287_v4  ;;  %6496 = vmatprep.mubr.bf16.mxu1 %v3260_v21  ;;  %2535 = vmatprep.mubr.bf16.mxu0 %v7178_v54  ;;  %v3008_v5 = vadd.f32 %v2944_v57, %v7939_v35  ;;  %v2690_v35 = vld [vmem:[%s9496_s1 + $0x40] sm:$0xff] }
 0x44b   :  { %v7039_v6 = vpop.eup %7038  ;;  %v2289_v12 = vpop.f32.mrf.mxu0 }
 0x44c   :  { %v2832_v13 = vmul.f32 1.442695, %v2757_v56  ;;  %3142 = vst [vmem:[%s9501_s6 + $0x128] sm:$0xff] %v8061_v1  ;;  %v2630_v16 = vadd.f32 %v7851_v27, %v2289_v12  ;;  %v2945_v17 = vmul.f32 %v7039_v6, %v2689_v23  ;;  %3072 = vst [vmem:[%s9501_s6 + $0x90] sm:$0xff] %v3008_v5 }
 0x44d   :  { %v2291_v54 = vpop.f32.mrf.mxu0 }
 0x44e   :  { %7046 = vpow2.f32 %v2832_v13  ;;  %v2758_v11 = vmul.f32 0.5, %v2630_v16  ;;  %3206 = vst [vmem:[%s9501_s6 + $0x130] sm:$0xff] %v2630_v16  ;;  %v8080_v19 = vadd.f32 %v7847_v26, %v2291_v54  ;;  %v3009_v20 = vadd.f32 %v2945_v17, %v7958_v33  ;;  %v2691_v33 = vld [vmem:[%s9496_s1 + $0x48] sm:$0xff] }
 0x44f   :  { %v7041_v47 = vpop.eup %7040  ;;  %v2293_v25 = vpop.f32.mrf.mxu0 }
 0x450   :  { %v2834_v10 = vmul.f32 1.442695, %v2758_v11  ;;  %3143 = vst [vmem:[%s9501_s6 + $0x140] sm:$0xff] %v8080_v19  ;;  %v2631_v14 = vadd.f32 %v7851_v27, %v2293_v25  ;;  %3073 = vst [vmem:[%s9501_s6 + $0xa8] sm:$0xff] %v3009_v20  ;;  %v3261_v32 = vpack.c.bf16 %v3009_v20, %v3008_v5  ;;  %v2946_v60 = vmul.f32 %v7041_v47, %v2690_v35 }
 0x451   :  { %v2297_v28 = vpop.f32.mrf.mxu0  ;;  %2536 = vmatmul.mubr.bf16.gmra.mxu0 %v2096_v55 }
 0x452   :  { %7048 = vpow2.f32 %v2834_v10  ;;  %v2759_v30 = vmul.f32 0.5, %v2631_v14  ;;  %3207 = vst [vmem:[%s9501_s6 + $0x148] sm:$0xff] %v2631_v14  ;;  %v8098_v3 = vadd.f32 %v7847_v26, %v2297_v28  ;;  %6497 = vmatmul.mubr.bf16.gmra.mxu1 %v3261_v32  ;;  %v3010_v0 = vadd.f32 %v2946_v60, %v7981_v2  ;;  %v2692_v2 = vld [vmem:[%s9496_s1 + $0x50] sm:$0xff] }
 0x453   :  { %v7043_v31 = vpop.eup %7042  ;;  %v2299_v34 = vpop.f32.mrf.mxu0 }
 0x454   :  { %v2836_v51 = vmul.f32 1.442695, %v2759_v30  ;;  %3144 = vst [vmem:[%s9501_s6 + $0x158] sm:$0xff] %v8098_v3  ;;  %v2632_v36 = vadd.f32 %v7851_v27, %v2299_v34  ;;  %v2947_v40 = vmul.f32 %v7043_v31, %v2691_v33  ;;  %3074 = vst [vmem:[%s9501_s6 + $0xc0] sm:$0xff] %v3010_v0 }
 0x455   :  { %v2301_v41 = vpop.f32.mrf.mxu0 }
 0x456   :  { %7050 = vpow2.f32 %v2836_v51  ;;  %v2760_v43 = vmul.f32 0.5, %v2632_v36  ;;  %3208 = vst [vmem:[%s9501_s6 + $0x160] sm:$0xff] %v2632_v36  ;;  %v8116_v44 = vadd.f32 %v7847_v26, %v2301_v41  ;;  %v3011_v46 = vadd.f32 %v2947_v40, %v8000_v22  ;;  %v2693_v22 = vld [vmem:[%s9496_s1 + $0x58] sm:$0xff] }
 0x457   :  { %v7045_v62 = vpop.eup %7044  ;;  %v2303_v29 = vpop.f32.mrf.mxu0 }
 0x458   :  { %v2838_v15 = vmul.f32 1.442695, %v2760_v43  ;;  %3145 = vst [vmem:[%s9501_s6 + $0x170] sm:$0xff] %v8116_v44  ;;  %v2633_v39 = vadd.f32 %v7851_v27, %v2303_v29  ;;  %3075 = vst [vmem:[%s9501_s6 + $0xd8] sm:$0xff] %v3011_v46  ;;  %v3262_v8 = vpack.c.bf16 %v3011_v46, %v3010_v0  ;;  %v2948_v48 = vmul.f32 %v7045_v62, %v2692_v2 }
 0x459   :  { %v2307_v50 = vpop.f32.mrf.mxu0 }
 0x45a   :  { %7052 = vpow2.f32 %v2838_v15  ;;  %v2761_v59 = vmul.f32 0.5, %v2633_v39  ;;  %3209 = vst [vmem:[%s9501_s6 + $0x178] sm:$0xff] %v2633_v39  ;;  %v8134_v61 = vadd.f32 %v7847_v26, %v2307_v50  ;;  %6500 = vmatprep.mubr.bf16.mxu1 %v3262_v8  ;;  %v3012_v63 = vadd.f32 %v2948_v48, %v8020_v38  ;;  %v2694_v38 = vld [vmem:[%s9496_s1 + $0x60] sm:$0xff] }
 0x45b   :  { %v7047_v9 = vpop.eup %7046  ;;  %v2309_v24 = vpop.f32.mrf.mxu0 }
 0x45c   :  { %v2840_v45 = vmul.f32 1.442695, %v2761_v59  ;;  %3146 = vst [vmem:[%s9501_s6 + $0x188] sm:$0xff] %v8134_v61  ;;  %v2634_v18 = vadd.f32 %v7851_v27, %v2309_v24  ;;  %v2949_v21 = vmul.f32 %v7047_v9, %v2693_v22  ;;  %3076 = vst [vmem:[%s9501_s6 + $0xf0] sm:$0xff] %v3012_v63 }
 0x45d   :  { %v2311_v57 = vpop.f32.mrf.mxu0 }
 0x45e   :  { %7054 = vpow2.f32 %v2840_v45  ;;  %v2762_v4 = vmul.f32 0.5, %v2634_v18  ;;  %3210 = vst [vmem:[%s9501_s6 + $0x190] sm:$0xff] %v2634_v18  ;;  %v8152_v23 = vadd.f32 %v7847_v26, %v2311_v57  ;;  %v3013_v56 = vadd.f32 %v2949_v21, %v8039_v49  ;;  %v2695_v49 = vld [vmem:[%s9496_s1 + $0x68] sm:$0xff] }
 0x45f   :  { %v7049_v5 = vpop.eup %7048  ;;  %v2313_v6 = vpop.f32.mrf.mxu0 }
 0x460   :  { %v2842_v58 = vmul.f32 1.442695, %v2762_v4  ;;  %3147 = vst [vmem:[%s9501_s6 + $0x1a0] sm:$0xff] %v8152_v23  ;;  %v2635_v42 = vadd.f32 %v7851_v27, %v2313_v6  ;;  %3077 = vst [vmem:[%s9501_s6 + $0x108] sm:$0xff] %v3013_v56  ;;  %v3263_v12 = vpack.c.bf16 %v3013_v56, %v3012_v63  ;;  %v2950_v13 = vmul.f32 %v7049_v5, %v2694_v38 }
 0x461   :  { %v2317_v16 = vpop.f32.mrf.mxu0 }
 0x462   :  { %7056 = vpow2.f32 %v2842_v58  ;;  %v2763_v17 = vmul.f32 0.5, %v2635_v42  ;;  %3211 = vst [vmem:[%s9501_s6 + $0x1a8] sm:$0xff] %v2635_v42  ;;  %v8170_v54 = vadd.f32 %v7847_v26, %v2317_v16  ;;  %6501 = vmatmul.mubr.bf16.gmra.mxu1 %v3263_v12  ;;  %v3014_v35 = vadd.f32 %v2950_v13, %v8061_v1  ;;  %v2696_v1 = vld [vmem:[%s9496_s1 + $0x70] sm:$0xff] }
 0x463   :  { %v7051_v11 = vpop.eup %7050  ;;  %v2319_v20 = vpop.f32.mrf.mxu0 }
 0x464   :  { %v2844_v47 = vmul.f32 1.442695, %v2763_v17  ;;  %3148 = vst [vmem:[%s9501_s6 + $0x1b8] sm:$0xff] %v8170_v54  ;;  %v2636_v55 = vadd.f32 %v7851_v27, %v2319_v20  ;;  %v2951_v25 = vmul.f32 %v7051_v11, %v2695_v49  ;;  %3078 = vst [vmem:[%s9501_s6 + $0x120] sm:$0xff] %v3014_v35 }
 0x465   :  { %v2321_v10 = vpop.f32.mrf.mxu0 }
 0x466   :  { %7058 = vpow2.f32 %v2844_v47  ;;  %v2764_v14 = vmul.f32 0.5, %v2636_v55  ;;  %3212 = vst [vmem:[%s9501_s6 + $0x1c0] sm:$0xff] %v2636_v55  ;;  %v8188_v32 = vadd.f32 %v7847_v26, %v2321_v10  ;;  %v3015_v60 = vadd.f32 %v2951_v25, %v8080_v19  ;;  %v2697_v19 = vld [vmem:[%s9496_s1 + $0x78] sm:$0xff] }
 0x467   :  { %v7053_v28 = vpop.eup %7052  ;;  %v2323_v33 = vpop.f32.mrf.mxu0 }
 0x468   :  { %v2846_v30 = vmul.f32 1.442695, %v2764_v14  ;;  %3149 = vst [vmem:[%s9501_s6 + $0x1d0] sm:$0xff] %v8188_v32  ;;  %v2637_v0 = vadd.f32 %v7851_v27, %v2323_v33  ;;  %3079 = vst [vmem:[%s9501_s6 + $0x138] sm:$0xff] %v3015_v60  ;;  %v3264_v31 = vpack.c.bf16 %v3015_v60, %v3014_v35  ;;  %v2952_v34 = vmul.f32 %v7053_v28, %v2696_v1 }
 0x469   :  { %v2327_v51 = vpop.f32.mrf.mxu0 }
 0x46a   :  { %7060 = vpow2.f32 %v2846_v30  ;;  %v2765_v36 = vmul.f32 0.5, %v2637_v0  ;;  %3213 = vst [vmem:[%s9501_s6 + $0x1d8] sm:$0xff] %v2637_v0  ;;  %v8206_v40 = vadd.f32 %v7847_v26, %v2327_v51  ;;  %6504 = vmatprep.mubr.bf16.mxu1 %v3264_v31  ;;  %v3016_v41 = vadd.f32 %v2952_v34, %v8098_v3  ;;  %v2698_v3 = vld [vmem:[%s9496_s1 + $0x80] sm:$0xff] }
 0x46b   :  { %v7055_v2 = vpop.eup %7054  ;;  %v2329_v43 = vpop.f32.mrf.mxu0 }
 0x46c   :  { %v2848_v46 = vmul.f32 1.442695, %v2765_v36  ;;  %3150 = vst [vmem:[%s9501_s6 + $0x1e8] sm:$0xff] %v8206_v40  ;;  %v2638_v62 = vadd.f32 %v7851_v27, %v2329_v43  ;;  %v2953_v29 = vmul.f32 %v7055_v2, %v2697_v19  ;;  %3080 = vst [vmem:[%s9501_s6 + $0x150] sm:$0xff] %v3016_v41 }
 0x46d   :  { %v2331_v15 = vpop.f32.mrf.mxu0 }
 0x46e   :  { %7062 = vpow2.f32 %v2848_v46  ;;  %v2766_v39 = vmul.f32 0.5, %v2638_v62  ;;  %3214 = vst [vmem:[%s9501_s6 + $0x1f0] sm:$0xff] %v2638_v62  ;;  %v8224_v8 = vadd.f32 %v7847_v26, %v2331_v15  ;;  %v3017_v48 = vadd.f32 %v2953_v29, %v8116_v44  ;;  %v2699_v44 = vld [vmem:[%s9496_s1 + $0x88] sm:$0xff] }
 0x46f   :  { %v7057_v50 = vpop.eup %7056  ;;  %v2333_v22 = vpop.f32.mrf.mxu0 }
 0x470   :  { %v2850_v59 = vmul.f32 1.442695, %v2766_v39  ;;  %3151 = vst [vmem:[%s9501_s6 + $0x200] sm:$0xff] %v8224_v8  ;;  %v2639_v63 = vadd.f32 %v7851_v27, %v2333_v22  ;;  %3081 = vst [vmem:[%s9501_s6 + $0x168] sm:$0xff] %v3017_v48  ;;  %v3265_v9 = vpack.c.bf16 %v3017_v48, %v3016_v41  ;;  %v2954_v24 = vmul.f32 %v7057_v50, %v2698_v3 }
 0x471   :  { %v2337_v45 = vpop.f32.mrf.mxu0 }
 0x472   :  { %7064 = vpow2.f32 %v2850_v59  ;;  %v2767_v18 = vmul.f32 0.5, %v2639_v63  ;;  %3215 = vst [vmem:[%s9501_s6 + $0x208] sm:$0xff] %v2639_v63  ;;  %v8242_v21 = vadd.f32 %v7847_v26, %v2337_v45  ;;  %6505 = vmatmul.mubr.bf16.gmra.mxu1 %v3265_v9  ;;  %v3018_v57 = vadd.f32 %v2954_v24, %v8134_v61  ;;  %v2700_v61 = vld [vmem:[%s9496_s1 + $0x90] sm:$0xff] }
 0x473   :  { %v7059_v38 = vpop.eup %7058  ;;  %v2339_v4 = vpop.f32.mrf.mxu0 }
 0x474   :  { %v2852_v56 = vmul.f32 1.442695, %v2767_v18  ;;  %3152 = vst [vmem:[%s9501_s6 + $0x218] sm:$0xff] %v8242_v21  ;;  %v2640_v5 = vadd.f32 %v7851_v27, %v2339_v4  ;;  %v2955_v6 = vmul.f32 %v7059_v38, %v2699_v44  ;;  %3082 = vst [vmem:[%s9501_s6 + $0x180] sm:$0xff] %v3018_v57 }
 0x475   :  { %v2341_v58 = vpop.f32.mrf.mxu0 }
 0x476   :  { %7066 = vpow2.f32 %v2852_v56  ;;  %v2768_v42 = vmul.f32 0.5, %v2640_v5  ;;  %3216 = vst [vmem:[%s9501_s6 + $0x220] sm:$0xff] %v2640_v5  ;;  %v8260_v12 = vadd.f32 %v7847_v26, %v2341_v58  ;;  %v3019_v13 = vadd.f32 %v2955_v6, %v8152_v23  ;;  %v2701_v23 = vld [vmem:[%s9496_s1 + $0x98] sm:$0xff] }
 0x477   :  { %v7061_v16 = vpop.eup %7060  ;;  %v2343_v49 = vpop.f32.mrf.mxu0 }
 0x478   :  { %v2854_v17 = vmul.f32 1.442695, %v2768_v42  ;;  %3153 = vst [vmem:[%s9501_s6 + $0x230] sm:$0xff] %v8260_v12  ;;  %v2641_v35 = vadd.f32 %v7851_v27, %v2343_v49  ;;  %3083 = vst [vmem:[%s9501_s6 + $0x198] sm:$0xff] %v3019_v13  ;;  %v3266_v11 = vpack.c.bf16 %v3019_v13, %v3018_v57  ;;  %v2956_v20 = vmul.f32 %v7061_v16, %v2700_v61 }
 0x479   :  { %v2347_v47 = vpop.f32.mrf.mxu0 }
 0x47a   :  { %7068 = vpow2.f32 %v2854_v17  ;;  %v2769_v55 = vmul.f32 0.5, %v2641_v35  ;;  %3217 = vst [vmem:[%s9501_s6 + $0x238] sm:$0xff] %v2641_v35  ;;  %v8278_v25 = vadd.f32 %v7847_v26, %v2347_v47  ;;  %6508 = vmatprep.mubr.bf16.mxu1 %v3266_v11  ;;  %v3020_v10 = vadd.f32 %v2956_v20, %v8170_v54  ;;  %v2702_v54 = vld [vmem:[%s9496_s1 + $0xa0] sm:$0xff]  ;;  %v6992_v47 = vld [vmem:[%s9497_s2 + $0x178] sm:$0xff]  }
 0x47b   :  { %v7063_v1 = vpop.eup %7062  ;;  %v2349_v14 = vpop.f32.mrf.mxu0  ;;  %6556 = vmatprep.subr.bf16.mxu1 %v6992_v47 }
 0x47c   :  { %v2856_v60 = vmul.f32 1.442695, %v2769_v55  ;;  %3154 = vst [vmem:[%s9501_s6 + $0x248] sm:$0xff] %v8278_v25  ;;  %v2642_v28 = vadd.f32 %v7851_v27, %v2349_v14  ;;  %v2957_v33 = vmul.f32 %v7063_v1, %v2701_v23  ;;  %3084 = vst [vmem:[%s9501_s6 + $0x1b0] sm:$0xff] %v3020_v10  ;;  %6557 = vmatpush3.bf16.msra.mxu1 %v6992_v47 }
 0x47d   :  { %v2351_v30 = vpop.f32.mrf.mxu0 }
 0x47e   :  { %7070 = vpow2.f32 %v2856_v60  ;;  %v2770_v0 = vmul.f32 0.5, %v2642_v28  ;;  %3218 = vst [vmem:[%s9501_s6 + $0x250] sm:$0xff] %v2642_v28  ;;  %v8296_v31 = vadd.f32 %v7847_v26, %v2351_v30  ;;  %v3021_v34 = vadd.f32 %v2957_v33, %v8188_v32  ;;  %v2703_v32 = vld [vmem:[%s9496_s1 + $0xa8] sm:$0xff] }
 0x47f   :  { %v7065_v51 = vpop.eup %7064  ;;  %v2353_v19 = vpop.f32.mrf.mxu0  ;;  %v2707_v28 = vld [vmem:[%s9496_s1 + $0xc8] sm:$0xff] }
 0x480   :  { %v2858_v36 = vmul.f32 1.442695, %v2770_v0  ;;  %3155 = vst [vmem:[%s9501_s6 + $0x260] sm:$0xff] %v8296_v31  ;;  %v2643_v41 = vadd.f32 %v7851_v27, %v2353_v19  ;;  %3085 = vst [vmem:[%s9501_s6 + $0x1c8] sm:$0xff] %v3021_v34  ;;  %v3267_v2 = vpack.c.bf16 %v3021_v34, %v3020_v10  ;;  %v2958_v43 = vmul.f32 %v7065_v51, %v2702_v54 }
 0x481   :  { %v2357_v46 = vpop.f32.mrf.mxu0 }
 0x482   :  { %7072 = vpow2.f32 %v2858_v36  ;;  %v2771_v62 = vmul.f32 0.5, %v2643_v41  ;;  %3219 = vst [vmem:[%s9501_s6 + $0x268] sm:$0xff] %v2643_v41  ;;  %v8314_v29 = vadd.f32 %v7847_v26, %v2357_v46  ;;  %6509 = vmatmul.mubr.bf16.gmra.mxu1 %v3267_v2  ;;  %v3022_v15 = vadd.f32 %v2958_v43, %v8206_v40  ;;  %v2704_v40 = vld [vmem:[%s9496_s1 + $0xb0] sm:$0xff] }
 0x483   :  { %v7067_v3 = vpop.eup %7066  ;;  %v2359_v39 = vpop.f32.mrf.mxu0 }
 0x484   :  { %v2860_v48 = vmul.f32 1.442695, %v2771_v62  ;;  %3156 = vst [vmem:[%s9501_s6 + $0x278] sm:$0xff] %v8314_v29  ;;  %v2644_v50 = vadd.f32 %v7851_v27, %v2359_v39  ;;  %v2959_v22 = vmul.f32 %v7067_v3, %v2703_v32  ;;  %3086 = vst [vmem:[%s9501_s6 + $0x1e0] sm:$0xff] %v3022_v15 }
 0x485   :  { %v2361_v59 = vpop.f32.mrf.mxu0 }
 0x486   :  { %7074 = vpow2.f32 %v2860_v48  ;;  %v2772_v63 = vmul.f32 0.5, %v2644_v50  ;;  %3220 = vst [vmem:[%s9501_s6 + $0x280] sm:$0xff] %v2644_v50  ;;  %v8332_v9 = vadd.f32 %v7847_v26, %v2361_v59  ;;  %v3023_v24 = vadd.f32 %v2959_v22, %v8224_v8  ;;  %v2705_v8 = vld [vmem:[%s9496_s1 + $0xb8] sm:$0xff] }
 0x487   :  { %v7069_v45 = vpop.eup %7068  ;;  %v2363_v44 = vpop.f32.mrf.mxu0 }
 0x488   :  { %v2862_v18 = vmul.f32 1.442695, %v2772_v63  ;;  %3157 = vst [vmem:[%s9501_s6 + $0x290] sm:$0xff] %v8332_v9  ;;  %v2645_v57 = vadd.f32 %v7851_v27, %v2363_v44  ;;  %3087 = vst [vmem:[%s9501_s6 + $0x1f8] sm:$0xff] %v3023_v24  ;;  %v3268_v38 = vpack.c.bf16 %v3023_v24, %v3022_v15  ;;  %v2960_v4 = vmul.f32 %v7069_v45, %v2704_v40 }
 0x489   :  { %v2367_v56 = vpop.f32.mrf.mxu0 }
 0x48a   :  { %7076 = vpow2.f32 %v2862_v18  ;;  %v2773_v5 = vmul.f32 0.5, %v2645_v57  ;;  %3221 = vst [vmem:[%s9501_s6 + $0x298] sm:$0xff] %v2645_v57  ;;  %v8350_v6 = vadd.f32 %v7847_v26, %v2367_v56  ;;  %6512 = vmatprep.mubr.bf16.mxu1 %v3268_v38  ;;  %v3024_v58 = vadd.f32 %v2960_v4, %v8242_v21  ;;  %v2706_v21 = vld [vmem:[%s9496_s1 + $0xc0] sm:$0xff]  ;;  %v6993_v57 = vld [vmem:[%s9497_s2 + $0x170] sm:$0xff]  }
 0x48b   :  { %v7071_v61 = vpop.eup %7070  ;;  %v2369_v42 = vpop.f32.mrf.mxu0  ;;  %v2710_v38 = vld [vmem:[%s9496_s1 + $0xe0] sm:$0xff]  ;;  %6558 = vmatprep.subr.bf16.mxu1 %v6993_v57 }
 0x48c   :  { %v2864_v13 = vmul.f32 1.442695, %v2773_v5  ;;  %3158 = vst [vmem:[%s9501_s6 + $0x2a8] sm:$0xff] %v8350_v6  ;;  %v2646_v16 = vadd.f32 %v7851_v27, %v2369_v42  ;;  %v2961_v49 = vmul.f32 %v7071_v61, %v2705_v8  ;;  %3088 = vst [vmem:[%s9501_s6 + $0x210] sm:$0xff] %v3024_v58  ;;  %6559 = vmatpush3.bf16.msra.mxu1 %v6993_v57 }
 0x48d   :  { %v2371_v17 = vpop.f32.mrf.mxu0 }
 0x48e   :  { %7078 = vpow2.f32 %v2864_v13  ;;  %v2774_v35 = vmul.f32 0.5, %v2646_v16  ;;  %3222 = vst [vmem:[%s9501_s6 + $0x2b0] sm:$0xff] %v2646_v16  ;;  %v8368_v11 = vadd.f32 %v7847_v26, %v2371_v17  ;;  %v3025_v20 = vadd.f32 %v2961_v49, %v8260_v12  ;;  %v2711_v17 = vld [vmem:[%s9496_s1 + $0xe8] sm:$0xff] }
 0x48f   :  { %v7073_v23 = vpop.eup %7072  ;;  %v2373_v55 = vpop.f32.mrf.mxu0 }
 0x490   :  { %v2866_v10 = vmul.f32 1.442695, %v2774_v35  ;;  %3159 = vst [vmem:[%s9501_s6 + $0x2c0] sm:$0xff] %v8368_v11  ;;  %v2647_v1 = vadd.f32 %v7851_v27, %v2373_v55  ;;  %3089 = vst [vmem:[%s9501_s6 + $0x228] sm:$0xff] %v3025_v20  ;;  %v3269_v14 = vpack.c.bf16 %v3025_v20, %v3024_v58  ;;  %v2962_v12 = vmul.f32 %v7073_v23, %v2706_v21 }
 0x491   :  { %v2377_v60 = vpop.f32.mrf.mxu0 }
 0x492   :  { %7080 = vpow2.f32 %v2866_v10  ;;  %v2775_v33 = vmul.f32 0.5, %v2647_v1  ;;  %3223 = vst [vmem:[%s9501_s6 + $0x2c8] sm:$0xff] %v2647_v1  ;;  %v8389_v30 = vadd.f32 %v7847_v26, %v2377_v60  ;;  %6513 = vmatmul.mubr.bf16.gmra.mxu1 %v3269_v14  ;;  %v3026_v54 = vadd.f32 %v2962_v12, %v8278_v25  ;;  %v2708_v25 = vld [vmem:[%s9496_s1 + $0xd0] sm:$0xff] }
 0x493   :  { %v7075_v0 = vpop.eup %7074  ;;  %v2379_v34 = vpop.f32.mrf.mxu0  ;;  %v2712_v12 = vld [vmem:[%s9496_s1 + $0xf0] sm:$0xff] }
 0x494   :  { %v2868_v51 = vmul.f32 1.442695, %v2775_v33  ;;  %3160 = vst [vmem:[%s9501_s6 + $0x2d8] sm:$0xff] %v8389_v30  ;;  %v2648_v19 = vadd.f32 %v7851_v27, %v2379_v34  ;;  %v2963_v36 = vmul.f32 %v7075_v0, %v2707_v28  ;;  %3090 = vst [vmem:[%s9501_s6 + $0x240] sm:$0xff] %v3026_v54 }
 0x495   :  { %v2381_v41 = vpop.f32.mrf.mxu0 }
 0x496   :  { %7082 = vpow2.f32 %v2868_v51  ;;  %v2776_v2 = vmul.f32 0.5, %v2648_v19  ;;  %3224 = vst [vmem:[%s9501_s6 + $0x2e0] sm:$0xff] %v2648_v19  ;;  %v8407_v43 = vadd.f32 %v7847_v26, %v2381_v41  ;;  %v3027_v46 = vadd.f32 %v2963_v36, %v8296_v31  ;;  %v2709_v31 = vld [vmem:[%s9496_s1 + $0xd8] sm:$0xff] }
 0x497   :  { %v7077_v32 = vpop.eup %7076  ;;  %v2383_v62 = vpop.f32.mrf.mxu0 }
 0x498   :  { %v2870_v15 = vmul.f32 1.442695, %v2776_v2  ;;  %3161 = vst [vmem:[%s9501_s6 + $0x2f0] sm:$0xff] %v8407_v43  ;;  %v2649_v3 = vadd.f32 %v7851_v27, %v2383_v62  ;;  %3091 = vst [vmem:[%s9501_s6 + $0x258] sm:$0xff] %v3027_v46  ;;  %v3270_v39 = vpack.c.bf16 %v3027_v46, %v3026_v54  ;;  %v2964_v48 = vmul.f32 %v7077_v32, %v2708_v25  ;;  %v2713_v25 = vld [vmem:[%s9496_s1 + $0xf8] sm:$0xff] }
 0x499   :  { %v2387_v50 = vpop.f32.mrf.mxu0 }
 0x49a   :  { %7084 = vpow2.f32 %v2870_v15  ;;  %v2777_v22 = vmul.f32 0.5, %v2649_v3  ;;  %3225 = vst [vmem:[%s9501_s6 + $0x2f8] sm:$0xff] %v2649_v3  ;;  %v8425_v59 = vadd.f32 %v7847_v26, %v2387_v50  ;;  %6516 = vmatprep.mubr.bf16.mxu1 %v3270_v39  ;;  %v3028_v40 = vadd.f32 %v2964_v48, %v8314_v29  ;;  %v6997_v3 = vld [vmem:[%s9497_s2 + $0x150] sm:$0xff]  }
 0x49b   :  { %v7079_v63 = vpop.eup %7078  ;;  %v2389_v24 = vpop.f32.mrf.mxu0 }
 0x49c   :  { %v2872_v45 = vmul.f32 1.442695, %v2777_v22  ;;  %3162 = vst [vmem:[%s9501_s6 + $0x308] sm:$0xff] %v8425_v59  ;;  %v2650_v44 = vadd.f32 %v7851_v27, %v2389_v24  ;;  %v2965_v18 = vmul.f32 %v7079_v63, %v2709_v31  ;;  %3092 = vst [vmem:[%s9501_s6 + $0x270] sm:$0xff] %v3028_v40  ;;  %v2714_v31 = vld [vmem:[%s9496_s1 + $0x100] sm:$0xff] }
 0x49d   :  { %v2391_v29 = vpop.f32.mrf.mxu0 }
 0x49e   :  { %7086 = vpow2.f32 %v2872_v45  ;;  %v2778_v4 = vmul.f32 0.5, %v2650_v44  ;;  %3226 = vst [vmem:[%s9501_s6 + $0x310] sm:$0xff] %v2650_v44  ;;  %v8446_v56 = vadd.f32 %v7847_v26, %v2391_v29  ;;  %v3029_v8 = vadd.f32 %v2965_v18, %v8332_v9  ;;  %v6994_v9 = vld [vmem:[%s9497_s2 + $0x168] sm:$0xff]  }
 0x49f   :  { %v7081_v5 = vpop.eup %7080  ;;  %v2393_v58 = vpop.f32.mrf.mxu0  ;;  %6560 = vmatprep.subr.bf16.mxu1 %v6994_v9 }
 0x4a0   :  { %v2874_v61 = vmul.f32 1.442695, %v2778_v4  ;;  %3163 = vst [vmem:[%s9501_s6 + $0x320] sm:$0xff] %v8446_v56  ;;  %v2651_v42 = vadd.f32 %v7851_v27, %v2393_v58  ;;  %3093 = vst [vmem:[%s9501_s6 + $0x288] sm:$0xff] %v3029_v8  ;;  %v3271_v13 = vpack.c.bf16 %v3029_v8, %v3028_v40  ;;  %v2966_v16 = vmul.f32 %v7081_v5, %v2710_v38  ;;  %v2715_v4 = vld [vmem:[%s9496_s1 + $0x108] sm:$0xff] }
 0x4a1   :  { %v2397_v49 = vpop.f32.mrf.mxu0  ;;  %6561 = vmatpush3.bf16.msra.mxu1 %v6994_v9 }
 0x4a2   :  { %7088 = vpow2.f32 %v2874_v61  ;;  %v2779_v21 = vmul.f32 0.5, %v2651_v42  ;;  %3227 = vst [vmem:[%s9501_s6 + $0x328] sm:$0xff] %v2651_v42  ;;  %v8467_v35 = vadd.f32 %v7847_v26, %v2397_v49  ;;  %6517 = vmatmul.mubr.bf16.gmra.mxu1 %v3271_v13  ;;  %v3030_v20 = vadd.f32 %v2966_v16, %v8350_v6  ;;  %v6995_v6 = vld [vmem:[%s9497_s2 + $0x160] sm:$0xff]  }
 0x4a3   :  { %v7083_v47 = vpop.eup %7082  ;;  %v2399_v23 = vpop.f32.mrf.mxu0  ;;  %6562 = vmatprep.subr.bf16.mxu1 %v6995_v6 }
 0x4a4   :  { %v2876_v55 = vmul.f32 1.442695, %v2779_v21  ;;  %3164 = vst [vmem:[%s9501_s6 + $0x338] sm:$0xff] %v8467_v35  ;;  %v2652_v10 = vadd.f32 %v7851_v27, %v2399_v23  ;;  %v2967_v1 = vmul.f32 %v7083_v47, %v2711_v17  ;;  %3094 = vst [vmem:[%s9501_s6 + $0x2a0] sm:$0xff] %v3030_v20  ;;  %v2716_v17 = vld [vmem:[%s9496_s1 + $0x110] sm:$0xff] }
 0x4a5   :  { %v2401_v14 = vpop.f32.mrf.mxu0  ;;  %6563 = vmatpush3.bf16.msra.mxu1 %v6995_v6 }
 0x4a6   :  { %7090 = vpow2.f32 %v2876_v55  ;;  %v2780_v60 = vmul.f32 0.5, %v2652_v10  ;;  %3228 = vst [vmem:[%s9501_s6 + $0x340] sm:$0xff] %v2652_v10  ;;  %v8488_v28 = vadd.f32 %v7847_v26, %v2401_v14  ;;  %v3031_v33 = vadd.f32 %v2967_v1, %v8368_v11  ;;  %v6996_v11 = vld [vmem:[%s9497_s2 + $0x158] sm:$0xff]  }
 0x4a7   :  { %v7085_v54 = vpop.eup %7084  ;;  %v2403_v0 = vpop.f32.mrf.mxu0  ;;  %6564 = vmatprep.subr.bf16.mxu1 %v6996_v11 }
 0x4a8   :  { %v2878_v34 = vmul.f32 1.442695, %v2780_v60  ;;  %3165 = vst [vmem:[%s9501_s6 + $0x350] sm:$0xff] %v8488_v28  ;;  %v2653_v51 = vadd.f32 %v7851_v27, %v2403_v0  ;;  %3095 = vst [vmem:[%s9501_s6 + $0x2b8] sm:$0xff] %v3031_v33  ;;  %v3272_v19 = vpack.c.bf16 %v3031_v33, %v3030_v20  ;;  %v2968_v36 = vmul.f32 %v7085_v54, %v2712_v12 }
 0x4a9   :  { %v2407_v41 = vpop.f32.mrf.mxu0  ;;  %6565 = vmatpush3.bf16.msra.mxu1 %v6996_v11 }
 0x4aa   :  { %7092 = vpow2.f32 %v2878_v34  ;;  %v2781_v2 = vmul.f32 0.5, %v2653_v51  ;;  %3229 = vst [vmem:[%s9501_s6 + $0x358] sm:$0xff] %v2653_v51  ;;  %v8509_v46 = vadd.f32 %v7847_v26, %v2407_v41  ;;  %6520 = vmatprep.mubr.bf16.mxu1 %v3272_v19  ;;  %v3032_v32 = vadd.f32 %v2968_v36, %v8389_v30  ;;  %6566 = vmatprep.subr.bf16.mxu1 %v6997_v3 }
 0x4ab   :  { %v7087_v62 = vpop.eup %7086  ;;  %v2409_v15 = vpop.f32.mrf.mxu0 }
 0x4ac   :  { %v2880_v39 = vmul.f32 1.442695, %v2781_v2  ;;  %3166 = vst [vmem:[%s9501_s6 + $0x368] sm:$0xff] %v8509_v46  ;;  %v2654_v48 = vadd.f32 %v7851_v27, %v2409_v15  ;;  %v2969_v50 = vmul.f32 %v7087_v62, %v2713_v25  ;;  %3096 = vst [vmem:[%s9501_s6 + $0x2d0] sm:$0xff] %v3032_v32 }
 0x4ad   :  { %v2411_v30 = vpop.f32.mrf.mxu0  ;;  %6567 = vmatpush3.bf16.msra.mxu1 %v6997_v3 }
 0x4ae   :  { %7094 = vpow2.f32 %v2880_v39  ;;  %v2782_v22 = vmul.f32 0.5, %v2654_v48  ;;  %3230 = vst [vmem:[%s9501_s6 + $0x370] sm:$0xff] %v2654_v48  ;;  %v8530_v40 = vadd.f32 %v7847_v26, %v2411_v30  ;;  %v3033_v63 = vadd.f32 %v2969_v50, %v8407_v43  ;;  %v6998_v43 = vld [vmem:[%s9497_s2 + $0x148] sm:$0xff]  }
 0x4af   :  { %v7089_v24 = vpop.eup %7088  ;;  %v2413_v45 = vpop.f32.mrf.mxu0  ;;  %6568 = vmatprep.subr.bf16.mxu1 %v6998_v43 }
 0x4b0   :  { %v2882_v44 = vmul.f32 1.442695, %v2782_v22  ;;  %3167 = vst [vmem:[%s9501_s6 + $0x380] sm:$0xff] %v8530_v40  ;;  %v2655_v18 = vadd.f32 %v7851_v27, %v2413_v45  ;;  %3097 = vst [vmem:[%s9501_s6 + $0x2e8] sm:$0xff] %v3033_v63  ;;  %v3273_v57 = vpack.c.bf16 %v3033_v63, %v3032_v32  ;;  %v2970_v29 = vmul.f32 %v7089_v24, %v2714_v31 }
 0x4b1   :  { %v2417_v38 = vpop.f32.mrf.mxu0  ;;  %6569 = vmatpush3.bf16.msra.mxu1 %v6998_v43 }
 0x4b2   :  { %7096 = vpow2.f32 %v2882_v44  ;;  %v2783_v8 = vmul.f32 0.5, %v2655_v18  ;;  %3231 = vst [vmem:[%s9501_s6 + $0x388] sm:$0xff] %v2655_v18  ;;  %v8551_v5 = vadd.f32 %v7847_v26, %v2417_v38  ;;  %6521 = vmatmul.mubr.bf16.gmra.mxu1 %v3273_v57  ;;  %v3034_v58 = vadd.f32 %v2970_v29, %v8425_v59  ;;  %v6999_v59 = vld [vmem:[%s9497_s2 + $0x140] sm:$0xff]  }
 0x4b3   :  { %v7091_v61 = vpop.eup %7090  ;;  %v2419_v42 = vpop.f32.mrf.mxu0  ;;  %6570 = vmatprep.subr.bf16.mxu1 %v6999_v59 }
 0x4b4   :  { %v2884_v13 = vmul.f32 1.442695, %v2783_v8  ;;  %3168 = vst [vmem:[%s9501_s6 + $0x398] sm:$0xff] %v8551_v5  ;;  %v2656_v16 = vadd.f32 %v7851_v27, %v2419_v42  ;;  %v2971_v9 = vmul.f32 %v7091_v61, %v2715_v4  ;;  %3098 = vst [vmem:[%s9501_s6 + $0x300] sm:$0xff] %v3034_v58 }
 0x4b5   :  { %v2421_v49 = vpop.f32.mrf.mxu0  ;;  %6571 = vmatpush3.bf16.msra.mxu1 %v6999_v59 }
 0x4b6   :  { %7098 = vpow2.f32 %v2884_v13  ;;  %v2784_v21 = vmul.f32 0.5, %v2656_v16  ;;  %3232 = vst [vmem:[%s9501_s6 + $0x3a0] sm:$0xff] %v2656_v16  ;;  %v8572_v20 = vadd.f32 %v7847_v26, %v2421_v49  ;;  %v3035_v47 = vadd.f32 %v2971_v9, %v8446_v56  ;;  %v2717_v56 = vld [vmem:[%s9496_s1 + $0x118] sm:$0xff] }
 0x4b7   :  { %v7093_v23 = vpop.eup %7092  ;;  %v2423_v55 = vpop.f32.mrf.mxu0 }
 0x4b8   :  { %v2886_v10 = vmul.f32 1.442695, %v2784_v21  ;;  %3169 = vst [vmem:[%s9501_s6 + $0x3b0] sm:$0xff] %v8572_v20  ;;  %v2657_v1 = vadd.f32 %v7851_v27, %v2423_v55  ;;  %3099 = vst [vmem:[%s9501_s6 + $0x318] sm:$0xff] %v3035_v47  ;;  %v3274_v6 = vpack.c.bf16 %v3035_v47, %v3034_v58  ;;  %v2972_v14 = vmul.f32 %v7093_v23, %v2716_v17 }
 0x4b9   :  { %v2427_v12 = vpop.f32.mrf.mxu0 }
 0x4ba   :  { %7100 = vpow2.f32 %v2886_v10  ;;  %v2785_v60 = vmul.f32 0.5, %v2657_v1  ;;  %3233 = vst [vmem:[%s9501_s6 + $0x3b8] sm:$0xff] %v2657_v1  ;;  %v8590_v33 = vadd.f32 %v7847_v26, %v2427_v12  ;;  %6524 = vmatprep.mubr.bf16.mxu1 %v3274_v6  ;;  %v3036_v54 = vadd.f32 %v2972_v14, %v8467_v35  ;;  %v2718_v35 = vld [vmem:[%s9496_s1 + $0x120] sm:$0xff] }
 0x4bb   :  { %v7095_v0 = vpop.eup %7094  ;;  %v2429_v34 = vpop.f32.mrf.mxu0 }
 0x4bc   :  { %v2888_v51 = vmul.f32 1.442695, %v2785_v60  ;;  %3170 = vst [vmem:[%s9501_s6 + $0x3c8] sm:$0xff] %v8590_v33  ;;  %v2658_v19 = vadd.f32 %v7851_v27, %v2429_v34  ;;  %v2973_v36 = vmul.f32 %v7095_v0, %v2717_v56  ;;  %3100 = vst [vmem:[%s9501_s6 + $0x330] sm:$0xff] %v3036_v54 }
 0x4bd   :  { %v2431_v11 = vpop.f32.mrf.mxu0 }
 0x4be   :  { %7102 = vpow2.f32 %v2888_v51  ;;  %v2786_v41 = vmul.f32 0.5, %v2658_v19  ;;  %3234 = vst [vmem:[%s9501_s6 + $0x3d0] sm:$0xff] %v2658_v19  ;;  %v8608_v25 = vadd.f32 %v7847_v26, %v2431_v11  ;;  %v3037_v2 = vadd.f32 %v2973_v36, %v8488_v28  ;;  %v2719_v28 = vld [vmem:[%s9496_s1 + $0x128] sm:$0xff] }
 0x4bf   :  { %v7097_v32 = vpop.eup %7096  ;;  %v2433_v62 = vpop.f32.mrf.mxu0 }
 0x4c0   :  { %v2890_v15 = vmul.f32 1.442695, %v2786_v41  ;;  %3171 = vst [vmem:[%s9501_s6 + $0x3e0] sm:$0xff] %v8608_v25  ;;  %v2659_v3 = vadd.f32 %v7851_v27, %v2433_v62  ;;  %3101 = vst [vmem:[%s9501_s6 + $0x348] sm:$0xff] %v3037_v2  ;;  %v3275_v39 = vpack.c.bf16 %v3037_v2, %v3036_v54  ;;  %v2974_v48 = vmul.f32 %v7097_v32, %v2718_v35 }
 0x4c1   :  { %v2437_v50 = vpop.f32.mrf.mxu0 }
 0x4c2   :  { %7104 = vpow2.f32 %v2890_v15  ;;  %v2787_v30 = vmul.f32 0.5, %v2659_v3  ;;  %3235 = vst [vmem:[%s9501_s6 + $0x3e8] sm:$0xff] %v2659_v3  ;;  %v8626_v31 = vadd.f32 %v7847_v26, %v2437_v50  ;;  %6525 = vmatmul.mubr.bf16.gmra.mxu1 %v3275_v39  ;;  %v3038_v22 = vadd.f32 %v2974_v48, %v8509_v46  ;;  %v2720_v46 = vld [vmem:[%s9496_s1 + $0x130] sm:$0xff] }
 0x4c3   :  { %v7099_v63 = vpop.eup %7098  ;;  %v2439_v24 = vpop.f32.mrf.mxu0 }
 0x4c4   :  { %v2892_v45 = vmul.f32 1.442695, %v2787_v30  ;;  %3172 = vst [vmem:[%s9501_s6 + $0x3f8] sm:$0xff] %v8626_v31  ;;  %v2660_v44 = vadd.f32 %v7851_v27, %v2439_v24  ;;  %v2975_v18 = vmul.f32 %v7099_v63, %v2719_v28  ;;  %3102 = vst [vmem:[%s9501_s6 + $0x360] sm:$0xff] %v3038_v22  ;;  %v7000_v30 = vld [vmem:[%s9497_s2 + $0x1b8] sm:$0xff]  }
 0x4c5   :  { %v2441_v57 = vpop.f32.mrf.mxu0  ;;  %6636 = vmatprep.subr.bf16.mxu0 %v7000_v30 }
 0x4c6   :  { %7106 = vpow2.f32 %v2892_v45  ;;  %v2788_v29 = vmul.f32 0.5, %v2660_v44  ;;  %3236 = vst [vmem:[%s9501_s6 + $0x400] sm:$0xff] %v2660_v44  ;;  %v8644_v43 = vadd.f32 %v7847_v26, %v2441_v57  ;;  %v3039_v38 = vadd.f32 %v2975_v18, %v8530_v40  ;;  %v2721_v40 = vld [vmem:[%s9496_s1 + $0x138] sm:$0xff]  ;;  %6637 = vmatpush3.bf16.msra.mxu0 %v7000_v30 }
 0x4c7   :  { %v7101_v4 = vpop.eup %7100  ;;  %v2443_v8 = vpop.f32.mrf.mxu0  ;;  %v2725_v44 = vld [vmem:[%s9496_s1 + $0x158] sm:$0xff] }
 0x4c8   :  { %v2894_v58 = vmul.f32 1.442695, %v2788_v29  ;;  %3173 = vst [vmem:[%s9501_s6 + $0x410] sm:$0xff] %v8644_v43  ;;  %v2661_v61 = vadd.f32 %v7851_v27, %v2443_v8  ;;  %3103 = vst [vmem:[%s9501_s6 + $0x378] sm:$0xff] %v3039_v38  ;;  %v3276_v42 = vpack.c.bf16 %v3039_v38, %v3038_v22  ;;  %v2976_v13 = vmul.f32 %v7101_v4, %v2720_v46 }
 0x4c9   :  { %v2447_v16 = vpop.f32.mrf.mxu0 }
 0x4ca   :  { %7108 = vpow2.f32 %v2894_v58  ;;  %v2789_v9 = vmul.f32 0.5, %v2661_v61  ;;  %3237 = vst [vmem:[%s9501_s6 + $0x418] sm:$0xff] %v2661_v61  ;;  %v8662_v59 = vadd.f32 %v7847_v26, %v2447_v16  ;;  %6528 = vmatprep.mubr.bf16.mxu1 %v3276_v42  ;;  %v3040_v49 = vadd.f32 %v2976_v13, %v8551_v5  ;;  %v2722_v5 = vld [vmem:[%s9496_s1 + $0x140] sm:$0xff] }
 0x4cb   :  { %v7103_v17 = vpop.eup %7102  ;;  %v2449_v21 = vpop.f32.mrf.mxu0 }
 0x4cc   :  { %v2896_v47 = vmul.f32 1.442695, %v2789_v9  ;;  %3174 = vst [vmem:[%s9501_s6 + $0x428] sm:$0xff] %v8662_v59  ;;  %v2662_v23 = vadd.f32 %v7851_v27, %v2449_v21  ;;  %v2977_v55 = vmul.f32 %v7103_v17, %v2721_v40  ;;  %3104 = vst [vmem:[%s9501_s6 + $0x390] sm:$0xff] %v3040_v49 }
 0x4cd   :  { %v2451_v10 = vpop.f32.mrf.mxu0 }
 0x4ce   :  { %7110 = vpow2.f32 %v2896_v47  ;;  %v2790_v1 = vmul.f32 0.5, %v2662_v23  ;;  %3238 = vst [vmem:[%s9501_s6 + $0x430] sm:$0xff] %v2662_v23  ;;  %v8680_v6 = vadd.f32 %v7847_v26, %v2451_v10  ;;  %v3041_v14 = vadd.f32 %v2977_v55, %v8572_v20  ;;  %v2723_v20 = vld [vmem:[%s9496_s1 + $0x148] sm:$0xff] }
 0x4cf   :  { %v7105_v12 = vpop.eup %7104  ;;  %v2453_v56 = vpop.f32.mrf.mxu0 }
 0x4d0   :  { %v2898_v60 = vmul.f32 1.442695, %v2790_v1  ;;  %3175 = vst [vmem:[%s9501_s6 + $0x440] sm:$0xff] %v8680_v6  ;;  %v2663_v54 = vadd.f32 %v7851_v27, %v2453_v56  ;;  %3105 = vst [vmem:[%s9501_s6 + $0x3a8] sm:$0xff] %v3041_v14  ;;  %v3277_v0 = vpack.c.bf16 %v3041_v14, %v3040_v49  ;;  %v2978_v34 = vmul.f32 %v7105_v12, %v2722_v5 }
 0x4d1   :  { %v2457_v51 = vpop.f32.mrf.mxu0 }
 0x4d2   :  { %7112 = vpow2.f32 %v2898_v60  ;;  %v2791_v19 = vmul.f32 0.5, %v2663_v54  ;;  %3239 = vst [vmem:[%s9501_s6 + $0x448] sm:$0xff] %v2663_v54  ;;  %v8698_v36 = vadd.f32 %v7847_v26, %v2457_v51  ;;  %6529 = vmatmul.mubr.bf16.gmra.mxu1 %v3277_v0  ;;  %v3042_v11 = vadd.f32 %v2978_v34, %v8590_v33  ;;  %v2724_v33 = vld [vmem:[%s9496_s1 + $0x150] sm:$0xff] }
 0x4d3   :  { %v7107_v35 = vpop.eup %7106  ;;  %v2459_v41 = vpop.f32.mrf.mxu0 }
 0x4d4   :  { %v2900_v2 = vmul.f32 1.442695, %v2791_v19  ;;  %3176 = vst [vmem:[%s9501_s6 + $0x458] sm:$0xff] %v8698_v36  ;;  %v2664_v32 = vadd.f32 %v7851_v27, %v2459_v41  ;;  %v2979_v62 = vmul.f32 %v7107_v35, %v2723_v20  ;;  %3106 = vst [vmem:[%s9501_s6 + $0x3c0] sm:$0xff] %v3042_v11 }
 0x4d5   :  { %v2461_v15 = vpop.f32.mrf.mxu0 }
 0x4d6   :  { %7114 = vpow2.f32 %v2900_v2  ;;  %v2792_v3 = vmul.f32 0.5, %v2664_v32  ;;  %3240 = vst [vmem:[%s9501_s6 + $0x460] sm:$0xff] %v2664_v32  ;;  %v8716_v39 = vadd.f32 %v7847_v26, %v2461_v15  ;;  %v3043_v48 = vadd.f32 %v2979_v62, %v8608_v25 }
 0x4d7   :  { %v7109_v50 = vpop.eup %7108  ;;  %v2463_v28 = vpop.f32.mrf.mxu0 }
 0x4d8   :  { %v2902_v22 = vmul.f32 1.442695, %v2792_v3  ;;  %3177 = vst [vmem:[%s9501_s6 + $0x470] sm:$0xff] %v8716_v39  ;;  %v2665_v63 = vadd.f32 %v7851_v27, %v2463_v28  ;;  %3107 = vst [vmem:[%s9501_s6 + $0x3d8] sm:$0xff] %v3043_v48  ;;  %v3278_v24 = vpack.c.bf16 %v3043_v48, %v3042_v11  ;;  %v2980_v25 = vmul.f32 %v7109_v50, %v2724_v33 }
 0x4d9   :  { %v2467_v45 = vpop.f32.mrf.mxu0 }
 0x4da   :  { %7116 = vpow2.f32 %v2902_v22  ;;  %v2793_v18 = vmul.f32 0.5, %v2665_v63  ;;  %3241 = vst [vmem:[%s9501_s6 + $0x478] sm:$0xff] %v2665_v63  ;;  %v8737_v57 = vadd.f32 %v7847_v26, %v2467_v45  ;;  %6532 = vmatprep.mubr.bf16.mxu1 %v3278_v24  ;;  %v3044_v46 = vadd.f32 %v2980_v25, %v8626_v31  ;;  %v2726_v31 = vld [vmem:[%s9496_s1 + $0x160] sm:$0xff] }
 0x4db   :  { %v7111_v29 = vpop.eup %7110  ;;  %v2469_v38 = vpop.f32.mrf.mxu0 }
 0x4dc   :  { %v2904_v4 = vmul.f32 1.442695, %v2793_v18  ;;  %3178 = vst [vmem:[%s9501_s6 + $0x488] sm:$0xff] %v8737_v57  ;;  %v2666_v8 = vadd.f32 %v7851_v27, %v2469_v38  ;;  %v2981_v58 = vmul.f32 %v7111_v29, %v2725_v44  ;;  %3108 = vst [vmem:[%s9501_s6 + $0x3f0] sm:$0xff] %v3044_v46 }
 0x4dd   :  { %v2471_v61 = vpop.f32.mrf.mxu0 }
 0x4de   :  { %7118 = vpow2.f32 %v2904_v4  ;;  %v2794_v42 = vmul.f32 0.5, %v2666_v8  ;;  %3242 = vst [vmem:[%s9501_s6 + $0x490] sm:$0xff] %v2666_v8  ;;  %v8755_v13 = vadd.f32 %v7847_v26, %v2471_v61  ;;  %v3045_v16 = vadd.f32 %v2981_v58, %v8644_v43  ;;  %v2727_v43 = vld [vmem:[%s9496_s1 + $0x168] sm:$0xff] }
 0x4df   :  { %v7113_v40 = vpop.eup %7112  ;;  %v2473_v9 = vpop.f32.mrf.mxu0 }
 0x4e0   :  { %v2906_v49 = vmul.f32 1.442695, %v2794_v42  ;;  %3179 = vst [vmem:[%s9501_s6 + $0x4a0] sm:$0xff] %v8755_v13  ;;  %v2667_v17 = vadd.f32 %v7851_v27, %v2473_v9  ;;  %3109 = vst [vmem:[%s9501_s6 + $0x408] sm:$0xff] %v3045_v16  ;;  %v3279_v21 = vpack.c.bf16 %v3045_v16, %v3044_v46  ;;  %v2982_v47 = vmul.f32 %v7113_v40, %v2726_v31 }
 0x4e1   :  { %v2477_v23 = vpop.f32.mrf.mxu0 }
 0x4e2   :  { %7120 = vpow2.f32 %v2906_v49  ;;  %v2795_v55 = vmul.f32 0.5, %v2667_v17  ;;  %3243 = vst [vmem:[%s9501_s6 + $0x4a8] sm:$0xff] %v2667_v17  ;;  %v8773_v10 = vadd.f32 %v7847_v26, %v2477_v23  ;;  %6533 = vmatmul.mubr.bf16.gmra.mxu1 %v3279_v21  ;;  %v3046_v5 = vadd.f32 %v2982_v47, %v8662_v59  ;;  %v2728_v59 = vld [vmem:[%s9496_s1 + $0x170] sm:$0xff] }
 0x4e3   :  { %v7115_v1 = vpop.eup %7114  ;;  %v2479_v14 = vpop.f32.mrf.mxu0 }
 0x4e4   :  { %v2908_v12 = vmul.f32 1.442695, %v2795_v55  ;;  %3180 = vst [vmem:[%s9501_s6 + $0x4b8] sm:$0xff] %v8773_v10  ;;  %v2668_v56 = vadd.f32 %v7851_v27, %v2479_v14  ;;  %v2983_v60 = vmul.f32 %v7115_v1, %v2727_v43  ;;  %3110 = vst [vmem:[%s9501_s6 + $0x420] sm:$0xff] %v3046_v5  ;;  %v7001_v55 = vld [vmem:[%s9497_s2 + $0x1b0] sm:$0xff]  }
 0x4e5   :  { %v2481_v54 = vpop.f32.mrf.mxu0  ;;  %6638 = vmatprep.subr.bf16.mxu0 %v7001_v55 }
 0x4e6   :  { %7122 = vpow2.f32 %v2908_v12  ;;  %v2796_v0 = vmul.f32 0.5, %v2668_v56  ;;  %3244 = vst [vmem:[%s9501_s6 + $0x4c0] sm:$0xff] %v2668_v56  ;;  %v8791_v34 = vadd.f32 %v7847_v26, %v2481_v54  ;;  %v3047_v51 = vadd.f32 %v2983_v60, %v8680_v6  ;;  %v2729_v6 = vld [vmem:[%s9496_s1 + $0x178] sm:$0xff]  ;;  %6639 = vmatpush3.bf16.msra.mxu0 %v7001_v55 }
 0x4e7   :  { %v7117_v20 = vpop.eup %7116  ;;  %v2483_v19 = vpop.f32.mrf.mxu0  ;;  %v2733_v56 = vld [vmem:[%s9496_s1 + $0x198] sm:$0xff] }
 0x4e8   :  { %v2910_v11 = vmul.f32 1.442695, %v2796_v0  ;;  %3181 = vst [vmem:[%s9501_s6 + $0x4d0] sm:$0xff] %v8791_v34  ;;  %v2669_v35 = vadd.f32 %v7851_v27, %v2483_v19  ;;  %3111 = vst [vmem:[%s9501_s6 + $0x438] sm:$0xff] %v3047_v51  ;;  %v3280_v41 = vpack.c.bf16 %v3047_v51, %v3046_v5  ;;  %v2984_v2 = vmul.f32 %v7117_v20, %v2728_v59 }
 0x4e9   :  { %v2487_v32 = vpop.f32.mrf.mxu0 }
 0x4ea   :  { %7124 = vpow2.f32 %v2910_v11  ;;  %v2797_v62 = vmul.f32 0.5, %v2669_v35  ;;  %3245 = vst [vmem:[%s9501_s6 + $0x4d8] sm:$0xff] %v2669_v35  ;;  %v8809_v15 = vadd.f32 %v7847_v26, %v2487_v32  ;;  %6536 = vmatprep.mubr.bf16.mxu1 %v3280_v41  ;;  %v3048_v33 = vadd.f32 %v2984_v2, %v8698_v36  ;;  %v2730_v36 = vld [vmem:[%s9496_s1 + $0x180] sm:$0xff] }
 0x4eb   :  { %v7119_v3 = vpop.eup %7118  ;;  %v2489_v48 = vpop.f32.mrf.mxu0 }
 0x4ec   :  { %v2912_v50 = vmul.f32 1.442695, %v2797_v62  ;;  %3182 = vst [vmem:[%s9501_s6 + $0x4e8] sm:$0xff] %v8809_v15  ;;  %v2670_v28 = vadd.f32 %v7851_v27, %v2489_v48  ;;  %v2985_v30 = vmul.f32 %v7119_v3, %v2729_v6  ;;  %3112 = vst [vmem:[%s9501_s6 + $0x450] sm:$0xff] %v3048_v33 }
 0x4ed   :  { %v2491_v22 = vpop.f32.mrf.mxu0 }
 0x4ee   :  { %7126 = vpow2.f32 %v2912_v50  ;;  %v2798_v63 = vmul.f32 0.5, %v2670_v28  ;;  %3246 = vst [vmem:[%s9501_s6 + $0x4f0] sm:$0xff] %v2670_v28  ;;  %v8827_v24 = vadd.f32 %v7847_v26, %v2491_v22  ;;  %v3049_v25 = vadd.f32 %v2985_v30, %v8716_v39  ;;  %v2731_v39 = vld [vmem:[%s9496_s1 + $0x188] sm:$0xff] }
 0x4ef   :  { %v7121_v45 = vpop.eup %7120  ;;  %v2493_v44 = vpop.f32.mrf.mxu0 }
 0x4f0   :  { %v2914_v18 = vmul.f32 1.442695, %v2798_v63  ;;  %3183 = vst [vmem:[%s9501_s6 + $0x500] sm:$0xff] %v8827_v24  ;;  %v2671_v46 = vadd.f32 %v7851_v27, %v2493_v44  ;;  %3113 = vst [vmem:[%s9501_s6 + $0x468] sm:$0xff] %v3049_v25  ;;  %v3281_v29 = vpack.c.bf16 %v3049_v25, %v3048_v33  ;;  %v2986_v38 = vmul.f32 %v7121_v45, %v2730_v36 }
 0x4f1   :  { %v2497_v4 = vpop.f32.mrf.mxu0 }
 0x4f2   :  { %7128 = vpow2.f32 %v2914_v18  ;;  %v2799_v8 = vmul.f32 0.5, %v2671_v46  ;;  %3247 = vst [vmem:[%s9501_s6 + $0x508] sm:$0xff] %v2671_v46  ;;  %v8845_v58 = vadd.f32 %v7847_v26, %v2497_v4  ;;  %6537 = vmatmul.mubr.bf16.gmra.mxu1 %v3281_v29  ;;  %v3050_v61 = vadd.f32 %v2986_v38, %v8737_v57  ;;  %v2732_v57 = vld [vmem:[%s9496_s1 + $0x190] sm:$0xff] }
 0x4f3   :  { %v7123_v31 = vpop.eup %7122  ;;  %v2499_v42 = vpop.f32.mrf.mxu0 }
 0x4f4   :  { %v2916_v16 = vmul.f32 1.442695, %v2799_v8  ;;  %3184 = vst [vmem:[%s9501_s6 + $0x518] sm:$0xff] %v8845_v58  ;;  %v2672_v40 = vadd.f32 %v7851_v27, %v2499_v42  ;;  %v2987_v9 = vmul.f32 %v7123_v31, %v2731_v39  ;;  %3114 = vst [vmem:[%s9501_s6 + $0x480] sm:$0xff] %v3050_v61 }
 0x4f5   :  { %v2501_v49 = vpop.f32.mrf.mxu0 }
 0x4f6   :  { %7130 = vpow2.f32 %v2916_v16  ;;  %v2800_v17 = vmul.f32 0.5, %v2672_v40  ;;  %3248 = vst [vmem:[%s9501_s6 + $0x520] sm:$0xff] %v2672_v40  ;;  %v8863_v21 = vadd.f32 %v7847_v26, %v2501_v49  ;;  %v3051_v47 = vadd.f32 %v2987_v9, %v8755_v13 }
 0x4f7   :  { %v7125_v23 = vpop.eup %7124  ;;  %v2503_v43 = vpop.f32.mrf.mxu0 }
 0x4f8   :  { %v2918_v5 = vmul.f32 1.442695, %v2800_v17  ;;  %3185 = vst [vmem:[%s9501_s6 + $0x530] sm:$0xff] %v8863_v21  ;;  %v2673_v1 = vadd.f32 %v7851_v27, %v2503_v43  ;;  %3115 = vst [vmem:[%s9501_s6 + $0x498] sm:$0xff] %v3051_v47  ;;  %v3282_v14 = vpack.c.bf16 %v3051_v47, %v3050_v61  ;;  %v2988_v13 = vmul.f32 %v7125_v23, %v2732_v57 }
 0x4f9   :  { %v2507_v12 = vpop.f32.mrf.mxu0 }
 0x4fa   :  { %7132 = vpow2.f32 %v2918_v5  ;;  %v2801_v60 = vmul.f32 0.5, %v2673_v1  ;;  %3249 = vst [vmem:[%s9501_s6 + $0x538] sm:$0xff] %v2673_v1  ;;  %v8884_v54 = vadd.f32 %v7847_v26, %v2507_v12  ;;  %6540 = vmatprep.mubr.bf16.mxu1 %v3282_v14  ;;  %v3052_v59 = vadd.f32 %v2988_v13, %v8773_v10  ;;  %v2734_v10 = vld [vmem:[%s9496_s1 + $0x1a0] sm:$0xff] }
 0x4fb   :  { %v7127_v0 = vpop.eup %7126  ;;  %v2509_v51 = vpop.f32.mrf.mxu0 }
 0x4fc   :  { %v2920_v20 = vmul.f32 1.442695, %v2801_v60  ;;  %3186 = vst [vmem:[%s9501_s6 + $0x548] sm:$0xff] %v8884_v54  ;;  %v2674_v19 = vadd.f32 %v7851_v27, %v2509_v51  ;;  %v2989_v11 = vmul.f32 %v7127_v0, %v2733_v56  ;;  %3116 = vst [vmem:[%s9501_s6 + $0x4b0] sm:$0xff] %v3052_v59 }
 0x4fd   :  { %v2511_v35 = vpop.f32.mrf.mxu0 }
 0x4fe   :  { %7134 = vpow2.f32 %v2920_v20  ;;  %v2802_v41 = vmul.f32 0.5, %v2674_v19  ;;  %3250 = vst [vmem:[%s9501_s6 + $0x550] sm:$0xff] %v2674_v19  ;;  %v8902_v2 = vadd.f32 %v7847_v26, %v2511_v35  ;;  %v3053_v32 = vadd.f32 %v2989_v11, %v8791_v34  ;;  %v2735_v34 = vld [vmem:[%s9496_s1 + $0x1a8] sm:$0xff] }
 0x4ff   :  { %v7129_v6 = vpop.eup %7128  ;;  %v2513_v62 = vpop.f32.mrf.mxu0 }
 0x500   :  { %v2922_v33 = vmul.f32 1.442695, %v2802_v41  ;;  %3187 = vst [vmem:[%s9501_s6 + $0x560] sm:$0xff] %v8902_v2  ;;  %v2675_v3 = vadd.f32 %v7851_v27, %v2513_v62  ;;  %3117 = vst [vmem:[%s9501_s6 + $0x4c8] sm:$0xff] %v3053_v32  ;;  %v3283_v48 = vpack.c.bf16 %v3053_v32, %v3052_v59  ;;  %v2990_v50 = vmul.f32 %v7129_v6, %v2734_v10 }
 0x501   :  { %v2517_v28 = vpop.f32.mrf.mxu0 }
 0x502   :  { %7136 = vpow2.f32 %v2922_v33  ;;  %v2803_v30 = vmul.f32 0.5, %v2675_v3  ;;  %3251 = vst [vmem:[%s9501_s6 + $0x568] sm:$0xff] %v2675_v3  ;;  %v8920_v22 = vadd.f32 %v7847_v26, %v2517_v28  ;;  %6541 = vmatmul.mubr.bf16.gmra.mxu1 %v3283_v48  ;;  %v3054_v36 = vadd.f32 %v2990_v50, %v8809_v15  ;;  %v2736_v15 = vld [vmem:[%s9496_s1 + $0x1b0] sm:$0xff]  ;;  %v8941_v61 = vpop.f32.mrf.mxu1 }
 0x503   :  { %v7131_v63 = vpop.eup %7130  ;;  %v2519_v25 = vpop.f32.mrf.mxu0 }
 0x504   :  { %v2924_v45 = vmul.f32 1.442695, %v2803_v30  ;;  %3188 = vst [vmem:[%s9501_s6 + $0x578] sm:$0xff] %v8920_v22  ;;  %v2676_v44 = vadd.f32 %v7851_v27, %v2519_v25  ;;  %v2991_v18 = vmul.f32 %v7131_v63, %v2735_v34  ;;  %3118 = vst [vmem:[%s9501_s6 + $0x4e0] sm:$0xff] %v3054_v36  ;;  %v8961_v43 = vpop.f32.mrf.mxu1 }
 0x505   :  { %v2521_v46 = vpop.f32.mrf.mxu0 }
 0x506   :  { %7138 = vpow2.f32 %v2924_v45  ;;  %v2804_v29 = vmul.f32 0.5, %v2676_v44  ;;  %3252 = vst [vmem:[%s9501_s6 + $0x580] sm:$0xff] %v2676_v44  ;;  %v8938_v38 = vadd.f32 %v7847_v26, %v2521_v46  ;;  %v3055_v4 = vadd.f32 %v2991_v18, %v8827_v24  ;;  %v2737_v24 = vld [vmem:[%s9496_s1 + $0x1b8] sm:$0xff]  ;;  %v8981_v0 = vpop.f32.mrf.mxu1  ;;  %v7002_v44 = vld [vmem:[%s9497_s2 + $0x1a8] sm:$0xff]  }
 0x507   :  { %v7133_v39 = vpop.eup %7132  ;;  %v2523_v8 = vpop.f32.mrf.mxu0  ;;  %6640 = vmatprep.subr.bf16.mxu0 %v7002_v44 }
 0x508   :  { %v2926_v31 = vmul.f32 1.442695, %v2804_v29  ;;  %3189 = vst [vmem:[%s9501_s6 + $0x590] sm:$0xff] %v8938_v38  ;;  %v2677_v42 = vadd.f32 %v7851_v27, %v2523_v8  ;;  %3119 = vst [vmem:[%s9501_s6 + $0x4f8] sm:$0xff] %v3055_v4  ;;  %v3284_v16 = vpack.c.bf16 %v3055_v4, %v3054_v36  ;;  %v2992_v40 = vmul.f32 %v7133_v39, %v2736_v15  ;;  %v3396_v33 = vpop.f32.mrf.mxu1 }
 0x509   :  { %v2527_v9 = vpop.f32.mrf.mxu0  ;;  %6641 = vmatpush3.bf16.msra.mxu0 %v7002_v44 }
 0x50a   :  { %7140 = vpow2.f32 %v2926_v31  ;;  %v2805_v49 = vmul.f32 0.5, %v2677_v42  ;;  %3253 = vst [vmem:[%s9501_s6 + $0x598] sm:$0xff] %v2677_v42  ;;  %v8958_v57 = vadd.f32 %v7847_v26, %v2527_v9  ;;  %6544 = vmatprep.mubr.bf16.mxu1 %v3284_v16  ;;  %v3056_v17 = vadd.f32 %v2992_v40, %v8845_v58  ;;  %v2738_v58 = vld [vmem:[%s9496_s1 + $0x1c0] sm:$0xff] }
 0x50b   :  { %v7135_v47 = vpop.eup %7134  ;;  %v2529_v23 = vpop.f32.mrf.mxu0  ;;  %v2742_v42 = vld [vmem:[%s9496_s1 + $0x1e0] sm:$0xff] }
 0x50c   :  { %v2928_v55 = vmul.f32 1.442695, %v2805_v49  ;;  %3190 = vst [vmem:[%s9501_s6 + $0x5a8] sm:$0xff] %v8958_v57  ;;  %v2678_v5 = vadd.f32 %v7851_v27, %v2529_v23  ;;  %v2993_v1 = vmul.f32 %v7135_v47, %v2737_v24  ;;  %3120 = vst [vmem:[%s9501_s6 + $0x510] sm:$0xff] %v3056_v17  ;;  %v2743_v49 = vld [vmem:[%s9496_s1 + $0x1e8] sm:$0xff] }
 0x50d   :  { %v2531_v14 = vpop.f32.mrf.mxu0 }
 0x50e   :  { %7142 = vpow2.f32 %v2928_v55  ;;  %v2806_v13 = vmul.f32 0.5, %v2678_v5  ;;  %3254 = vst [vmem:[%s9501_s6 + $0x5b0] sm:$0xff] %v2678_v5  ;;  %v8978_v12 = vadd.f32 %v7847_v26, %v2531_v14  ;;  %v3057_v56 = vadd.f32 %v2993_v1, %v8863_v21  ;;  %v2739_v21 = vld [vmem:[%s9496_s1 + $0x1c8] sm:$0xff]  ;;  %v2744_v1 = vld [vmem:[%s9496_s1 + $0x1f0] sm:$0xff] }
 0x50f   :  { %v7137_v60 = vpop.eup %7136  ;;  %v2533_v59 = vpop.f32.mrf.mxu0  ;;  %v3309_v55 = vsub.s32 6, %v7370_v52 }
 0x510   :  { %v2930_v51 = vmul.f32 1.442695, %v2806_v13  ;;  %3191 = vst [vmem:[%s9501_s6 + $0x5c0] sm:$0xff] %v8978_v12  ;;  %v2679_v20 = vadd.f32 %v7851_v27, %v2533_v59  ;;  %3121 = vst [vmem:[%s9501_s6 + $0x528] sm:$0xff] %v3057_v56  ;;  %v3285_v19 = vpack.c.bf16 %v3057_v56, %v3056_v17  ;;  %v2994_v11 = vmul.f32 %v7137_v60, %v2738_v58 }
 0x511   :  { %v2537_v35 = vpop.f32.mrf.mxu0 }
 0x512   :  { %7144 = vpow2.f32 %v2930_v51  ;;  %v2807_v10 = vmul.f32 0.5, %v2679_v20  ;;  %3255 = vst [vmem:[%s9501_s6 + $0x5c8] sm:$0xff] %v2679_v20  ;;  %v8998_v41 = vadd.f32 %v7847_v26, %v2537_v35  ;;  %6545 = vmatmul.mubr.bf16.gmra.mxu1 %v3285_v19  ;;  %v3058_v32 = vadd.f32 %v2994_v11, %v8884_v54  ;;  %v2740_v54 = vld [vmem:[%s9496_s1 + $0x1d0] sm:$0xff]  ;;  %v9012_v34 = vpop.f32.mrf.mxu1 }
 0x513   :  { %v7139_v6 = vpop.eup %7138  ;;  %v2539_v62 = vpop.f32.mrf.mxu0 }
 0x514   :  { %v2932_v3 = vmul.f32 1.442695, %v2807_v10  ;;  %3192 = vst [vmem:[%s9501_s6 + $0x5d8] sm:$0xff] %v8998_v41  ;;  %v2680_v48 = vadd.f32 %v7851_v27, %v2539_v62  ;;  %v2995_v50 = vmul.f32 %v7139_v6, %v2739_v21  ;;  %3122 = vst [vmem:[%s9501_s6 + $0x540] sm:$0xff] %v3058_v32  ;;  %v3409_v29 = vpop.f32.mrf.mxu1 }
 0x515   :  { %v2541_v28 = vpop.f32.mrf.mxu0 }
 0x516   :  { %7146 = vpow2.f32 %v2932_v3  ;;  %v2808_v30 = vmul.f32 0.5, %v2680_v48  ;;  %3256 = vst [vmem:[%s9501_s6 + $0x5e0] sm:$0xff] %v2680_v48  ;;  %v2613_v36 = vadd.f32 %v7847_v26, %v2541_v28  ;;  %v3059_v63 = vadd.f32 %v2995_v50, %v8902_v2  ;;  %v2741_v2 = vld [vmem:[%s9496_s1 + $0x1d8] sm:$0xff]  ;;  %v6499_v16 = vpop.f32.mrf.mxu1 }
 0x517   :  { %v7141_v25 = vpop.eup %7140  ;;  %v2543_v45 = vpop.f32.mrf.mxu0 }
 0x518   :  { %v2934_v18 = vmul.f32 1.442695, %v2808_v30  ;;  %3193 = vst [vmem:[%s9501_s6 + $0x5f0] sm:$0xff] %v2613_v36  ;;  %v2681_v46 = vadd.f32 %v7851_v27, %v2543_v45  ;;  %3123 = vst [vmem:[%s9501_s6 + $0x558] sm:$0xff] %v3059_v63  ;;  %v3286_v26 = vpack.c.bf16 %v3059_v63, %v3058_v32  ;;  %v2996_v15 = vmul.f32 %v7141_v25, %v2740_v54  ;;  %v3412_v17 = vpop.f32.mrf.mxu1  ;;  %v7003_v25 = vld [vmem:[%s9497_s2 + $0x1a0] sm:$0xff]  }
 0x519   :  { %6642 = vmatprep.subr.bf16.mxu0 %v7003_v25 }
 0x51a   :  { %7148 = vpow2.f32 %v2934_v18  ;;  %v2809_v4 = vmul.f32 0.5, %v2681_v46  ;;  %3257 = vst [vmem:[%s9501_s6 + $0x5f8] sm:$0xff] %v2681_v46  ;;  %6548 = vmatprep.mubr.bf16.mxu1 %v3286_v26  ;;  %v3060_v27 = vadd.f32 %v2996_v15, %v8920_v22  ;;  %6643 = vmatpush3.bf16.msra.mxu0 %v7003_v25 }
 0x51b   :  { %v7143_v39 = vpop.eup %7142 }
 0x51c   :  { %v2936_v8 = vmul.f32 1.442695, %v2809_v4  ;;  %v2997_v31 = vmul.f32 %v7143_v39, %v2741_v2  ;;  %3124 = vst [vmem:[%s9501_s6 + $0x570] sm:$0xff] %v3060_v27 }
 0x51e   :  { %7150 = vpow2.f32 %v2936_v8  ;;  %v3061_v40 = vadd.f32 %v2997_v31, %v8938_v38 }
 0x51f   :  { %v7145_v9 = vpop.eup %7144 }
 0x520   :  { %3125 = vst [vmem:[%s9501_s6 + $0x588] sm:$0xff] %v3061_v40  ;;  %v3287_v22 = vpack.c.bf16 %v3061_v40, %v3060_v27  ;;  %v2998_v24 = vmul.f32 %v7145_v9, %v2742_v42 }
 0x522   :  { %6549 = vmatmul.mubr.bf16.gmra.mxu1 %v3287_v22  ;;  %v3062_v47 = vadd.f32 %v2998_v24, %v8958_v57  ;;  %v6502_v5 = vpop.f32.mrf.mxu1  ;;  %v9061_v57 = vld [vmem:[%s9499_s4] sm:$0xff] }
 0x523   :  { %v7147_v23 = vpop.eup %7146  ;;  %v9064_v13 = vrot.slane %v9061_v57, %v3309_v55 }
 0x524   :  { %v2999_v38 = vmul.f32 %v7147_v23, %v2743_v49  ;;  %3126 = vst [vmem:[%s9501_s6 + $0x5a0] sm:$0xff] %v3062_v47  ;;  %v3425_v56 = vpop.f32.mrf.mxu1 }
 0x525   :  { %v3397_v51 = vadd.f32 %v3396_v33, %v9064_v13  ;;  %v3394_v11 = vadd.f32 %v8961_v43, %v9064_v13  ;;  %v3405_v62 = vadd.f32 %v8981_v0, %v9064_v13  ;;  %v3413_v43 = vadd.f32 %v3412_v17, %v9064_v13 }
 0x526   :  { %v3063_v14 = vadd.f32 %v2999_v38, %v8978_v12  ;;  %v2745_v12 = vld [vmem:[%s9496_s1 + $0x1f8] sm:$0xff]  ;;  %v6503_v35 = vpop.f32.mrf.mxu1  ;;  %v3402_v48 = vadd.f32 %v8941_v61, %v9064_v13  ;;  %v3410_v28 = vadd.f32 %v3409_v29, %v9064_v13  ;;  %v3421_v44 = vadd.f32 %v6499_v16, %v9064_v13 }
 0x527   :  { %v7149_v58 = vpop.eup %7148  ;;  %v3649_v10 = vmax.f32 %v3397_v51, 0.0  ;;  %v3648_v6 = vmax.f32 %v3394_v11, 0.0  ;;  %v3651_v54 = vmax.f32 %v3405_v62, 0.0  ;;  %v3653_v30 = vmax.f32 %v3413_v43, 0.0 }
 0x528   :  { %3127 = vst [vmem:[%s9501_s6 + $0x5b8] sm:$0xff] %v3063_v14  ;;  %v3288_v60 = vpack.c.bf16 %v3063_v14, %v3062_v47  ;;  %v3000_v59 = vmul.f32 %v7149_v58, %v2744_v1  ;;  %v3428_v33 = vpop.f32.mrf.mxu1  ;;  %v3650_v0 = vmax.f32 %v3402_v48, 0.0  ;;  %v3652_v63 = vmax.f32 %v3410_v28, 0.0 }
 0x529   :  { %v3712_v3 = vpack.c.bf16 %v3649_v10, %v3648_v6  ;;  %v3429_v18 = vadd.f32 %v3428_v33, %v9064_v13  ;;  %v3418_v46 = vadd.f32 %v9012_v34, %v9064_v13  ;;  %v3426_v15 = vadd.f32 %v3425_v56, %v9064_v13 }
 0x52a   :  { %6552 = vmatprep.mubr.bf16.mxu1 %v3288_v60  ;;  %v3064_v20 = vadd.f32 %v3000_v59, %v8998_v41  ;;  %v3713_v45 = vpack.c.bf16 %v3651_v54, %v3650_v0  ;;  %v3714_v61 = vpack.c.bf16 %v3653_v30, %v3652_v63  ;;  %v3655_v2 = vmax.f32 %v3421_v44, 0.0 }
 0x52b   :  { %v7151_v19 = vpop.eup %7150  ;;  %v3657_v29 = vmax.f32 %v3429_v18, 0.0  ;;  %v3654_v4 = vmax.f32 %v3418_v46, 0.0  ;;  %v3656_v39 = vmax.f32 %v3426_v15, 0.0  ;;  %v3437_v31 = vadd.f32 %v6503_v35, %v9064_v13 }
 0x52c   :  { %v3001_v21 = vmul.f32 %v7151_v19, %v2745_v12  ;;  %3128 = vst [vmem:[%s9501_s6 + $0x5d0] sm:$0xff] %v3064_v20  ;;  %v3434_v40 = vadd.f32 %v6502_v5, %v9064_v13 }
 0x52d   :  { %v3715_v8 = vpack.c.bf16 %v3655_v2, %v3654_v4  ;;  %v3716_v16 = vpack.c.bf16 %v3657_v29, %v3656_v39  ;;  %v3659_v22 = vmax.f32 %v3437_v31, 0.0 }
 0x52e   :  { %v3065_v32 = vadd.f32 %v3001_v21, %v2613_v36  ;;  %v3658_v17 = vmax.f32 %v3434_v40, 0.0 }
 0x530   :  { %3129 = vst [vmem:[%s9501_s6 + $0x5e8] sm:$0xff] %v3065_v32  ;;  %v3289_v41 = vpack.c.bf16 %v3065_v32, %v3064_v20  ;;  %v3717_v55 = vpack.c.bf16 %v3659_v22, %v3658_v17  ;;  %v7005_v22 = vld [vmem:[%s9497_s2 + $0x190] sm:$0xff]  }
 0x532   :  { %v6506_v50 = vpop.f32.mrf.mxu1  ;;  %6553 = vmatmul.mubr.bf16.gmra.mxu1 %v3289_v41  ;;  %v7004_v41 = vld [vmem:[%s9497_s2 + $0x198] sm:$0xff]  }
 0x533   :  { %6572 = vmatprep.mubr.bf16.mxu1 %v3712_v3  ;;  %v3450_v5 = vadd.f32 %v6506_v50, %v9064_v13  ;;  %6644 = vmatprep.subr.bf16.mxu0 %v7004_v41 }
 0x534   :  { %v3441_v36 = vpop.f32.mrf.mxu1  ;;  %6645 = vmatpush3.bf16.msra.mxu0 %v7004_v41 }
 0x535   :  { %v3442_v9 = vadd.f32 %v3441_v36, %v9064_v13  ;;  %v3662_v51 = vmax.f32 %v3450_v5, 0.0  ;;  %6646 = vmatprep.subr.bf16.mxu0 %v7005_v22 }
 0x536   :  { %v6507_v26 = vpop.f32.mrf.mxu1 }
 0x537   :  { %v3660_v23 = vmax.f32 %v3442_v9, 0.0  ;;  %v3453_v38 = vadd.f32 %v6507_v26, %v9064_v13 }
 0x538   :  { %v3444_v27 = vpop.f32.mrf.mxu1  ;;  %6647 = vmatpush3.bf16.msra.mxu0 %v7005_v22 }
 0x539   :  { %v3445_v42 = vadd.f32 %v3444_v27, %v9064_v13  ;;  %v3663_v60 = vmax.f32 %v3453_v38, 0.0 }
 0x53a   :  { %6573 = vmatmul.mubr.bf16.vlgmr.msra.gmra.mxu1 %v3713_v45 }
 0x53b   :  { %6576 = vmatprep.mubr.bf16.mxu1 %v3714_v61  ;;  %v3661_v49 = vmax.f32 %v3445_v42, 0.0  ;;  %v3719_v20 = vpack.c.bf16 %v3663_v60, %v3662_v51 }
 0x53d   :  { %v3718_v58 = vpack.c.bf16 %v3661_v49, %v3660_v23 }
 0x542   :  { %v6510_v34 = vpop.f32.mrf.mxu1  ;;  %6577 = vmatmul.mubr.bf16.gmra.mxu1 %v3715_v8 }
 0x543   :  { %6580 = vmatprep.mubr.bf16.mxu1 %v3716_v16  ;;  %v3466_v35 = vadd.f32 %v6510_v34, %v9064_v13 }
 0x544   :  { %v3457_v24 = vpop.f32.mrf.mxu1 }
 0x545   :  { %v3458_v56 = vadd.f32 %v3457_v24, %v9064_v13  ;;  %v3666_v6 = vmax.f32 %v3466_v35, 0.0 }
 0x546   :  { %v6511_v47 = vpop.f32.mrf.mxu1 }
 0x547   :  { %v3664_v12 = vmax.f32 %v3458_v56, 0.0  ;;  %v3469_v19 = vadd.f32 %v6511_v47, %v9064_v13  ;;  %v7007_v56 = vld [vmem:[%s9497_s2 + $0x180] sm:$0xff]  }
 0x548   :  { %v3460_v1 = vpop.f32.mrf.mxu1 }
 0x549   :  { %v3461_v14 = vadd.f32 %v3460_v1, %v9064_v13  ;;  %v3667_v10 = vmax.f32 %v3469_v19, 0.0 }
 0x54a   :  { %6581 = vmatmul.mubr.bf16.gmra.mxu1 %v3717_v55 }
 0x54b   :  { %6584 = vmatprep.mubr.bf16.mxu1 %v3718_v58  ;;  %v3665_v59 = vmax.f32 %v3461_v14, 0.0  ;;  %v3721_v43 = vpack.c.bf16 %v3667_v10, %v3666_v6  ;;  %v7006_v58 = vld [vmem:[%s9497_s2 + $0x188] sm:$0xff]  }
 0x54c   :  { %6648 = vmatprep.subr.bf16.mxu0 %v7006_v58 }
 0x54d   :  { %v3720_v11 = vpack.c.bf16 %v3665_v59, %v3664_v12  ;;  %6649 = vmatpush3.bf16.msra.mxu0 %v7006_v58 }
 0x54e   :  { %6650 = vmatprep.subr.bf16.mxu0 %v7007_v56 }
 0x551   :  { %6651 = vmatpush3.bf16.msra.mxu0 %v7007_v56 }
 0x552   :  { %v6514_v21 = vpop.f32.mrf.mxu1  ;;  %6585 = vmatmul.mubr.bf16.gmra.mxu1 %v3719_v20 }
 0x553   :  { %6588 = vmatprep.mubr.bf16.mxu1 %v3720_v11  ;;  %v3482_v28 = vadd.f32 %v6514_v21, %v9064_v13 }
 0x554   :  { %v3473_v32 = vpop.f32.mrf.mxu1 }
 0x555   :  { %v3474_v33 = vadd.f32 %v3473_v32, %v9064_v13  ;;  %v3670_v63 = vmax.f32 %v3482_v28, 0.0 }
 0x556   :  { %v6515_v62 = vpop.f32.mrf.mxu1 }
 0x557   :  { %v3485_v3 = vadd.f32 %v6515_v62, %v9064_v13  ;;  %v3668_v54 = vmax.f32 %v3474_v33, 0.0 }
 0x558   :  { %v3476_v48 = vpop.f32.mrf.mxu1 }
 0x559   :  { %v3477_v50 = vadd.f32 %v3476_v48, %v9064_v13  ;;  %v3671_v0 = vmax.f32 %v3485_v3, 0.0 }
 0x55a   :  { %6589 = vmatmul.mubr.bf16.gmra.mxu1 %v3721_v43 }
 0x55b   :  { %v3669_v30 = vmax.f32 %v3477_v50, 0.0  ;;  %v3723_v25 = vpack.c.bf16 %v3671_v0, %v3670_v63 }
 0x55d   :  { %v3722_v36 = vpack.c.bf16 %v3669_v30, %v3668_v54 }
 0x55f   :  { %6592 = vmatprep.mubr.bf16.mxu1 %v3722_v36 }
 0x562   :  { %v6518_v45 = vpop.f32.mrf.mxu1  ;;  %6593 = vmatmul.mubr.bf16.gmra.mxu1 %v3723_v25 }
 0x563   :  { %v3498_v26 = vadd.f32 %v6518_v45, %v9064_v13 }
 0x564   :  { %v3489_v44 = vpop.f32.mrf.mxu1 }
 0x565   :  { %v3490_v61 = vadd.f32 %v3489_v44, %v9064_v13  ;;  %v3674_v39 = vmax.f32 %v3498_v26, 0.0 }
 0x566   :  { %v6519_v18 = vpop.f32.mrf.mxu1 }
 0x567   :  { %v3501_v46 = vadd.f32 %v6519_v18, %v9064_v13  ;;  %v3672_v4 = vmax.f32 %v3490_v61, 0.0 }
 0x568   :  { %v3492_v15 = vpop.f32.mrf.mxu1 }
 0x569   :  { %v3493_v2 = vadd.f32 %v3492_v15, %v9064_v13  ;;  %v3675_v29 = vmax.f32 %v3501_v46, 0.0 }
 0x56b   :  { %v3673_v27 = vmax.f32 %v3493_v2, 0.0  ;;  %v3725_v31 = vpack.c.bf16 %v3675_v29, %v3674_v39 }
 0x56d   :  { %v3724_v8 = vpack.c.bf16 %v3673_v27, %v3672_v4 }
 0x56f   :  { %6596 = vmatprep.mubr.bf16.mxu1 %v3724_v8 }
 0x570   :  { %6597 = vmatmul.mubr.bf16.gmra.mxu1 %v3725_v31 }
 0x572   :  { %v6522_v42 = vpop.f32.mrf.mxu1 }
 0x573   :  { %v3514_v24 = vadd.f32 %v6522_v42, %v9064_v13 }
 0x574   :  { %v3505_v16 = vpop.f32.mrf.mxu1 }
 0x575   :  { %v3506_v34 = vadd.f32 %v3505_v16, %v9064_v13  ;;  %v3678_v38 = vmax.f32 %v3514_v24, 0.0 }
 0x576   :  { %v6523_v40 = vpop.f32.mrf.mxu1 }
 0x577   :  { %v3517_v9 = vadd.f32 %v6523_v40, %v9064_v13  ;;  %v3676_v23 = vmax.f32 %v3506_v34, 0.0 }
 0x578   :  { %v3508_v49 = vpop.f32.mrf.mxu1 }
 0x579   :  { %v3509_v17 = vadd.f32 %v3508_v49, %v9064_v13  ;;  %v3679_v47 = vmax.f32 %v3517_v9, 0.0 }
 0x57b   :  { %v3677_v55 = vmax.f32 %v3509_v17, 0.0  ;;  %v3727_v14 = vpack.c.bf16 %v3679_v47, %v3678_v38 }
 0x57d   :  { %v3726_v1 = vpack.c.bf16 %v3677_v55, %v3676_v23 }
 0x57f   :  { %6600 = vmatprep.mubr.bf16.mxu1 %v3726_v1 }
 0x580   :  { %6601 = vmatmul.mubr.bf16.gmra.mxu1 %v3727_v14 }
 0x582   :  { %v6526_v5 = vpop.f32.mrf.mxu1 }
 0x583   :  { %v3530_v20 = vadd.f32 %v6526_v5, %v9064_v13 }
 0x584   :  { %v3521_v60 = vpop.f32.mrf.mxu1 }
 0x585   :  { %v3522_v51 = vadd.f32 %v3521_v60, %v9064_v13  ;;  %v3682_v32 = vmax.f32 %v3530_v20, 0.0 }
 0x586   :  { %v6527_v59 = vpop.f32.mrf.mxu1 }
 0x587   :  { %v3533_v12 = vadd.f32 %v6527_v59, %v9064_v13  ;;  %v3680_v21 = vmax.f32 %v3522_v51, 0.0 }
 0x588   :  { %v3524_v19 = vpop.f32.mrf.mxu1 }
 0x589   :  { %v3525_v11 = vadd.f32 %v3524_v19, %v9064_v13  ;;  %v3683_v35 = vmax.f32 %v3533_v12, 0.0 }
 0x58b   :  { %v3681_v10 = vmax.f32 %v3525_v11, 0.0  ;;  %v3729_v62 = vpack.c.bf16 %v3683_v35, %v3682_v32 }
 0x58d   :  { %v3728_v6 = vpack.c.bf16 %v3681_v10, %v3680_v21 }
 0x58f   :  { %6604 = vmatprep.mubr.bf16.mxu1 %v3728_v6 }
 0x590   :  { %6605 = vmatmul.mubr.bf16.gmra.mxu1 %v3729_v62 }
 0x592   :  { %v6530_v33 = vpop.f32.mrf.mxu1 }
 0x593   :  { %v3546_v50 = vadd.f32 %v6530_v33, %v9064_v13 }
 0x594   :  { %v3537_v41 = vpop.f32.mrf.mxu1 }
 0x595   :  { %v3538_v3 = vadd.f32 %v3537_v41, %v9064_v13  ;;  %v3686_v63 = vmax.f32 %v3546_v50, 0.0 }
 0x596   :  { %v6531_v43 = vpop.f32.mrf.mxu1 }
 0x597   :  { %v3549_v48 = vadd.f32 %v6531_v43, %v9064_v13  ;;  %v3684_v0 = vmax.f32 %v3538_v3, 0.0 }
 0x598   :  { %v3540_v28 = vpop.f32.mrf.mxu1 }
 0x599   :  { %v3541_v54 = vadd.f32 %v3540_v28, %v9064_v13  ;;  %v3687_v30 = vmax.f32 %v3549_v48, 0.0 }
 0x59b   :  { %v3685_v36 = vmax.f32 %v3541_v54, 0.0  ;;  %v3731_v45 = vpack.c.bf16 %v3687_v30, %v3686_v63 }
 0x59d   :  { %v3730_v25 = vpack.c.bf16 %v3685_v36, %v3684_v0 }
 0x59f   :  { %6608 = vmatprep.mubr.bf16.mxu1 %v3730_v25 }
 0x5a0   :  { %6609 = vmatmul.mubr.bf16.gmra.mxu1 %v3731_v45 }
 0x5a2   :  { %v6534_v44 = vpop.f32.mrf.mxu1 }
 0x5a3   :  { %v3562_v15 = vadd.f32 %v6534_v44, %v9064_v13 }
 0x5a4   :  { %v3553_v18 = vpop.f32.mrf.mxu1 }
 0x5a5   :  { %v3554_v46 = vadd.f32 %v3553_v18, %v9064_v13  ;;  %v3690_v8 = vmax.f32 %v3562_v15, 0.0 }
 0x5a6   :  { %v6535_v61 = vpop.f32.mrf.mxu1 }
 0x5a7   :  { %v3565_v26 = vadd.f32 %v6535_v61, %v9064_v13  ;;  %v3688_v27 = vmax.f32 %v3554_v46, 0.0 }
 0x5a8   :  { %v3556_v2 = vpop.f32.mrf.mxu1 }
 0x5a9   :  { %v3557_v29 = vadd.f32 %v3556_v2, %v9064_v13  ;;  %v3691_v4 = vmax.f32 %v3565_v26, 0.0 }
 0x5ab   :  { %v3689_v39 = vmax.f32 %v3557_v29, 0.0  ;;  %v3733_v42 = vpack.c.bf16 %v3691_v4, %v3690_v8 }
 0x5ad   :  { %v3732_v31 = vpack.c.bf16 %v3689_v39, %v3688_v27 }
 0x5af   :  { %6612 = vmatprep.mubr.bf16.mxu1 %v3732_v31 }
 0x5b0   :  { %6613 = vmatmul.mubr.bf16.gmra.mxu1 %v3733_v42 }
 0x5b2   :  { %v6538_v16 = vpop.f32.mrf.mxu1 }
 0x5b3   :  { %v3578_v24 = vadd.f32 %v6538_v16, %v9064_v13 }
 0x5b4   :  { %v3569_v40 = vpop.f32.mrf.mxu1 }
 0x5b5   :  { %v3570_v9 = vadd.f32 %v3569_v40, %v9064_v13  ;;  %v3694_v38 = vmax.f32 %v3578_v24, 0.0  ;;  %v3763_v24 = vsub.s32 7, %v7370_v52 }
 0x5b6   :  { %v6539_v34 = vpop.f32.mrf.mxu1 }
 0x5b7   :  { %v3581_v22 = vadd.f32 %v6539_v34, %v9064_v13  ;;  %v3692_v23 = vmax.f32 %v3570_v9, 0.0 }
 0x5b8   :  { %v3572_v49 = vpop.f32.mrf.mxu1 }
 0x5b9   :  { %v3573_v17 = vadd.f32 %v3572_v49, %v9064_v13  ;;  %v3695_v47 = vmax.f32 %v3581_v22, 0.0 }
 0x5bb   :  { %v3693_v55 = vmax.f32 %v3573_v17, 0.0  ;;  %v3735_v14 = vpack.c.bf16 %v3695_v47, %v3694_v38 }
 0x5bd   :  { %v3734_v1 = vpack.c.bf16 %v3693_v55, %v3692_v23 }
 0x5bf   :  { %6616 = vmatprep.mubr.bf16.mxu1 %v3734_v1  ;;  %v9164_v1 = vrot.slane %v9061_v57, %v3763_v24 }
 0x5c0   :  { %6617 = vmatmul.mubr.bf16.gmra.mxu1 %v3735_v14 }
 0x5c2   :  { %v6542_v58 = vpop.f32.mrf.mxu1 }
 0x5c3   :  { %v3594_v51 = vadd.f32 %v6542_v58, %v9064_v13 }
 0x5c4   :  { %v3585_v5 = vpop.f32.mrf.mxu1 }
 0x5c5   :  { %v3586_v60 = vadd.f32 %v3585_v5, %v9064_v13  ;;  %v3698_v21 = vmax.f32 %v3594_v51, 0.0 }
 0x5c6   :  { %v6543_v56 = vpop.f32.mrf.mxu1 }
 0x5c7   :  { %v3597_v59 = vadd.f32 %v6543_v56, %v9064_v13  ;;  %v3696_v11 = vmax.f32 %v3586_v60, 0.0 }
 0x5c8   :  { %v3588_v12 = vpop.f32.mrf.mxu1 }
 0x5c9   :  { %v3589_v20 = vadd.f32 %v3588_v12, %v9064_v13  ;;  %v3699_v19 = vmax.f32 %v3597_v59, 0.0 }
 0x5cb   :  { %v3697_v35 = vmax.f32 %v3589_v20, 0.0  ;;  %v3737_v32 = vpack.c.bf16 %v3699_v19, %v3698_v21 }
 0x5cd   :  { %v3736_v10 = vpack.c.bf16 %v3697_v35, %v3696_v11 }
 0x5cf   :  { %6620 = vmatprep.mubr.bf16.mxu1 %v3736_v10 }
 0x5d0   :  { %6621 = vmatmul.mubr.bf16.gmra.mxu1 %v3737_v32 }
 0x5d2   :  { %v6546_v6 = vpop.f32.mrf.mxu1 }
 0x5d3   :  { %v3610_v3 = vadd.f32 %v6546_v6, %v9064_v13 }
 0x5d4   :  { %v3601_v62 = vpop.f32.mrf.mxu1 }
 0x5d5   :  { %v3602_v41 = vadd.f32 %v3601_v62, %v9064_v13  ;;  %v3702_v0 = vmax.f32 %v3610_v3, 0.0 }
 0x5d6   :  { %v6547_v33 = vpop.f32.mrf.mxu1 }
 0x5d7   :  { %v3613_v43 = vadd.f32 %v6547_v33, %v9064_v13  ;;  %v3700_v54 = vmax.f32 %v3602_v41, 0.0 }
 0x5d8   :  { %v3604_v48 = vpop.f32.mrf.mxu1 }
 0x5d9   :  { %v3605_v50 = vadd.f32 %v3604_v48, %v9064_v13  ;;  %v3703_v28 = vmax.f32 %v3613_v43, 0.0 }
 0x5db   :  { %v3701_v30 = vmax.f32 %v3605_v50, 0.0  ;;  %v3739_v63 = vpack.c.bf16 %v3703_v28, %v3702_v0 }
 0x5dd   :  { %v3738_v36 = vpack.c.bf16 %v3701_v30, %v3700_v54 }
 0x5df   :  { %6624 = vmatprep.mubr.bf16.mxu1 %v3738_v36 }
 0x5e0   :  { %6625 = vmatmul.mubr.bf16.gmra.mxu1 %v3739_v63 }
 0x5e2   :  { %v6550_v25 = vpop.f32.mrf.mxu1 }
 0x5e3   :  { %v3626_v46 = vadd.f32 %v6550_v25, %v9064_v13 }
 0x5e4   :  { %v3617_v45 = vpop.f32.mrf.mxu1 }
 0x5e5   :  { %v3618_v18 = vadd.f32 %v3617_v45, %v9064_v13  ;;  %v3706_v27 = vmax.f32 %v3626_v46, 0.0 }
 0x5e6   :  { %v6551_v44 = vpop.f32.mrf.mxu1 }
 0x5e7   :  { %v3629_v61 = vadd.f32 %v6551_v44, %v9064_v13  ;;  %v3704_v29 = vmax.f32 %v3618_v18, 0.0 }
 0x5e8   :  { %v3620_v26 = vpop.f32.mrf.mxu1 }
 0x5e9   :  { %v3621_v15 = vadd.f32 %v3620_v26, %v9064_v13  ;;  %v3707_v2 = vmax.f32 %v3629_v61, 0.0 }
 0x5eb   :  { %v3705_v4 = vmax.f32 %v3621_v15, 0.0  ;;  %v3741_v8 = vpack.c.bf16 %v3707_v2, %v3706_v27 }
 0x5ed   :  { %v3740_v39 = vpack.c.bf16 %v3705_v4, %v3704_v29 }
 0x5ef   :  { %6628 = vmatprep.mubr.bf16.mxu1 %v3740_v39 }
 0x5f0   :  { %6629 = vmatmul.mubr.bf16.gmra.mxu1 %v3741_v8 }
 0x5f2   :  { %v6554_v31 = vpop.f32.mrf.mxu1 }
 0x5f3   :  { %v3642_v9 = vadd.f32 %v6554_v31, %v9064_v13 }
 0x5f4   :  { %v3633_v42 = vpop.f32.mrf.mxu1 }
 0x5f5   :  { %v3634_v40 = vadd.f32 %v3633_v42, %v9064_v13  ;;  %v3710_v38 = vmax.f32 %v3642_v9, 0.0 }
 0x5f6   :  { %v6555_v16 = vpop.f32.mrf.mxu1 }
 0x5f7   :  { %v3645_v34 = vadd.f32 %v6555_v16, %v9064_v13  ;;  %v3708_v23 = vmax.f32 %v3634_v40, 0.0 }
 0x5f8   :  { %v3636_v22 = vpop.f32.mrf.mxu1 }
 0x5f9   :  { %v3637_v49 = vadd.f32 %v3636_v22, %v9064_v13  ;;  %v3711_v17 = vmax.f32 %v3645_v34, 0.0 }
 0x5fa   :  { %v6574_v47 = vpop.f32.mrf.mxu1 }
 0x5fb   :  { %v3709_v55 = vmax.f32 %v3637_v49, 0.0  ;;  %v3743_v5 = vpack.c.bf16 %v3711_v17, %v3710_v38  ;;  %v3856_v51 = vadd.f32 %v6574_v47, %v9164_v1 }
 0x5fc   :  { %v3847_v14 = vpop.f32.mrf.mxu1 }
 0x5fd   :  { %v3742_v58 = vpack.c.bf16 %v3709_v55, %v3708_v23  ;;  %v3848_v60 = vadd.f32 %v3847_v14, %v9164_v1  ;;  %v4104_v35 = vmax.f32 %v3856_v51, 0.0 }
 0x5fe   :  { %v6575_v56 = vpop.f32.mrf.mxu1 }
 0x5ff   :  { %v3859_v59 = vadd.f32 %v6575_v56, %v9164_v1  ;;  %6632 = vmatprep.mubr.bf16.mxu1 %v3742_v58  ;;  %v4102_v11 = vmax.f32 %v3848_v60, 0.0 }
 0x600   :  { %v3850_v13 = vpop.f32.mrf.mxu1  ;;  %6633 = vmatmul.mubr.bf16.gmra.mxu1 %v3743_v5 }
 0x601   :  { %v3851_v12 = vadd.f32 %v3850_v13, %v9164_v1  ;;  %v4105_v20 = vmax.f32 %v3859_v59, 0.0 }
 0x602   :  { %v6578_v19 = vpop.f32.mrf.mxu1 }
 0x603   :  { %v4103_v57 = vmax.f32 %v3851_v12, 0.0  ;;  %v4167_v32 = vpack.c.bf16 %v4105_v20, %v4104_v35  ;;  %v3872_v41 = vadd.f32 %v6578_v19, %v9164_v1  ;;  %v7008_v35 = vld [vmem:[%s9497_s2 + $0x1f8] sm:$0xff]  }
 0x604   :  { %v3863_v21 = vpop.f32.mrf.mxu1  ;;  %6716 = vmatprep.subr.bf16.mxu1 %v7008_v35 }
 0x605   :  { %v4166_v10 = vpack.c.bf16 %v4103_v57, %v4102_v11  ;;  %v3864_v62 = vadd.f32 %v3863_v21, %v9164_v1  ;;  %v4108_v30 = vmax.f32 %v3872_v41, 0.0  ;;  %6717 = vmatpush3.bf16.msra.mxu1 %v7008_v35 }
 0x606   :  { %v6579_v6 = vpop.f32.mrf.mxu1 }
 0x607   :  { %v3875_v33 = vadd.f32 %v6579_v6, %v9164_v1  ;;  %6652 = vmatprep.mubr.bf16.mxu0 %v4166_v10  ;;  %v4106_v28 = vmax.f32 %v3864_v62, 0.0 }
 0x608   :  { %v3866_v43 = vpop.f32.mrf.mxu1  ;;  %6653 = vmatmul.mubr.bf16.vlgmr.msra.gmra.mxu0 %v4167_v32 }
 0x609   :  { %v3867_v3 = vadd.f32 %v3866_v43, %v9164_v1  ;;  %v4109_v48 = vmax.f32 %v3875_v33, 0.0 }
 0x60a   :  { %v6582_v50 = vpop.f32.mrf.mxu1 }
 0x60b   :  { %v4107_v54 = vmax.f32 %v3867_v3, 0.0  ;;  %v4169_v63 = vpack.c.bf16 %v4109_v48, %v4108_v30  ;;  %v3888_v18 = vadd.f32 %v6582_v50, %v9164_v1 }
 0x60c   :  { %v3879_v0 = vpop.f32.mrf.mxu1 }
 0x60d   :  { %v4168_v36 = vpack.c.bf16 %v4107_v54, %v4106_v28  ;;  %v3880_v45 = vadd.f32 %v3879_v0, %v9164_v1  ;;  %v4112_v4 = vmax.f32 %v3888_v18, 0.0 }
 0x60e   :  { %v6583_v25 = vpop.f32.mrf.mxu1 }
 0x60f   :  { %v3891_v44 = vadd.f32 %v6583_v25, %v9164_v1  ;;  %6656 = vmatprep.mubr.bf16.mxu0 %v4168_v36  ;;  %v4110_v2 = vmax.f32 %v3880_v45, 0.0  ;;  %v7009_v45 = vld [vmem:[%s9497_s2 + $0x1f0] sm:$0xff]  }
 0x610   :  { %v3882_v61 = vpop.f32.mrf.mxu1  ;;  %6657 = vmatmul.mubr.bf16.gmra.mxu0 %v4169_v63  ;;  %6718 = vmatprep.subr.bf16.mxu1 %v7009_v45 }
 0x611   :  { %v3883_v46 = vadd.f32 %v3882_v61, %v9164_v1  ;;  %v4113_v26 = vmax.f32 %v3891_v44, 0.0  ;;  %6719 = vmatpush3.bf16.msra.mxu1 %v7009_v45 }
 0x612   :  { %v6586_v15 = vpop.f32.mrf.mxu1 }
 0x613   :  { %v4111_v29 = vmax.f32 %v3883_v46, 0.0  ;;  %v4171_v8 = vpack.c.bf16 %v4113_v26, %v4112_v4  ;;  %v3904_v40 = vadd.f32 %v6586_v15, %v9164_v1 }
 0x614   :  { %v3895_v27 = vpop.f32.mrf.mxu1 }
 0x615   :  { %v4170_v39 = vpack.c.bf16 %v4111_v29, %v4110_v2  ;;  %v3896_v42 = vadd.f32 %v3895_v27, %v9164_v1  ;;  %v4116_v47 = vmax.f32 %v3904_v40, 0.0  ;;  %v7010_v27 = vld [vmem:[%s9497_s2 + $0x1e8] sm:$0xff]  }
 0x616   :  { %v6587_v31 = vpop.f32.mrf.mxu1  ;;  %6720 = vmatprep.subr.bf16.mxu1 %v7010_v27 }
 0x617   :  { %v3907_v16 = vadd.f32 %v6587_v31, %v9164_v1  ;;  %6660 = vmatprep.mubr.bf16.mxu0 %v4170_v39  ;;  %v4114_v49 = vmax.f32 %v3896_v42, 0.0  ;;  %6721 = vmatpush3.bf16.msra.mxu1 %v7010_v27 }
 0x618   :  { %v3898_v34 = vpop.f32.mrf.mxu1  ;;  %6661 = vmatmul.mubr.bf16.gmra.mxu0 %v4171_v8  ;;  %v7011_v8 = vld [vmem:[%s9497_s2 + $0x1e0] sm:$0xff]  }
 0x619   :  { %v3899_v9 = vadd.f32 %v3898_v34, %v9164_v1  ;;  %v4117_v22 = vmax.f32 %v3907_v16, 0.0  ;;  %6722 = vmatprep.subr.bf16.mxu1 %v7011_v8  ;;  %v7012_v16 = vld [vmem:[%s9497_s2 + $0x1d8] sm:$0xff]  }
 0x61a   :  { %v6590_v24 = vpop.f32.mrf.mxu1 }
 0x61b   :  { %v4115_v17 = vmax.f32 %v3899_v9, 0.0  ;;  %v4173_v38 = vpack.c.bf16 %v4117_v22, %v4116_v47  ;;  %v3920_v56 = vadd.f32 %v6590_v24, %v9164_v1  ;;  %6723 = vmatpush3.bf16.msra.mxu1 %v7011_v8 }
 0x61c   :  { %v3911_v23 = vpop.f32.mrf.mxu1  ;;  %6724 = vmatprep.subr.bf16.mxu1 %v7012_v16 }
 0x61d   :  { %v4172_v55 = vpack.c.bf16 %v4115_v17, %v4114_v49  ;;  %v3912_v58 = vadd.f32 %v3911_v23, %v9164_v1  ;;  %v4120_v19 = vmax.f32 %v3920_v56, 0.0  ;;  %v7013_v17 = vld [vmem:[%s9497_s2 + $0x1d0] sm:$0xff]   ;;  %v7015_v56 = vld [vmem:[%s9497_s2 + $0x1c0] sm:$0xff]  }
 0x61e   :  { %v6591_v14 = vpop.f32.mrf.mxu1 }
 0x61f   :  { %v3923_v5 = vadd.f32 %v6591_v14, %v9164_v1  ;;  %6664 = vmatprep.mubr.bf16.mxu0 %v4172_v55  ;;  %v4118_v12 = vmax.f32 %v3912_v58, 0.0  ;;  %6725 = vmatpush3.bf16.msra.mxu1 %v7012_v16  ;;  %v7014_v58 = vld [vmem:[%s9497_s2 + $0x1c8] sm:$0xff]  }
 0x620   :  { %v3914_v60 = vpop.f32.mrf.mxu1  ;;  %6665 = vmatmul.mubr.bf16.gmra.mxu0 %v4173_v38  ;;  %6726 = vmatprep.subr.bf16.mxu1 %v7013_v17 }
 0x621   :  { %v3915_v59 = vadd.f32 %v3914_v60, %v9164_v1  ;;  %v4121_v51 = vmax.f32 %v3923_v5, 0.0 }
 0x622   :  { %v6594_v13 = vpop.f32.mrf.mxu1 }
 0x623   :  { %v4119_v20 = vmax.f32 %v3915_v59, 0.0  ;;  %v4175_v21 = vpack.c.bf16 %v4121_v51, %v4120_v19  ;;  %v3936_v62 = vadd.f32 %v6594_v13, %v9164_v1  ;;  %6727 = vmatpush3.bf16.msra.mxu1 %v7013_v17 }
 0x624   :  { %v3927_v11 = vpop.f32.mrf.mxu1  ;;  %6728 = vmatprep.subr.bf16.mxu1 %v7014_v58 }
 0x625   :  { %v4174_v57 = vpack.c.bf16 %v4119_v20, %v4118_v12  ;;  %v3928_v32 = vadd.f32 %v3927_v11, %v9164_v1  ;;  %v4124_v50 = vmax.f32 %v3936_v62, 0.0 }
 0x626   :  { %v6595_v10 = vpop.f32.mrf.mxu1 }
 0x627   :  { %v3939_v6 = vadd.f32 %v6595_v10, %v9164_v1  ;;  %6668 = vmatprep.mubr.bf16.mxu0 %v4174_v57  ;;  %v4122_v3 = vmax.f32 %v3928_v32, 0.0  ;;  %6729 = vmatpush3.bf16.msra.mxu1 %v7014_v58 }
 0x628   :  { %v3930_v33 = vpop.f32.mrf.mxu1  ;;  %6669 = vmatmul.mubr.bf16.gmra.mxu0 %v4175_v21  ;;  %6730 = vmatprep.subr.bf16.mxu1 %v7015_v56 }
 0x629   :  { %v3931_v41 = vadd.f32 %v3930_v33, %v9164_v1  ;;  %v4125_v43 = vmax.f32 %v3939_v6, 0.0 }
 0x62b   :  { %v4123_v48 = vmax.f32 %v3931_v41, 0.0  ;;  %v4177_v54 = vpack.c.bf16 %v4125_v43, %v4124_v50  ;;  %6731 = vmatpush3.bf16.msra.mxu1 %v7015_v56 }
 0x62d   :  { %v4176_v28 = vpack.c.bf16 %v4123_v48, %v4122_v3 }
 0x62f   :  { %6672 = vmatprep.mubr.bf16.mxu0 %v4176_v28 }
 0x630   :  { %v6598_v30 = vpop.f32.mrf.mxu1  ;;  %6673 = vmatmul.mubr.bf16.gmra.mxu0 %v4177_v54 }
 0x631   :  { %v3952_v44 = vadd.f32 %v6598_v30, %v9164_v1 }
 0x632   :  { %v3943_v0 = vpop.f32.mrf.mxu1 }
 0x633   :  { %v3944_v63 = vadd.f32 %v3943_v0, %v9164_v1  ;;  %v4128_v2 = vmax.f32 %v3952_v44, 0.0 }
 0x634   :  { %v6599_v36 = vpop.f32.mrf.mxu1 }
 0x635   :  { %v3955_v25 = vadd.f32 %v6599_v36, %v9164_v1  ;;  %v4126_v26 = vmax.f32 %v3944_v63, 0.0 }
 0x636   :  { %v3946_v18 = vpop.f32.mrf.mxu1 }
 0x637   :  { %v3947_v61 = vadd.f32 %v3946_v18, %v9164_v1  ;;  %v4129_v46 = vmax.f32 %v3955_v25, 0.0 }
 0x639   :  { %v4127_v15 = vmax.f32 %v3947_v61, 0.0  ;;  %v4179_v4 = vpack.c.bf16 %v4129_v46, %v4128_v2 }
 0x63b   :  { %v4178_v29 = vpack.c.bf16 %v4127_v15, %v4126_v26 }
 0x63d   :  { %6676 = vmatprep.mubr.bf16.mxu0 %v4178_v29 }
 0x63e   :  { %6677 = vmatmul.mubr.bf16.gmra.mxu0 %v4179_v4 }
 0x640   :  { %v6602_v39 = vpop.f32.mrf.mxu1 }
 0x641   :  { %v3968_v9 = vadd.f32 %v6602_v39, %v9164_v1 }
 0x642   :  { %v3959_v31 = vpop.f32.mrf.mxu1 }
 0x643   :  { %v3960_v40 = vadd.f32 %v3959_v31, %v9164_v1  ;;  %v4132_v55 = vmax.f32 %v3968_v9, 0.0 }
 0x644   :  { %v6603_v42 = vpop.f32.mrf.mxu1 }
 0x645   :  { %v3971_v34 = vadd.f32 %v6603_v42, %v9164_v1  ;;  %v4130_v47 = vmax.f32 %v3960_v40, 0.0 }
 0x646   :  { %v3962_v22 = vpop.f32.mrf.mxu1 }
 0x647   :  { %v3963_v24 = vadd.f32 %v3962_v22, %v9164_v1  ;;  %v4133_v49 = vmax.f32 %v3971_v34, 0.0 }
 0x649   :  { %v4131_v23 = vmax.f32 %v3963_v24, 0.0  ;;  %v4181_v14 = vpack.c.bf16 %v4133_v49, %v4132_v55 }
 0x64b   :  { %v4180_v38 = vpack.c.bf16 %v4131_v23, %v4130_v47 }
 0x64d   :  { %6680 = vmatprep.mubr.bf16.mxu0 %v4180_v38 }
 0x64e   :  { %6681 = vmatmul.mubr.bf16.gmra.mxu0 %v4181_v14 }
 0x650   :  { %v6606_v5 = vpop.f32.mrf.mxu1 }
 0x651   :  { %v3984_v12 = vadd.f32 %v6606_v5, %v9164_v1 }
 0x652   :  { %v3975_v60 = vpop.f32.mrf.mxu1 }
 0x653   :  { %v3976_v51 = vadd.f32 %v3975_v60, %v9164_v1  ;;  %v4136_v21 = vmax.f32 %v3984_v12, 0.0 }
 0x654   :  { %v6607_v59 = vpop.f32.mrf.mxu1 }
 0x655   :  { %v3987_v13 = vadd.f32 %v6607_v59, %v9164_v1  ;;  %v4134_v57 = vmax.f32 %v3976_v51, 0.0 }
 0x656   :  { %v3978_v20 = vpop.f32.mrf.mxu1 }
 0x657   :  { %v3979_v19 = vadd.f32 %v3978_v20, %v9164_v1  ;;  %v4137_v11 = vmax.f32 %v3987_v13, 0.0 }
 0x659   :  { %v4135_v35 = vmax.f32 %v3979_v19, 0.0  ;;  %v4183_v32 = vpack.c.bf16 %v4137_v11, %v4136_v21 }
 0x65b   :  { %v4182_v10 = vpack.c.bf16 %v4135_v35, %v4134_v57 }
 0x65d   :  { %6684 = vmatprep.mubr.bf16.mxu0 %v4182_v10 }
 0x65e   :  { %6685 = vmatmul.mubr.bf16.gmra.mxu0 %v4183_v32 }
 0x660   :  { %v6610_v6 = vpop.f32.mrf.mxu1 }
 0x661   :  { %v4000_v3 = vadd.f32 %v6610_v6, %v9164_v1 }
 0x662   :  { %v3991_v62 = vpop.f32.mrf.mxu1 }
 0x663   :  { %v3992_v41 = vadd.f32 %v3991_v62, %v9164_v1  ;;  %v4140_v0 = vmax.f32 %v4000_v3, 0.0 }
 0x664   :  { %v6611_v33 = vpop.f32.mrf.mxu1 }
 0x665   :  { %v4003_v43 = vadd.f32 %v6611_v33, %v9164_v1  ;;  %v4138_v54 = vmax.f32 %v3992_v41, 0.0 }
 0x666   :  { %v3994_v48 = vpop.f32.mrf.mxu1 }
 0x667   :  { %v3995_v50 = vadd.f32 %v3994_v48, %v9164_v1  ;;  %v4141_v28 = vmax.f32 %v4003_v43, 0.0 }
 0x669   :  { %v4139_v30 = vmax.f32 %v3995_v50, 0.0  ;;  %v4185_v63 = vpack.c.bf16 %v4141_v28, %v4140_v0 }
 0x66b   :  { %v4184_v36 = vpack.c.bf16 %v4139_v30, %v4138_v54 }
 0x66d   :  { %6688 = vmatprep.mubr.bf16.mxu0 %v4184_v36 }
 0x66e   :  { %6689 = vmatmul.mubr.bf16.gmra.mxu0 %v4185_v63 }
 0x670   :  { %v6614_v25 = vpop.f32.mrf.mxu1 }
 0x671   :  { %v4016_v46 = vadd.f32 %v6614_v25, %v9164_v1 }
 0x672   :  { %v4007_v45 = vpop.f32.mrf.mxu1 }
 0x673   :  { %v4008_v18 = vadd.f32 %v4007_v45, %v9164_v1  ;;  %v4144_v27 = vmax.f32 %v4016_v46, 0.0 }
 0x674   :  { %v6615_v44 = vpop.f32.mrf.mxu1 }
 0x675   :  { %v4019_v61 = vadd.f32 %v6615_v44, %v9164_v1  ;;  %v4142_v29 = vmax.f32 %v4008_v18, 0.0 }
 0x676   :  { %v4010_v26 = vpop.f32.mrf.mxu1 }
 0x677   :  { %v4011_v15 = vadd.f32 %v4010_v26, %v9164_v1  ;;  %v4145_v2 = vmax.f32 %v4019_v61, 0.0 }
 0x679   :  { %v4143_v4 = vmax.f32 %v4011_v15, 0.0  ;;  %v4187_v8 = vpack.c.bf16 %v4145_v2, %v4144_v27 }
 0x67b   :  { %v4186_v39 = vpack.c.bf16 %v4143_v4, %v4142_v29 }
 0x67d   :  { %6692 = vmatprep.mubr.bf16.mxu0 %v4186_v39 }
 0x67e   :  { %6693 = vmatmul.mubr.bf16.gmra.mxu0 %v4187_v8 }
 0x680   :  { %v6618_v31 = vpop.f32.mrf.mxu1 }
 0x681   :  { %v4032_v9 = vadd.f32 %v6618_v31, %v9164_v1 }
 0x682   :  { %v4023_v42 = vpop.f32.mrf.mxu1 }
 0x683   :  { %v4024_v40 = vadd.f32 %v4023_v42, %v9164_v1  ;;  %v4148_v23 = vmax.f32 %v4032_v9, 0.0  ;;  %v9257_v9 = vld [vmem:[%s9499_s4 + $0x8] sm:$0x7] }
 0x684   :  { %v6619_v16 = vpop.f32.mrf.mxu1 }
 0x685   :  { %v4035_v34 = vadd.f32 %v6619_v16, %v9164_v1  ;;  %v4146_v17 = vmax.f32 %v4024_v40, 0.0 }
 0x686   :  { %v4026_v22 = vpop.f32.mrf.mxu1 }
 0x687   :  { %v4027_v24 = vadd.f32 %v4026_v22, %v9164_v1  ;;  %v4149_v49 = vmax.f32 %v4035_v34, 0.0 }
 0x689   :  { %v4147_v47 = vmax.f32 %v4027_v24, 0.0  ;;  %v4189_v38 = vpack.c.bf16 %v4149_v49, %v4148_v23  ;;  %v9262_v23 = vrot.slane %v9257_v9, %v108_v53 }
 0x68b   :  { %v4188_v55 = vpack.c.bf16 %v4147_v47, %v4146_v17 }
 0x68d   :  { %6696 = vmatprep.mubr.bf16.mxu0 %v4188_v55 }
 0x68e   :  { %6697 = vmatmul.mubr.bf16.gmra.mxu0 %v4189_v38 }
 0x690   :  { %v6622_v14 = vpop.f32.mrf.mxu1 }
 0x691   :  { %v4048_v59 = vadd.f32 %v6622_v14, %v9164_v1 }
 0x692   :  { %v4039_v58 = vpop.f32.mrf.mxu1 }
 0x693   :  { %v4040_v56 = vadd.f32 %v4039_v58, %v9164_v1  ;;  %v4152_v11 = vmax.f32 %v4048_v59, 0.0 }
 0x694   :  { %v6623_v5 = vpop.f32.mrf.mxu1 }
 0x695   :  { %v4051_v60 = vadd.f32 %v6623_v5, %v9164_v1  ;;  %v4150_v20 = vmax.f32 %v4040_v56, 0.0 }
 0x696   :  { %v4042_v51 = vpop.f32.mrf.mxu1 }
 0x697   :  { %v4043_v13 = vadd.f32 %v4042_v51, %v9164_v1  ;;  %v4153_v12 = vmax.f32 %v4051_v60, 0.0 }
 0x699   :  { %v4151_v19 = vmax.f32 %v4043_v13, 0.0  ;;  %v4191_v35 = vpack.c.bf16 %v4153_v12, %v4152_v11 }
 0x69b   :  { %v4190_v57 = vpack.c.bf16 %v4151_v19, %v4150_v20 }
 0x69d   :  { %6700 = vmatprep.mubr.bf16.mxu0 %v4190_v57 }
 0x69e   :  { %6701 = vmatmul.mubr.bf16.gmra.mxu0 %v4191_v35 }
 0x6a0   :  { %v6626_v21 = vpop.f32.mrf.mxu1 }
 0x6a1   :  { %v4064_v33 = vadd.f32 %v6626_v21, %v9164_v1 }
 0x6a2   :  { %v4055_v10 = vpop.f32.mrf.mxu1 }
 0x6a3   :  { %v4056_v6 = vadd.f32 %v4055_v10, %v9164_v1  ;;  %v4156_v28 = vmax.f32 %v4064_v33, 0.0 }
 0x6a4   :  { %v6627_v32 = vpop.f32.mrf.mxu1 }
 0x6a5   :  { %v4067_v62 = vadd.f32 %v6627_v32, %v9164_v1  ;;  %v4154_v48 = vmax.f32 %v4056_v6, 0.0 }
 0x6a6   :  { %v4058_v41 = vpop.f32.mrf.mxu1 }
 0x6a7   :  { %v4059_v43 = vadd.f32 %v4058_v41, %v9164_v1  ;;  %v4157_v3 = vmax.f32 %v4067_v62, 0.0 }
 0x6a9   :  { %v4155_v50 = vmax.f32 %v4059_v43, 0.0  ;;  %v4193_v30 = vpack.c.bf16 %v4157_v3, %v4156_v28 }
 0x6ab   :  { %v4192_v54 = vpack.c.bf16 %v4155_v50, %v4154_v48 }
 0x6ad   :  { %6704 = vmatprep.mubr.bf16.mxu0 %v4192_v54 }
 0x6ae   :  { %6705 = vmatmul.mubr.bf16.gmra.mxu0 %v4193_v30 }
 0x6b0   :  { %v6630_v0 = vpop.f32.mrf.mxu1 }
 0x6b1   :  { %v4080_v44 = vadd.f32 %v6630_v0, %v9164_v1 }
 0x6b2   :  { %v4071_v36 = vpop.f32.mrf.mxu1 }
 0x6b3   :  { %v4072_v25 = vadd.f32 %v4071_v36, %v9164_v1  ;;  %v4160_v2 = vmax.f32 %v4080_v44, 0.0 }
 0x6b4   :  { %v6631_v63 = vpop.f32.mrf.mxu1 }
 0x6b5   :  { %v4083_v45 = vadd.f32 %v6631_v63, %v9164_v1  ;;  %v4158_v26 = vmax.f32 %v4072_v25, 0.0 }
 0x6b6   :  { %v4074_v18 = vpop.f32.mrf.mxu1 }
 0x6b7   :  { %v4075_v61 = vadd.f32 %v4074_v18, %v9164_v1  ;;  %v4161_v46 = vmax.f32 %v4083_v45, 0.0 }
 0x6b9   :  { %v4159_v15 = vmax.f32 %v4075_v61, 0.0  ;;  %v4195_v4 = vpack.c.bf16 %v4161_v46, %v4160_v2 }
 0x6bb   :  { %v4194_v29 = vpack.c.bf16 %v4159_v15, %v4158_v26 }
 0x6bd   :  { %6708 = vmatprep.mubr.bf16.mxu0 %v4194_v29 }
 0x6be   :  { %6709 = vmatmul.mubr.bf16.gmra.mxu0 %v4195_v4 }
 0x6c0   :  { %v6634_v27 = vpop.f32.mrf.mxu1 }
 0x6c1   :  { %v4096_v16 = vadd.f32 %v6634_v27, %v9164_v1 }
 0x6c2   :  { %v4087_v39 = vpop.f32.mrf.mxu1 }
 0x6c3   :  { %v4088_v31 = vadd.f32 %v4087_v39, %v9164_v1  ;;  %v4164_v47 = vmax.f32 %v4096_v16, 0.0 }
 0x6c4   :  { %v6635_v8 = vpop.f32.mrf.mxu1 }
 0x6c5   :  { %v4099_v42 = vadd.f32 %v6635_v8, %v9164_v1  ;;  %v4162_v49 = vmax.f32 %v4088_v31, 0.0 }
 0x6c6   :  { %v4090_v40 = vpop.f32.mrf.mxu1 }
 0x6c7   :  { %v4091_v34 = vadd.f32 %v4090_v40, %v9164_v1  ;;  %v4165_v22 = vmax.f32 %v4099_v42, 0.0 }
 0x6c8   :  { %v6654_v24 = vpop.f32.mrf.mxu0 }
 0x6c9   :  { %v4163_v17 = vmax.f32 %v4091_v34, 0.0  ;;  %v4197_v14 = vpack.c.bf16 %v4165_v22, %v4164_v47  ;;  %v4310_v56 = vadd.f32 %v6654_v24, %v9262_v23 }
 0x6ca   :  { %v4301_v55 = vpop.f32.mrf.mxu0 }
 0x6cb   :  { %v4196_v38 = vpack.c.bf16 %v4163_v17, %v4162_v49  ;;  %v4302_v1 = vadd.f32 %v4301_v55, %v9262_v23  ;;  %v4558_v20 = vmax.f32 %v4310_v56, 0.0 }
 0x6cc   :  { %v6655_v58 = vpop.f32.mrf.mxu0 }
 0x6cd   :  { %v4313_v5 = vadd.f32 %v6655_v58, %v9262_v23  ;;  %6712 = vmatprep.mubr.bf16.mxu0 %v4196_v38  ;;  %v4556_v12 = vmax.f32 %v4302_v1, 0.0 }
 0x6ce   :  { %v4304_v60 = vpop.f32.mrf.mxu0  ;;  %6713 = vmatmul.mubr.bf16.gmra.mxu0 %v4197_v14 }
 0x6cf   :  { %v4305_v59 = vadd.f32 %v4304_v60, %v9262_v23  ;;  %v4559_v51 = vmax.f32 %v4313_v5, 0.0 }
 0x6d0   :  { %v6658_v13 = vpop.f32.mrf.mxu0 }
 0x6d1   :  { %v4557_v53 = vmax.f32 %v4305_v59, 0.0  ;;  %v4621_v57 = vpack.c.bf16 %v4559_v51, %v4558_v20  ;;  %v4326_v32 = vadd.f32 %v6658_v13, %v9262_v23  ;;  %v7016_v20 = vld [vmem:[%s9497_s2 + $0x238] sm:$0xff]  }
 0x6d2   :  { %v4317_v19 = vpop.f32.mrf.mxu0  ;;  %6796 = vmatprep.subr.bf16.mxu0 %v7016_v20 }
 0x6d3   :  { %v4620_v11 = vpack.c.bf16 %v4557_v53, %v4556_v12  ;;  %v4318_v21 = vadd.f32 %v4317_v19, %v9262_v23  ;;  %v4562_v48 = vmax.f32 %v4326_v32, 0.0  ;;  %6797 = vmatpush3.bf16.msra.mxu0 %v7016_v20 }
 0x6d4   :  { %v6659_v35 = vpop.f32.mrf.mxu0 }
 0x6d5   :  { %v4329_v10 = vadd.f32 %v6659_v35, %v9262_v23  ;;  %6732 = vmatprep.mubr.bf16.mxu1 %v4620_v11  ;;  %v4560_v43 = vmax.f32 %v4318_v21, 0.0 }
 0x6d6   :  { %v4320_v6 = vpop.f32.mrf.mxu0  ;;  %6733 = vmatmul.mubr.bf16.vlgmr.msra.gmra.mxu1 %v4621_v57 }
 0x6d7   :  { %v4321_v62 = vadd.f32 %v4320_v6, %v9262_v23  ;;  %v4563_v33 = vmax.f32 %v4329_v10, 0.0 }
 0x6d8   :  { %v6662_v41 = vpop.f32.mrf.mxu0 }
 0x6d9   :  { %v4561_v3 = vmax.f32 %v4321_v62, 0.0  ;;  %v4623_v54 = vpack.c.bf16 %v4563_v33, %v4562_v48  ;;  %v4342_v63 = vadd.f32 %v6662_v41, %v9262_v23 }
 0x6da   :  { %v4333_v50 = vpop.f32.mrf.mxu0 }
 0x6db   :  { %v4622_v28 = vpack.c.bf16 %v4561_v3, %v4560_v43  ;;  %v4334_v0 = vadd.f32 %v4333_v50, %v9262_v23  ;;  %v4566_v26 = vmax.f32 %v4342_v63, 0.0 }
 0x6dc   :  { %v6663_v30 = vpop.f32.mrf.mxu0 }
 0x6dd   :  { %v4345_v36 = vadd.f32 %v6663_v30, %v9262_v23  ;;  %6736 = vmatprep.mubr.bf16.mxu1 %v4622_v28  ;;  %v4564_v61 = vmax.f32 %v4334_v0, 0.0  ;;  %v7017_v0 = vld [vmem:[%s9497_s2 + $0x230] sm:$0xff]  }
 0x6de   :  { %v4336_v25 = vpop.f32.mrf.mxu0  ;;  %6737 = vmatmul.mubr.bf16.gmra.mxu1 %v4623_v54  ;;  %6798 = vmatprep.subr.bf16.mxu0 %v7017_v0 }
 0x6df   :  { %v4337_v45 = vadd.f32 %v4336_v25, %v9262_v23  ;;  %v4567_v44 = vmax.f32 %v4345_v36, 0.0  ;;  %6799 = vmatpush3.bf16.msra.mxu0 %v7017_v0 }
 0x6e0   :  { %v6666_v18 = vpop.f32.mrf.mxu0 }
 0x6e1   :  { %v4565_v46 = vmax.f32 %v4337_v45, 0.0  ;;  %v4625_v29 = vpack.c.bf16 %v4567_v44, %v4566_v26  ;;  %v4358_v8 = vadd.f32 %v6666_v18, %v9262_v23 }
 0x6e2   :  { %v4349_v15 = vpop.f32.mrf.mxu0 }
 0x6e3   :  { %v4624_v2 = vpack.c.bf16 %v4565_v46, %v4564_v61  ;;  %v4350_v27 = vadd.f32 %v4349_v15, %v9262_v23  ;;  %v4570_v24 = vmax.f32 %v4358_v8, 0.0  ;;  %v7018_v15 = vld [vmem:[%s9497_s2 + $0x228] sm:$0xff]  }
 0x6e4   :  { %v6667_v4 = vpop.f32.mrf.mxu0  ;;  %6800 = vmatprep.subr.bf16.mxu0 %v7018_v15 }
 0x6e5   :  { %v4361_v39 = vadd.f32 %v6667_v4, %v9262_v23  ;;  %6740 = vmatprep.mubr.bf16.mxu1 %v4624_v2  ;;  %v4568_v34 = vmax.f32 %v4350_v27, 0.0  ;;  %6801 = vmatpush3.bf16.msra.mxu0 %v7018_v15 }
 0x6e6   :  { %v4352_v31 = vpop.f32.mrf.mxu0  ;;  %6741 = vmatmul.mubr.bf16.gmra.mxu1 %v4625_v29  ;;  %v7019_v29 = vld [vmem:[%s9497_s2 + $0x220] sm:$0xff]  }
 0x6e7   :  { %v4353_v42 = vadd.f32 %v4352_v31, %v9262_v23  ;;  %v4571_v16 = vmax.f32 %v4361_v39, 0.0  ;;  %6802 = vmatprep.subr.bf16.mxu0 %v7019_v29  ;;  %v7020_v39 = vld [vmem:[%s9497_s2 + $0x218] sm:$0xff]  }
 0x6e8   :  { %v6670_v40 = vpop.f32.mrf.mxu0 }
 0x6e9   :  { %v4569_v22 = vmax.f32 %v4353_v42, 0.0  ;;  %v4627_v47 = vpack.c.bf16 %v4571_v16, %v4570_v24  ;;  %v4374_v58 = vadd.f32 %v6670_v40, %v9262_v23  ;;  %6803 = vmatpush3.bf16.msra.mxu0 %v7019_v29 }
 0x6ea   :  { %v4365_v49 = vpop.f32.mrf.mxu0  ;;  %6804 = vmatprep.subr.bf16.mxu0 %v7020_v39 }
 0x6eb   :  { %v4626_v17 = vpack.c.bf16 %v4569_v22, %v4568_v34  ;;  %v4366_v38 = vadd.f32 %v4365_v49, %v9262_v23  ;;  %v4574_v13 = vmax.f32 %v4374_v58, 0.0  ;;  %v7021_v22 = vld [vmem:[%s9497_s2 + $0x210] sm:$0xff]   ;;  %v7023_v58 = vld [vmem:[%s9497_s2 + $0x200] sm:$0xff]  }
 0x6ec   :  { %v6671_v55 = vpop.f32.mrf.mxu0 }
 0x6ed   :  { %v4377_v14 = vadd.f32 %v6671_v55, %v9262_v23  ;;  %6744 = vmatprep.mubr.bf16.mxu1 %v4626_v17  ;;  %v4572_v59 = vmax.f32 %v4366_v38, 0.0  ;;  %6805 = vmatpush3.bf16.msra.mxu0 %v7020_v39  ;;  %v7022_v38 = vld [vmem:[%s9497_s2 + $0x208] sm:$0xff]  }
 0x6ee   :  { %v4368_v1 = vpop.f32.mrf.mxu0  ;;  %6745 = vmatmul.mubr.bf16.gmra.mxu1 %v4627_v47  ;;  %6806 = vmatprep.subr.bf16.mxu0 %v7021_v22 }
 0x6ef   :  { %v4369_v5 = vadd.f32 %v4368_v1, %v9262_v23  ;;  %v4575_v56 = vmax.f32 %v4377_v14, 0.0 }
 0x6f0   :  { %v6674_v60 = vpop.f32.mrf.mxu0 }
 0x6f1   :  { %v4573_v51 = vmax.f32 %v4369_v5, 0.0  ;;  %v4629_v19 = vpack.c.bf16 %v4575_v56, %v4574_v13  ;;  %v4390_v21 = vadd.f32 %v6674_v60, %v9262_v23  ;;  %6807 = vmatpush3.bf16.msra.mxu0 %v7021_v22 }
 0x6f2   :  { %v4381_v12 = vpop.f32.mrf.mxu0  ;;  %6808 = vmatprep.subr.bf16.mxu0 %v7022_v38 }
 0x6f3   :  { %v4628_v53 = vpack.c.bf16 %v4573_v51, %v4572_v59  ;;  %v4382_v57 = vadd.f32 %v4381_v12, %v9262_v23  ;;  %v4578_v41 = vmax.f32 %v4390_v21, 0.0 }
 0x6f4   :  { %v6675_v11 = vpop.f32.mrf.mxu0 }
 0x6f5   :  { %v4393_v35 = vadd.f32 %v6675_v11, %v9262_v23  ;;  %6748 = vmatprep.mubr.bf16.mxu1 %v4628_v53  ;;  %v4576_v62 = vmax.f32 %v4382_v57, 0.0  ;;  %6809 = vmatpush3.bf16.msra.mxu0 %v7022_v38 }
 0x6f6   :  { %v4384_v10 = vpop.f32.mrf.mxu0  ;;  %6749 = vmatmul.mubr.bf16.gmra.mxu1 %v4629_v19  ;;  %6810 = vmatprep.subr.bf16.mxu0 %v7023_v58 }
 0x6f7   :  { %v4385_v32 = vadd.f32 %v4384_v10, %v9262_v23  ;;  %v4579_v6 = vmax.f32 %v4393_v35, 0.0 }
 0x6f9   :  { %v4577_v33 = vmax.f32 %v4385_v32, 0.0  ;;  %v4631_v3 = vpack.c.bf16 %v4579_v6, %v4578_v41  ;;  %6811 = vmatpush3.bf16.msra.mxu0 %v7023_v58 }
 0x6fb   :  { %v4630_v43 = vpack.c.bf16 %v4577_v33, %v4576_v62 }
 0x6fd   :  { %6752 = vmatprep.mubr.bf16.mxu1 %v4630_v43 }
 0x6fe   :  { %v6678_v48 = vpop.f32.mrf.mxu0  ;;  %6753 = vmatmul.mubr.bf16.gmra.mxu1 %v4631_v3 }
 0x6ff   :  { %v4406_v36 = vadd.f32 %v6678_v48, %v9262_v23 }
 0x700   :  { %v4397_v50 = vpop.f32.mrf.mxu0 }
 0x701   :  { %v4398_v54 = vadd.f32 %v4397_v50, %v9262_v23  ;;  %v4582_v61 = vmax.f32 %v4406_v36, 0.0 }
 0x702   :  { %v6679_v28 = vpop.f32.mrf.mxu0 }
 0x703   :  { %v4409_v30 = vadd.f32 %v6679_v28, %v9262_v23  ;;  %v4580_v44 = vmax.f32 %v4398_v54, 0.0 }
 0x704   :  { %v4400_v63 = vpop.f32.mrf.mxu0 }
 0x705   :  { %v4401_v25 = vadd.f32 %v4400_v63, %v9262_v23  ;;  %v4583_v45 = vmax.f32 %v4409_v30, 0.0 }
 0x707   :  { %v4581_v18 = vmax.f32 %v4401_v25, 0.0  ;;  %v4633_v26 = vpack.c.bf16 %v4583_v45, %v4582_v61 }
 0x709   :  { %v4632_v46 = vpack.c.bf16 %v4581_v18, %v4580_v44 }
 0x70b   :  { %6756 = vmatprep.mubr.bf16.mxu1 %v4632_v46 }
 0x70c   :  { %6757 = vmatmul.mubr.bf16.gmra.mxu1 %v4633_v26 }
 0x70e   :  { %v6682_v2 = vpop.f32.mrf.mxu0 }
 0x70f   :  { %v4422_v42 = vadd.f32 %v6682_v2, %v9262_v23 }
 0x710   :  { %v4413_v4 = vpop.f32.mrf.mxu0 }
 0x711   :  { %v4414_v8 = vadd.f32 %v4413_v4, %v9262_v23  ;;  %v4586_v17 = vmax.f32 %v4422_v42, 0.0 }
 0x712   :  { %v6683_v27 = vpop.f32.mrf.mxu0 }
 0x713   :  { %v4425_v31 = vadd.f32 %v6683_v27, %v9262_v23  ;;  %v4584_v24 = vmax.f32 %v4414_v8, 0.0 }
 0x714   :  { %v4416_v16 = vpop.f32.mrf.mxu0 }
 0x715   :  { %v4417_v40 = vadd.f32 %v4416_v16, %v9262_v23  ;;  %v4587_v34 = vmax.f32 %v4425_v31, 0.0 }
 0x717   :  { %v4585_v49 = vmax.f32 %v4417_v40, 0.0  ;;  %v4635_v55 = vpack.c.bf16 %v4587_v34, %v4586_v17 }
 0x719   :  { %v4634_v47 = vpack.c.bf16 %v4585_v49, %v4584_v24 }
 0x71b   :  { %6760 = vmatprep.mubr.bf16.mxu1 %v4634_v47 }
 0x71c   :  { %6761 = vmatmul.mubr.bf16.gmra.mxu1 %v4635_v55 }
 0x71e   :  { %v6686_v14 = vpop.f32.mrf.mxu0 }
 0x71f   :  { %v4438_v59 = vadd.f32 %v6686_v14, %v9262_v23 }
 0x720   :  { %v4429_v1 = vpop.f32.mrf.mxu0 }
 0x721   :  { %v4430_v56 = vadd.f32 %v4429_v1, %v9262_v23  ;;  %v4590_v19 = vmax.f32 %v4438_v59, 0.0 }
 0x722   :  { %v6687_v5 = vpop.f32.mrf.mxu0 }
 0x723   :  { %v4441_v60 = vadd.f32 %v6687_v5, %v9262_v23  ;;  %v4588_v53 = vmax.f32 %v4430_v56, 0.0 }
 0x724   :  { %v4432_v51 = vpop.f32.mrf.mxu0 }
 0x725   :  { %v4433_v13 = vadd.f32 %v4432_v51, %v9262_v23  ;;  %v4591_v12 = vmax.f32 %v4441_v60, 0.0 }
 0x727   :  { %v4589_v20 = vmax.f32 %v4433_v13, 0.0  ;;  %v4637_v57 = vpack.c.bf16 %v4591_v12, %v4590_v19 }
 0x729   :  { %v4636_v11 = vpack.c.bf16 %v4589_v20, %v4588_v53 }
 0x72b   :  { %6764 = vmatprep.mubr.bf16.mxu1 %v4636_v11 }
 0x72c   :  { %6765 = vmatmul.mubr.bf16.gmra.mxu1 %v4637_v57 }
 0x72e   :  { %v6690_v35 = vpop.f32.mrf.mxu0 }
 0x72f   :  { %v4454_v62 = vadd.f32 %v6690_v35, %v9262_v23 }
 0x730   :  { %v4445_v21 = vpop.f32.mrf.mxu0 }
 0x731   :  { %v4446_v32 = vadd.f32 %v4445_v21, %v9262_v23  ;;  %v4594_v50 = vmax.f32 %v4454_v62, 0.0 }
 0x732   :  { %v6691_v10 = vpop.f32.mrf.mxu0 }
 0x733   :  { %v4457_v6 = vadd.f32 %v6691_v10, %v9262_v23  ;;  %v4592_v3 = vmax.f32 %v4446_v32, 0.0 }
 0x734   :  { %v4448_v33 = vpop.f32.mrf.mxu0 }
 0x735   :  { %v4449_v41 = vadd.f32 %v4448_v33, %v9262_v23  ;;  %v4595_v43 = vmax.f32 %v4457_v6, 0.0 }
 0x737   :  { %v4593_v48 = vmax.f32 %v4449_v41, 0.0  ;;  %v4639_v54 = vpack.c.bf16 %v4595_v43, %v4594_v50 }
 0x739   :  { %v4638_v28 = vpack.c.bf16 %v4593_v48, %v4592_v3 }
 0x73b   :  { %6768 = vmatprep.mubr.bf16.mxu1 %v4638_v28 }
 0x73c   :  { %6769 = vmatmul.mubr.bf16.gmra.mxu1 %v4639_v54 }
 0x73e   :  { %v6694_v30 = vpop.f32.mrf.mxu0 }
 0x73f   :  { %v4470_v45 = vadd.f32 %v6694_v30, %v9262_v23 }
 0x740   :  { %v4461_v0 = vpop.f32.mrf.mxu0 }
 0x741   :  { %v4462_v63 = vadd.f32 %v4461_v0, %v9262_v23  ;;  %v4598_v15 = vmax.f32 %v4470_v45, 0.0 }
 0x742   :  { %v6695_v36 = vpop.f32.mrf.mxu0 }
 0x743   :  { %v4473_v25 = vadd.f32 %v6695_v36, %v9262_v23  ;;  %v4596_v46 = vmax.f32 %v4462_v63, 0.0 }
 0x744   :  { %v4464_v44 = vpop.f32.mrf.mxu0 }
 0x745   :  { %v4465_v18 = vadd.f32 %v4464_v44, %v9262_v23  ;;  %v4599_v61 = vmax.f32 %v4473_v25, 0.0 }
 0x747   :  { %v4597_v26 = vmax.f32 %v4465_v18, 0.0  ;;  %v4641_v29 = vpack.c.bf16 %v4599_v61, %v4598_v15 }
 0x749   :  { %v4640_v2 = vpack.c.bf16 %v4597_v26, %v4596_v46 }
 0x74b   :  { %6772 = vmatprep.mubr.bf16.mxu1 %v4640_v2 }
 0x74c   :  { %6773 = vmatmul.mubr.bf16.gmra.mxu1 %v4641_v29 }
 0x74e   :  { %v6698_v4 = vpop.f32.mrf.mxu0 }
 0x74f   :  { %v4486_v42 = vadd.f32 %v6698_v4, %v9262_v23 }
 0x750   :  { %v4477_v27 = vpop.f32.mrf.mxu0 }
 0x751   :  { %v4478_v8 = vadd.f32 %v4477_v27, %v9262_v23  ;;  %v4602_v49 = vmax.f32 %v4486_v42, 0.0 }
 0x752   :  { %v6699_v39 = vpop.f32.mrf.mxu0 }
 0x753   :  { %v4489_v31 = vadd.f32 %v6699_v39, %v9262_v23  ;;  %v4600_v22 = vmax.f32 %v4478_v8, 0.0 }
 0x754   :  { %v4480_v16 = vpop.f32.mrf.mxu0 }
 0x755   :  { %v4481_v40 = vadd.f32 %v4480_v16, %v9262_v23  ;;  %v4603_v34 = vmax.f32 %v4489_v31, 0.0 }
 0x757   :  { %v4601_v24 = vmax.f32 %v4481_v40, 0.0  ;;  %v4643_v47 = vpack.c.bf16 %v4603_v34, %v4602_v49 }
 0x759   :  { %v4642_v17 = vpack.c.bf16 %v4601_v24, %v4600_v22  ;;  %v9355_v24 = vrot.slane %v9257_v9, %v754_v37 }
 0x75b   :  { %6776 = vmatprep.mubr.bf16.mxu1 %v4642_v17 }
 0x75c   :  { %6777 = vmatmul.mubr.bf16.gmra.mxu1 %v4643_v47 }
 0x75e   :  { %v6702_v55 = vpop.f32.mrf.mxu0 }
 0x75f   :  { %v4502_v5 = vadd.f32 %v6702_v55, %v9262_v23 }
 0x760   :  { %v4493_v38 = vpop.f32.mrf.mxu0 }
 0x761   :  { %v4494_v58 = vadd.f32 %v4493_v38, %v9262_v23  ;;  %v4606_v12 = vmax.f32 %v4502_v5, 0.0 }
 0x762   :  { %v6703_v14 = vpop.f32.mrf.mxu0 }
 0x763   :  { %v4505_v1 = vadd.f32 %v6703_v14, %v9262_v23  ;;  %v4604_v51 = vmax.f32 %v4494_v58, 0.0 }
 0x764   :  { %v4496_v56 = vpop.f32.mrf.mxu0 }
 0x765   :  { %v4497_v60 = vadd.f32 %v4496_v56, %v9262_v23  ;;  %v4607_v59 = vmax.f32 %v4505_v1, 0.0 }
 0x767   :  { %v4605_v13 = vmax.f32 %v4497_v60, 0.0  ;;  %v4645_v20 = vpack.c.bf16 %v4607_v59, %v4606_v12 }
 0x769   :  { %v4644_v53 = vpack.c.bf16 %v4605_v13, %v4604_v51 }
 0x76b   :  { %6780 = vmatprep.mubr.bf16.mxu1 %v4644_v53 }
 0x76c   :  { %6781 = vmatmul.mubr.bf16.gmra.mxu1 %v4645_v20 }
 0x76e   :  { %v6706_v19 = vpop.f32.mrf.mxu0 }
 0x76f   :  { %v4518_v10 = vadd.f32 %v6706_v19, %v9262_v23 }
 0x770   :  { %v4509_v11 = vpop.f32.mrf.mxu0 }
 0x771   :  { %v4510_v35 = vadd.f32 %v4509_v11, %v9262_v23  ;;  %v4610_v43 = vmax.f32 %v4518_v10, 0.0 }
 0x772   :  { %v6707_v57 = vpop.f32.mrf.mxu0 }
 0x773   :  { %v4521_v21 = vadd.f32 %v6707_v57, %v9262_v23  ;;  %v4608_v33 = vmax.f32 %v4510_v35, 0.0 }
 0x774   :  { %v4512_v32 = vpop.f32.mrf.mxu0 }
 0x775   :  { %v4513_v6 = vadd.f32 %v4512_v32, %v9262_v23  ;;  %v4611_v62 = vmax.f32 %v4521_v21, 0.0 }
 0x777   :  { %v4609_v41 = vmax.f32 %v4513_v6, 0.0  ;;  %v4647_v48 = vpack.c.bf16 %v4611_v62, %v4610_v43 }
 0x779   :  { %v4646_v3 = vpack.c.bf16 %v4609_v41, %v4608_v33 }
 0x77b   :  { %6784 = vmatprep.mubr.bf16.mxu1 %v4646_v3 }
 0x77c   :  { %6785 = vmatmul.mubr.bf16.gmra.mxu1 %v4647_v48 }
 0x77e   :  { %v6710_v50 = vpop.f32.mrf.mxu0 }
 0x77f   :  { %v4534_v36 = vadd.f32 %v6710_v50, %v9262_v23 }
 0x780   :  { %v4525_v28 = vpop.f32.mrf.mxu0 }
 0x781   :  { %v4526_v30 = vadd.f32 %v4525_v28, %v9262_v23  ;;  %v4614_v61 = vmax.f32 %v4534_v36, 0.0 }
 0x782   :  { %v6711_v54 = vpop.f32.mrf.mxu0 }
 0x783   :  { %v4537_v0 = vadd.f32 %v6711_v54, %v9262_v23  ;;  %v4612_v44 = vmax.f32 %v4526_v30, 0.0 }
 0x784   :  { %v4528_v63 = vpop.f32.mrf.mxu0 }
 0x785   :  { %v4529_v25 = vadd.f32 %v4528_v63, %v9262_v23  ;;  %v4615_v45 = vmax.f32 %v4537_v0, 0.0 }
 0x787   :  { %v4613_v18 = vmax.f32 %v4529_v25, 0.0  ;;  %v4649_v26 = vpack.c.bf16 %v4615_v45, %v4614_v61 }
 0x789   :  { %v4648_v46 = vpack.c.bf16 %v4613_v18, %v4612_v44 }
 0x78b   :  { %6788 = vmatprep.mubr.bf16.mxu1 %v4648_v46 }
 0x78c   :  { %6789 = vmatmul.mubr.bf16.gmra.mxu1 %v4649_v26 }
 0x78e   :  { %v6714_v15 = vpop.f32.mrf.mxu0 }
 0x78f   :  { %v4550_v39 = vadd.f32 %v6714_v15, %v9262_v23 }
 0x790   :  { %v4541_v2 = vpop.f32.mrf.mxu0 }
 0x791   :  { %v4542_v4 = vadd.f32 %v4541_v2, %v9262_v23  ;;  %v4618_v22 = vmax.f32 %v4550_v39, 0.0 }
 0x792   :  { %v6715_v29 = vpop.f32.mrf.mxu0 }
 0x793   :  { %v4553_v27 = vadd.f32 %v6715_v29, %v9262_v23  ;;  %v4616_v40 = vmax.f32 %v4542_v4, 0.0 }
 0x794   :  { %v4544_v8 = vpop.f32.mrf.mxu0 }
 0x795   :  { %v4545_v31 = vadd.f32 %v4544_v8, %v9262_v23  ;;  %v4619_v42 = vmax.f32 %v4553_v27, 0.0 }
 0x796   :  { %v6734_v16 = vpop.f32.mrf.mxu1 }
 0x797   :  { %v4617_v34 = vmax.f32 %v4545_v31, 0.0  ;;  %v4651_v47 = vpack.c.bf16 %v4619_v42, %v4618_v22  ;;  %v4764_v23 = vadd.f32 %v6734_v16, %v9355_v24 }
 0x798   :  { %v4755_v49 = vpop.f32.mrf.mxu1 }
 0x799   :  { %v4650_v17 = vpack.c.bf16 %v4617_v34, %v4616_v40  ;;  %v4756_v38 = vadd.f32 %v4755_v49, %v9355_v24  ;;  %v5012_v9 = vmax.f32 %v4764_v23, 0.0 }
 0x79a   :  { %v6735_v55 = vpop.f32.mrf.mxu1 }
 0x79b   :  { %v4767_v14 = vadd.f32 %v6735_v55, %v9355_v24  ;;  %6792 = vmatprep.mubr.bf16.mxu1 %v4650_v17  ;;  %v5010_v60 = vmax.f32 %v4756_v38, 0.0 }
 0x79c   :  { %v4758_v58 = vpop.f32.mrf.mxu1  ;;  %6793 = vmatmul.mubr.bf16.gmra.mxu1 %v4651_v47 }
 0x79d   :  { %v4759_v1 = vadd.f32 %v4758_v58, %v9355_v24  ;;  %v5013_v5 = vmax.f32 %v4767_v14, 0.0 }
 0x79e   :  { %v6738_v56 = vpop.f32.mrf.mxu1 }
 0x79f   :  { %v5011_v37 = vmax.f32 %v4759_v1, 0.0  ;;  %v5075_v13 = vpack.c.bf16 %v5013_v5, %v5012_v9  ;;  %v4780_v19 = vadd.f32 %v6738_v56, %v9355_v24 }
 0x7a0   :  { %v4771_v59 = vpop.f32.mrf.mxu1 }
 0x7a1   :  { %v5074_v51 = vpack.c.bf16 %v5011_v37, %v5010_v60  ;;  %v4772_v53 = vadd.f32 %v4771_v59, %v9355_v24  ;;  %v5016_v6 = vmax.f32 %v4780_v19, 0.0 }
 0x7a2   :  { %v6739_v12 = vpop.f32.mrf.mxu1 }
 0x7a3   :  { %v4783_v20 = vadd.f32 %v6739_v12, %v9355_v24  ;;  %6812 = vmatprep.mubr.bf16.mxu0 %v5074_v51  ;;  %v5014_v10 = vmax.f32 %v4772_v53, 0.0 }
 0x7a4   :  { %v4774_v11 = vpop.f32.mrf.mxu1  ;;  %6813 = vmatmul.mubr.bf16.vlgmr.msra.gmra.mxu0 %v5075_v13 }
 0x7a5   :  { %v4775_v57 = vadd.f32 %v4774_v11, %v9355_v24  ;;  %v5017_v35 = vmax.f32 %v4783_v20, 0.0 }
 0x7a6   :  { %v6742_v21 = vpop.f32.mrf.mxu1 }
 0x7a7   :  { %v5015_v32 = vmax.f32 %v4775_v57, 0.0  ;;  %v5077_v41 = vpack.c.bf16 %v5017_v35, %v5016_v6  ;;  %v4796_v50 = vadd.f32 %v6742_v21, %v9355_v24 }
 0x7a8   :  { %v4787_v62 = vpop.f32.mrf.mxu1 }
 0x7a9   :  { %v5076_v33 = vpack.c.bf16 %v5015_v32, %v5014_v10  ;;  %v4788_v3 = vadd.f32 %v4787_v62, %v9355_v24  ;;  %v5020_v25 = vmax.f32 %v4796_v50, 0.0 }
 0x7aa   :  { %v6743_v43 = vpop.f32.mrf.mxu1 }
 0x7ab   :  { %v4799_v48 = vadd.f32 %v6743_v43, %v9355_v24  ;;  %6816 = vmatprep.mubr.bf16.mxu0 %v5076_v33  ;;  %v5018_v36 = vmax.f32 %v4788_v3, 0.0 }
 0x7ac   :  { %v4790_v28 = vpop.f32.mrf.mxu1  ;;  %6817 = vmatmul.mubr.bf16.gmra.mxu0 %v5077_v41 }
 0x7ad   :  { %v4791_v54 = vadd.f32 %v4790_v28, %v9355_v24  ;;  %v5021_v30 = vmax.f32 %v4799_v48, 0.0 }
 0x7ae   :  { %v6746_v0 = vpop.f32.mrf.mxu1 }
 0x7af   :  { %v5019_v63 = vmax.f32 %v4791_v54, 0.0  ;;  %v5079_v18 = vpack.c.bf16 %v5021_v30, %v5020_v25  ;;  %v4812_v15 = vadd.f32 %v6746_v0, %v9355_v24 }
 0x7b0   :  { %v4803_v45 = vpop.f32.mrf.mxu1 }
 0x7b1   :  { %v5078_v44 = vpack.c.bf16 %v5019_v63, %v5018_v36  ;;  %v4804_v46 = vadd.f32 %v4803_v45, %v9355_v24  ;;  %v5024_v31 = vmax.f32 %v4812_v15, 0.0 }
 0x7b2   :  { %v6747_v61 = vpop.f32.mrf.mxu1 }
 0x7b3   :  { %v4815_v26 = vadd.f32 %v6747_v61, %v9355_v24  ;;  %6820 = vmatprep.mubr.bf16.mxu0 %v5078_v44  ;;  %v5022_v39 = vmax.f32 %v4804_v46, 0.0 }
 0x7b4   :  { %v4806_v2 = vpop.f32.mrf.mxu1  ;;  %6821 = vmatmul.mubr.bf16.gmra.mxu0 %v5079_v18 }
 0x7b5   :  { %v4807_v29 = vadd.f32 %v4806_v2, %v9355_v24  ;;  %v5025_v4 = vmax.f32 %v4815_v26, 0.0 }
 0x7b6   :  { %v6750_v27 = vpop.f32.mrf.mxu1 }
 0x7b7   :  { %v5023_v8 = vmax.f32 %v4807_v29, 0.0  ;;  %v5081_v40 = vpack.c.bf16 %v5025_v4, %v5024_v31  ;;  %v4828_v17 = vadd.f32 %v6750_v27, %v9355_v24 }
 0x7b8   :  { %v4819_v42 = vpop.f32.mrf.mxu1 }
 0x7b9   :  { %v5080_v16 = vpack.c.bf16 %v5023_v8, %v5022_v39  ;;  %v4820_v22 = vadd.f32 %v4819_v42, %v9355_v24  ;;  %v5028_v1 = vmax.f32 %v4828_v17, 0.0 }
 0x7ba   :  { %v6751_v34 = vpop.f32.mrf.mxu1 }
 0x7bb   :  { %v4831_v49 = vadd.f32 %v6751_v34, %v9355_v24  ;;  %6824 = vmatprep.mubr.bf16.mxu0 %v5080_v16  ;;  %v5026_v23 = vmax.f32 %v4820_v22, 0.0 }
 0x7bc   :  { %v4822_v47 = vpop.f32.mrf.mxu1  ;;  %6825 = vmatmul.mubr.bf16.gmra.mxu0 %v5081_v40 }
 0x7bd   :  { %v4823_v55 = vadd.f32 %v4822_v47, %v9355_v24  ;;  %v5029_v38 = vmax.f32 %v4831_v49, 0.0 }
 0x7be   :  { %v6754_v14 = vpop.f32.mrf.mxu1 }
 0x7bf   :  { %v5027_v58 = vmax.f32 %v4823_v55, 0.0  ;;  %v5083_v60 = vpack.c.bf16 %v5029_v38, %v5028_v1  ;;  %v4844_v51 = vadd.f32 %v6754_v14, %v9355_v24 }
 0x7c0   :  { %v4835_v5 = vpop.f32.mrf.mxu1 }
 0x7c1   :  { %v5082_v56 = vpack.c.bf16 %v5027_v58, %v5026_v23  ;;  %v4836_v9 = vadd.f32 %v4835_v5, %v9355_v24  ;;  %v5032_v11 = vmax.f32 %v4844_v51, 0.0 }
 0x7c2   :  { %v6755_v37 = vpop.f32.mrf.mxu1 }
 0x7c3   :  { %v4847_v59 = vadd.f32 %v6755_v37, %v9355_v24  ;;  %6828 = vmatprep.mubr.bf16.mxu0 %v5082_v56  ;;  %v5030_v20 = vmax.f32 %v4836_v9, 0.0 }
 0x7c4   :  { %v4838_v13 = vpop.f32.mrf.mxu1  ;;  %6829 = vmatmul.mubr.bf16.gmra.mxu0 %v5083_v60 }
 0x7c5   :  { %v4839_v12 = vadd.f32 %v4838_v13, %v9355_v24  ;;  %v5033_v53 = vmax.f32 %v4847_v59, 0.0 }
 0x7c7   :  { %v5031_v19 = vmax.f32 %v4839_v12, 0.0  ;;  %v5085_v35 = vpack.c.bf16 %v5033_v53, %v5032_v11 }
 0x7c9   :  { %v5084_v57 = vpack.c.bf16 %v5031_v19, %v5030_v20 }
 0x7cb   :  { %6832 = vmatprep.mubr.bf16.mxu0 %v5084_v57 }
 0x7cc   :  { %v6758_v21 = vpop.f32.mrf.mxu1  ;;  %6833 = vmatmul.mubr.bf16.gmra.mxu0 %v5085_v35 }
 0x7cd   :  { %v4860_v33 = vadd.f32 %v6758_v21, %v9355_v24 }
 0x7ce   :  { %v4851_v10 = vpop.f32.mrf.mxu1 }
 0x7cf   :  { %v4852_v6 = vadd.f32 %v4851_v10, %v9355_v24  ;;  %v5036_v28 = vmax.f32 %v4860_v33, 0.0 }
 0x7d0   :  { %v6759_v32 = vpop.f32.mrf.mxu1 }
 0x7d1   :  { %v4863_v62 = vadd.f32 %v6759_v32, %v9355_v24  ;;  %v5034_v48 = vmax.f32 %v4852_v6, 0.0 }
 0x7d2   :  { %v4854_v41 = vpop.f32.mrf.mxu1 }
 0x7d3   :  { %v4855_v43 = vadd.f32 %v4854_v41, %v9355_v24  ;;  %v5037_v3 = vmax.f32 %v4863_v62, 0.0 }
 0x7d5   :  { %v5035_v50 = vmax.f32 %v4855_v43, 0.0  ;;  %v5087_v30 = vpack.c.bf16 %v5037_v3, %v5036_v28 }
 0x7d7   :  { %v5086_v54 = vpack.c.bf16 %v5035_v50, %v5034_v48 }
 0x7d9   :  { %6836 = vmatprep.mubr.bf16.mxu0 %v5086_v54 }
 0x7da   :  { %6837 = vmatmul.mubr.bf16.gmra.mxu0 %v5087_v30 }
 0x7dc   :  { %v6762_v0 = vpop.f32.mrf.mxu1 }
 0x7dd   :  { %v4876_v44 = vadd.f32 %v6762_v0, %v9355_v24 }
 0x7de   :  { %v4867_v36 = vpop.f32.mrf.mxu1 }
 0x7df   :  { %v4868_v25 = vadd.f32 %v4867_v36, %v9355_v24  ;;  %v5040_v2 = vmax.f32 %v4876_v44, 0.0 }
 0x7e0   :  { %v6763_v63 = vpop.f32.mrf.mxu1 }
 0x7e1   :  { %v4879_v45 = vadd.f32 %v6763_v63, %v9355_v24  ;;  %v5038_v26 = vmax.f32 %v4868_v25, 0.0 }
 0x7e2   :  { %v4870_v18 = vpop.f32.mrf.mxu1 }
 0x7e3   :  { %v4871_v61 = vadd.f32 %v4870_v18, %v9355_v24  ;;  %v5041_v46 = vmax.f32 %v4879_v45, 0.0 }
 0x7e5   :  { %v5039_v15 = vmax.f32 %v4871_v61, 0.0  ;;  %v5089_v4 = vpack.c.bf16 %v5041_v46, %v5040_v2 }
 0x7e7   :  { %v5088_v29 = vpack.c.bf16 %v5039_v15, %v5038_v26 }
 0x7e9   :  { %6840 = vmatprep.mubr.bf16.mxu0 %v5088_v29 }
 0x7ea   :  { %6841 = vmatmul.mubr.bf16.gmra.mxu0 %v5089_v4 }
 0x7ec   :  { %v6766_v27 = vpop.f32.mrf.mxu1 }
 0x7ed   :  { %v4892_v16 = vadd.f32 %v6766_v27, %v9355_v24 }
 0x7ee   :  { %v4883_v39 = vpop.f32.mrf.mxu1 }
 0x7ef   :  { %v4884_v31 = vadd.f32 %v4883_v39, %v9355_v24  ;;  %v5044_v47 = vmax.f32 %v4892_v16, 0.0 }
 0x7f0   :  { %v6767_v8 = vpop.f32.mrf.mxu1 }
 0x7f1   :  { %v4895_v42 = vadd.f32 %v6767_v8, %v9355_v24  ;;  %v5042_v49 = vmax.f32 %v4884_v31, 0.0 }
 0x7f2   :  { %v4886_v40 = vpop.f32.mrf.mxu1 }
 0x7f3   :  { %v4887_v34 = vadd.f32 %v4886_v40, %v9355_v24  ;;  %v5045_v22 = vmax.f32 %v4895_v42, 0.0 }
 0x7f5   :  { %v5043_v17 = vmax.f32 %v4887_v34, 0.0  ;;  %v5091_v38 = vpack.c.bf16 %v5045_v22, %v5044_v47 }
 0x7f7   :  { %v5090_v55 = vpack.c.bf16 %v5043_v17, %v5042_v49 }
 0x7f9   :  { %6844 = vmatprep.mubr.bf16.mxu0 %v5090_v55 }
 0x7fa   :  { %6845 = vmatmul.mubr.bf16.gmra.mxu0 %v5091_v38 }
 0x7fc   :  { %v6770_v14 = vpop.f32.mrf.mxu1 }
 0x7fd   :  { %v4908_v56 = vadd.f32 %v6770_v14, %v9355_v24 }
 0x7fe   :  { %v4899_v23 = vpop.f32.mrf.mxu1 }
 0x7ff   :  { %v4900_v1 = vadd.f32 %v4899_v23, %v9355_v24  ;;  %v5048_v13 = vmax.f32 %v4908_v56, 0.0 }
 0x800   :  { %v6771_v58 = vpop.f32.mrf.mxu1 }
 0x801   :  { %v4911_v5 = vadd.f32 %v6771_v58, %v9355_v24  ;;  %v5046_v59 = vmax.f32 %v4900_v1, 0.0 }
 0x802   :  { %v4902_v60 = vpop.f32.mrf.mxu1 }
 0x803   :  { %v4903_v37 = vadd.f32 %v4902_v60, %v9355_v24  ;;  %v5049_v9 = vmax.f32 %v4911_v5, 0.0 }
 0x805   :  { %v5047_v51 = vmax.f32 %v4903_v37, 0.0  ;;  %v5093_v53 = vpack.c.bf16 %v5049_v9, %v5048_v13 }
 0x807   :  { %v5092_v12 = vpack.c.bf16 %v5047_v51, %v5046_v59 }
 0x809   :  { %6848 = vmatprep.mubr.bf16.mxu0 %v5092_v12 }
 0x80a   :  { %6849 = vmatmul.mubr.bf16.gmra.mxu0 %v5093_v53 }
 0x80c   :  { %v6774_v20 = vpop.f32.mrf.mxu1 }
 0x80d   :  { %v4924_v21 = vadd.f32 %v6774_v20, %v9355_v24 }
 0x80e   :  { %v4915_v19 = vpop.f32.mrf.mxu1 }
 0x80f   :  { %v4916_v57 = vadd.f32 %v4915_v19, %v9355_v24  ;;  %v5052_v41 = vmax.f32 %v4924_v21, 0.0 }
 0x810   :  { %v6775_v11 = vpop.f32.mrf.mxu1 }
 0x811   :  { %v4927_v35 = vadd.f32 %v6775_v11, %v9355_v24  ;;  %v5050_v62 = vmax.f32 %v4916_v57, 0.0 }
 0x812   :  { %v4918_v10 = vpop.f32.mrf.mxu1 }
 0x813   :  { %v4919_v32 = vadd.f32 %v4918_v10, %v9355_v24  ;;  %v5053_v6 = vmax.f32 %v4927_v35, 0.0 }
 0x815   :  { %v5051_v33 = vmax.f32 %v4919_v32, 0.0  ;;  %v5095_v3 = vpack.c.bf16 %v5053_v6, %v5052_v41 }
 0x817   :  { %v5094_v43 = vpack.c.bf16 %v5051_v33, %v5050_v62 }
 0x819   :  { %6852 = vmatprep.mubr.bf16.mxu0 %v5094_v43 }
 0x81a   :  { %6853 = vmatmul.mubr.bf16.gmra.mxu0 %v5095_v3 }
 0x81c   :  { %v6778_v48 = vpop.f32.mrf.mxu1 }
 0x81d   :  { %v4940_v0 = vadd.f32 %v6778_v48, %v9355_v24  ;;  %v7155_v48 = vld [vmem:[%s9499_s4 + $0x8] sm:$0x7]  ;;  %s7179_s4 = smov [#allocation2]  }
 0x81e   :  { %v4931_v50 = vpop.f32.mrf.mxu1  ;;  %s5533_s11 = sshll.u32 %s7179_s4, 4  ;;  %s5534_s11 = int_to_ptr.vmem [resolvable:$true] %s5533_s11 }
 0x81f   :  { %v4932_v54 = vadd.f32 %v4931_v50, %v9355_v24  ;;  %v5056_v18 = vmax.f32 %v4940_v0, 0.0  ;;  %v9424_v50 = vrot.slane %v7155_v48, %v1208_v7  ;;  %s7156_s12 = scalar_lea.vmem %s5534_s11, 8192  ;;  %p7161_p1 = scmp.lt.s32.totalorder %s5534_s11, %s5534_s11 }
 0x820   :  { %v6779_v28 = vpop.f32.mrf.mxu1  ;;  %p7157_p0 = scmp.ne.s32.totalorder %s5534_s11, %s7156_s12  ;;  %p7162_p2 = scmp.lt.s32.totalorder %s7156_s12, %s7156_s12 }
 0x821   :  { %v4943_v30 = vadd.f32 %v6779_v28, %v9355_v24  ;;  %v5054_v45 = vmax.f32 %v4932_v54, 0.0 }
 0x822   :  { %v4934_v36 = vpop.f32.mrf.mxu1  ;;  %p7163_p3 = por %p7162_p2, %p7161_p1 }
 0x823   :  { %v4935_v63 = vadd.f32 %v4934_v36, %v9355_v24  ;;  %v5057_v25 = vmax.f32 %v4943_v30, 0.0 }
 0x824   :  { %p7164_p4 = pnand %p7163_p3, %p7157_p0 }
 0x825   :  { %v5055_v44 = vmax.f32 %v4935_v63, 0.0  ;;  %v5097_v46 = vpack.c.bf16 %v5057_v25, %v5056_v18 }
 0x827   :  { %v5096_v61 = vpack.c.bf16 %v5055_v44, %v5054_v45 }
 0x829   :  { %6856 = vmatprep.mubr.bf16.mxu0 %v5096_v61 }
 0x82a   :  { %6857 = vmatmul.mubr.bf16.gmra.mxu0 %v5097_v46 }
 0x82c   :  { %v6782_v26 = vpop.f32.mrf.mxu1 }
 0x82d   :  { %v4956_v27 = vadd.f32 %v6782_v26, %v9355_v24 }
 0x82e   :  { %v4947_v15 = vpop.f32.mrf.mxu1 }
 0x82f   :  { %v4948_v29 = vadd.f32 %v4947_v15, %v9355_v24  ;;  %v5060_v40 = vmax.f32 %v4956_v27, 0.0 }
 0x830   :  { %v6783_v2 = vpop.f32.mrf.mxu1 }
 0x831   :  { %v4959_v4 = vadd.f32 %v6783_v2, %v9355_v24  ;;  %v5058_v42 = vmax.f32 %v4948_v29, 0.0 }
 0x832   :  { %v4950_v39 = vpop.f32.mrf.mxu1 }
 0x833   :  { %v4951_v8 = vadd.f32 %v4950_v39, %v9355_v24  ;;  %v5061_v31 = vmax.f32 %v4959_v4, 0.0 }
 0x835   :  { %v5059_v16 = vmax.f32 %v4951_v8, 0.0  ;;  %v5099_v22 = vpack.c.bf16 %v5061_v31, %v5060_v40 }
 0x837   :  { %v5098_v34 = vpack.c.bf16 %v5059_v16, %v5058_v42 }
 0x839   :  { %6860 = vmatprep.mubr.bf16.mxu0 %v5098_v34 }
 0x83a   :  { %6861 = vmatmul.mubr.bf16.gmra.mxu0 %v5099_v22 }
 0x83c   :  { %v6786_v49 = vpop.f32.mrf.mxu1 }
 0x83d   :  { %v4972_v14 = vadd.f32 %v6786_v49, %v9355_v24 }
 0x83e   :  { %v4963_v17 = vpop.f32.mrf.mxu1 }
 0x83f   :  { %v4964_v55 = vadd.f32 %v4963_v17, %v9355_v24  ;;  %v5064_v60 = vmax.f32 %v4972_v14, 0.0 }
 0x840   :  { %v6787_v47 = vpop.f32.mrf.mxu1 }
 0x841   :  { %v4975_v38 = vadd.f32 %v6787_v47, %v9355_v24  ;;  %v5062_v5 = vmax.f32 %v4964_v55, 0.0 }
 0x842   :  { %v4966_v23 = vpop.f32.mrf.mxu1 }
 0x843   :  { %v4967_v58 = vadd.f32 %v4966_v23, %v9355_v24  ;;  %v5065_v1 = vmax.f32 %v4975_v38, 0.0 }
 0x845   :  { %v5063_v56 = vmax.f32 %v4967_v58, 0.0  ;;  %v5101_v9 = vpack.c.bf16 %v5065_v1, %v5064_v60 }
 0x847   :  { %v5100_v37 = vpack.c.bf16 %v5063_v56, %v5062_v5 }
 0x849   :  { %6864 = vmatprep.mubr.bf16.mxu0 %v5100_v37 }
 0x84a   :  { %6865 = vmatmul.mubr.bf16.gmra.mxu0 %v5101_v9 }
 0x84c   :  { %v6790_v59 = vpop.f32.mrf.mxu1 }
 0x84d   :  { %v4988_v20 = vadd.f32 %v6790_v59, %v9355_v24 }
 0x84e   :  { %v4979_v51 = vpop.f32.mrf.mxu1 }
 0x84f   :  { %v4980_v12 = vadd.f32 %v4979_v51, %v9355_v24  ;;  %v5068_v10 = vmax.f32 %v4988_v20, 0.0 }
 0x850   :  { %v6791_v13 = vpop.f32.mrf.mxu1 }
 0x851   :  { %v4991_v53 = vadd.f32 %v6791_v13, %v9355_v24  ;;  %v5066_v35 = vmax.f32 %v4980_v12, 0.0 }
 0x852   :  { %v4982_v19 = vpop.f32.mrf.mxu1 }
 0x853   :  { %v4983_v11 = vadd.f32 %v4982_v19, %v9355_v24  ;;  %v5069_v57 = vmax.f32 %v4991_v53, 0.0 }
 0x855   :  { %v5067_v21 = vmax.f32 %v4983_v11, 0.0  ;;  %v5103_v6 = vpack.c.bf16 %v5069_v57, %v5068_v10 }
 0x857   :  { %v5102_v32 = vpack.c.bf16 %v5067_v21, %v5066_v35 }
 0x859   :  { %6868 = vmatprep.mubr.bf16.mxu0 %v5102_v32 }
 0x85a   :  { %6869 = vmatmul.mubr.bf16.gmra.mxu0 %v5103_v6 }
 0x85c   :  { %v6794_v62 = vpop.f32.mrf.mxu1 }
 0x85d   :  { %v5004_v28 = vadd.f32 %v6794_v62, %v9355_v24 }
 0x85e   :  { %v4995_v33 = vpop.f32.mrf.mxu1 }
 0x85f   :  { %v4996_v43 = vadd.f32 %v4995_v33, %v9355_v24  ;;  %v5072_v44 = vmax.f32 %v5004_v28, 0.0 }
 0x860   :  { %v6795_v41 = vpop.f32.mrf.mxu1 }
 0x861   :  { %v5007_v3 = vadd.f32 %v6795_v41, %v9355_v24  ;;  %v5070_v63 = vmax.f32 %v4996_v43, 0.0 }
 0x862   :  { %v4998_v54 = vpop.f32.mrf.mxu1 }
 0x863   :  { %v4999_v30 = vadd.f32 %v4998_v54, %v9355_v24  ;;  %v5073_v0 = vmax.f32 %v5007_v3, 0.0 }
 0x864   :  { %v6814_v36 = vpop.f32.mrf.mxu0 }
 0x865   :  { %v5071_v25 = vmax.f32 %v4999_v30, 0.0  ;;  %v5218_v45 = vadd.f32 %v6814_v36, %v9424_v50  ;;  %v5105_v52 = vpack.c.bf16 %v5073_v0, %v5072_v44 }
 0x866   :  { %v5209_v18 = vpop.f32.mrf.mxu0 }
 0x867   :  { %v5104_v61 = vpack.c.bf16 %v5071_v25, %v5070_v63  ;;  %5466 = vst [vmem:[#allocation2 + $0x10] sm:$0xff] %v5218_v45  ;;  %v5210_v46 = vadd.f32 %v5209_v18, %v9424_v50 }
 0x868   :  { %v6815_v7 = vpop.f32.mrf.mxu0 }
 0x869   :  { %5464 = vst [vmem:[#allocation2] sm:$0xff] %v5210_v46  ;;  %v5221_v26 = vadd.f32 %v6815_v7, %v9424_v50  ;;  %6872 = vmatprep.mubr.bf16.mxu0 %v5104_v61 }
 0x86a   :  { %v5212_v15 = vpop.f32.mrf.mxu0  ;;  %6873 = vmatmul.mubr.bf16.gmra.mxu0 %v5105_v52 }
 0x86b   :  { %5467 = vst [vmem:[#allocation2 + $0x18] sm:$0xff] %v5221_v26  ;;  %v5213_v24 = vadd.f32 %v5212_v15, %v9424_v50 }
 0x86c   :  { %v6818_v2 = vpop.f32.mrf.mxu0 }
 0x86d   :  { %5465 = vst [vmem:[#allocation2 + $0x8] sm:$0xff] %v5213_v24  ;;  %v5234_v29 = vadd.f32 %v6818_v2, %v9424_v50 }
 0x86e   :  { %v5225_v4 = vpop.f32.mrf.mxu0 }
 0x86f   :  { %5470 = vst [vmem:[#allocation2 + $0x30] sm:$0xff] %v5234_v29  ;;  %v5226_v27 = vadd.f32 %v5225_v4, %v9424_v50 }
 0x870   :  { %v6819_v39 = vpop.f32.mrf.mxu0 }
 0x871   :  { %5468 = vst [vmem:[#allocation2 + $0x20] sm:$0xff] %v5226_v27  ;;  %v5237_v8 = vadd.f32 %v6819_v39, %v9424_v50 }
 0x872   :  { %v5228_v31 = vpop.f32.mrf.mxu0 }
 0x873   :  { %5471 = vst [vmem:[#allocation2 + $0x38] sm:$0xff] %v5237_v8  ;;  %v5229_v42 = vadd.f32 %v5228_v31, %v9424_v50 }
 0x874   :  { %v6822_v16 = vpop.f32.mrf.mxu0 }
 0x875   :  { %5469 = vst [vmem:[#allocation2 + $0x28] sm:$0xff] %v5229_v42  ;;  %v5250_v40 = vadd.f32 %v6822_v16, %v9424_v50 }
 0x876   :  { %v5241_v34 = vpop.f32.mrf.mxu0 }
 0x877   :  { %5474 = vst [vmem:[#allocation2 + $0x50] sm:$0xff] %v5250_v40  ;;  %v5242_v22 = vadd.f32 %v5241_v34, %v9424_v50 }
 0x878   :  { %v6823_v49 = vpop.f32.mrf.mxu0 }
 0x879   :  { %5472 = vst [vmem:[#allocation2 + $0x40] sm:$0xff] %v5242_v22  ;;  %v5253_v17 = vadd.f32 %v6823_v49, %v9424_v50 }
 0x87a   :  { %v5244_v47 = vpop.f32.mrf.mxu0 }
 0x87b   :  { %5475 = vst [vmem:[#allocation2 + $0x58] sm:$0xff] %v5253_v17  ;;  %v5245_v55 = vadd.f32 %v5244_v47, %v9424_v50 }
 0x87c   :  { %v6826_v38 = vpop.f32.mrf.mxu0 }
 0x87d   :  { %5473 = vst [vmem:[#allocation2 + $0x48] sm:$0xff] %v5245_v55  ;;  %v5266_v14 = vadd.f32 %v6826_v38, %v9424_v50 }
 0x87e   :  { %v5257_v23 = vpop.f32.mrf.mxu0 }
 0x87f   :  { %5478 = vst [vmem:[#allocation2 + $0x70] sm:$0xff] %v5266_v14  ;;  %v5258_v58 = vadd.f32 %v5257_v23, %v9424_v50 }
 0x880   :  { %v6827_v1 = vpop.f32.mrf.mxu0 }
 0x881   :  { %5476 = vst [vmem:[#allocation2 + $0x60] sm:$0xff] %v5258_v58  ;;  %v5269_v5 = vadd.f32 %v6827_v1, %v9424_v50 }
 0x882   :  { %v5260_v56 = vpop.f32.mrf.mxu0 }
 0x883   :  { %5479 = vst [vmem:[#allocation2 + $0x78] sm:$0xff] %v5269_v5  ;;  %v5261_v60 = vadd.f32 %v5260_v56, %v9424_v50 }
 0x884   :  { %v6830_v37 = vpop.f32.mrf.mxu0 }
 0x885   :  { %5477 = vst [vmem:[#allocation2 + $0x68] sm:$0xff] %v5261_v60  ;;  %v5282_v9 = vadd.f32 %v6830_v37, %v9424_v50 }
 0x886   :  { %v5273_v59 = vpop.f32.mrf.mxu0 }
 0x887   :  { %5482 = vst [vmem:[#allocation2 + $0x90] sm:$0xff] %v5282_v9  ;;  %v5274_v51 = vadd.f32 %v5273_v59, %v9424_v50 }
 0x888   :  { %v6831_v13 = vpop.f32.mrf.mxu0 }
 0x889   :  { %5480 = vst [vmem:[#allocation2 + $0x80] sm:$0xff] %v5274_v51  ;;  %v5285_v12 = vadd.f32 %v6831_v13, %v9424_v50 }
 0x88a   :  { %v5276_v53 = vpop.f32.mrf.mxu0 }
 0x88b   :  { %5483 = vst [vmem:[#allocation2 + $0x98] sm:$0xff] %v5285_v12  ;;  %v5277_v20 = vadd.f32 %v5276_v53, %v9424_v50 }
 0x88c   :  { %v6834_v19 = vpop.f32.mrf.mxu0 }
 0x88d   :  { %5481 = vst [vmem:[#allocation2 + $0x88] sm:$0xff] %v5277_v20  ;;  %v5298_v11 = vadd.f32 %v6834_v19, %v9424_v50 }
 0x88e   :  { %v5289_v57 = vpop.f32.mrf.mxu0 }
 0x88f   :  { %5486 = vst [vmem:[#allocation2 + $0xb0] sm:$0xff] %v5298_v11  ;;  %v5290_v35 = vadd.f32 %v5289_v57, %v9424_v50 }
 0x890   :  { %v6835_v21 = vpop.f32.mrf.mxu0 }
 0x891   :  { %5484 = vst [vmem:[#allocation2 + $0xa0] sm:$0xff] %v5290_v35  ;;  %v5301_v10 = vadd.f32 %v6835_v21, %v9424_v50 }
 0x892   :  { %v5292_v32 = vpop.f32.mrf.mxu0 }
 0x893   :  { %5487 = vst [vmem:[#allocation2 + $0xb8] sm:$0xff] %v5301_v10  ;;  %v5293_v6 = vadd.f32 %v5292_v32, %v9424_v50 }
 0x895   :  { %5485 = vst [vmem:[#allocation2 + $0xa8] sm:$0xff] %v5293_v6 }
 0x89a   :  { %v6838_v62 = vpop.f32.mrf.mxu0 }
 0x89b   :  { %v5314_v33 = vadd.f32 %v6838_v62, %v9424_v50 }
 0x89c   :  { %v5305_v41 = vpop.f32.mrf.mxu0 }
 0x89d   :  { %5490 = vst [vmem:[#allocation2 + $0xd0] sm:$0xff] %v5314_v33  ;;  %v5306_v43 = vadd.f32 %v5305_v41, %v9424_v50 }
 0x89e   :  { %v6839_v3 = vpop.f32.mrf.mxu0 }
 0x89f   :  { %5488 = vst [vmem:[#allocation2 + $0xc0] sm:$0xff] %v5306_v43  ;;  %v5317_v48 = vadd.f32 %v6839_v3, %v9424_v50 }
 0x8a0   :  { %v5308_v28 = vpop.f32.mrf.mxu0 }
 0x8a1   :  { %5491 = vst [vmem:[#allocation2 + $0xd8] sm:$0xff] %v5317_v48  ;;  %v5309_v54 = vadd.f32 %v5308_v28, %v9424_v50 }
 0x8a3   :  { %5489 = vst [vmem:[#allocation2 + $0xc8] sm:$0xff] %v5309_v54 }
 0x8aa   :  { %v6842_v30 = vpop.f32.mrf.mxu0 }
 0x8ab   :  { %v5330_v0 = vadd.f32 %v6842_v30, %v9424_v50 }
 0x8ac   :  { %v5321_v36 = vpop.f32.mrf.mxu0 }
 0x8ad   :  { %5494 = vst [vmem:[#allocation2 + $0xf0] sm:$0xff] %v5330_v0  ;;  %v5322_v63 = vadd.f32 %v5321_v36, %v9424_v50 }
 0x8ae   :  { %v6843_v25 = vpop.f32.mrf.mxu0 }
 0x8af   :  { %5492 = vst [vmem:[#allocation2 + $0xe0] sm:$0xff] %v5322_v63  ;;  %v5333_v45 = vadd.f32 %v6843_v25, %v9424_v50 }
 0x8b0   :  { %v5324_v44 = vpop.f32.mrf.mxu0 }
 0x8b1   :  { %5495 = vst [vmem:[#allocation2 + $0xf8] sm:$0xff] %v5333_v45  ;;  %v5325_v18 = vadd.f32 %v5324_v44, %v9424_v50 }
 0x8b3   :  { %5493 = vst [vmem:[#allocation2 + $0xe8] sm:$0xff] %v5325_v18 }
 0x8ba   :  { %v6846_v61 = vpop.f32.mrf.mxu0 }
 0x8bb   :  { %v5346_v46 = vadd.f32 %v6846_v61, %v9424_v50 }
 0x8bc   :  { %v5337_v52 = vpop.f32.mrf.mxu0 }
 0x8bd   :  { %5498 = vst [vmem:[#allocation2 + $0x110] sm:$0xff] %v5346_v46  ;;  %v5338_v7 = vadd.f32 %v5337_v52, %v9424_v50 }
 0x8be   :  { %v6847_v26 = vpop.f32.mrf.mxu0 }
 0x8bf   :  { %5496 = vst [vmem:[#allocation2 + $0x100] sm:$0xff] %v5338_v7  ;;  %v5349_v15 = vadd.f32 %v6847_v26, %v9424_v50 }
 0x8c0   :  { %v5340_v24 = vpop.f32.mrf.mxu0 }
 0x8c1   :  { %5499 = vst [vmem:[#allocation2 + $0x118] sm:$0xff] %v5349_v15  ;;  %v5341_v2 = vadd.f32 %v5340_v24, %v9424_v50 }
 0x8c3   :  { %5497 = vst [vmem:[#allocation2 + $0x108] sm:$0xff] %v5341_v2 }
 0x8ca   :  { %v6850_v29 = vpop.f32.mrf.mxu0 }
 0x8cb   :  { %v5362_v4 = vadd.f32 %v6850_v29, %v9424_v50 }
 0x8cc   :  { %v5353_v27 = vpop.f32.mrf.mxu0 }
 0x8cd   :  { %5502 = vst [vmem:[#allocation2 + $0x130] sm:$0xff] %v5362_v4  ;;  %v5354_v39 = vadd.f32 %v5353_v27, %v9424_v50 }
 0x8ce   :  { %v6851_v8 = vpop.f32.mrf.mxu0 }
 0x8cf   :  { %5500 = vst [vmem:[#allocation2 + $0x120] sm:$0xff] %v5354_v39  ;;  %v5365_v31 = vadd.f32 %v6851_v8, %v9424_v50 }
 0x8d0   :  { %v5356_v42 = vpop.f32.mrf.mxu0 }
 0x8d1   :  { %5503 = vst [vmem:[#allocation2 + $0x138] sm:$0xff] %v5365_v31  ;;  %v5357_v16 = vadd.f32 %v5356_v42, %v9424_v50 }
 0x8d3   :  { %5501 = vst [vmem:[#allocation2 + $0x128] sm:$0xff] %v5357_v16 }
 0x8da   :  { %v6854_v40 = vpop.f32.mrf.mxu0 }
 0x8db   :  { %v5378_v34 = vadd.f32 %v6854_v40, %v9424_v50 }
 0x8dc   :  { %v5369_v22 = vpop.f32.mrf.mxu0 }
 0x8dd   :  { %5506 = vst [vmem:[#allocation2 + $0x150] sm:$0xff] %v5378_v34  ;;  %v5370_v49 = vadd.f32 %v5369_v22, %v9424_v50 }
 0x8de   :  { %v6855_v17 = vpop.f32.mrf.mxu0 }
 0x8df   :  { %5504 = vst [vmem:[#allocation2 + $0x140] sm:$0xff] %v5370_v49  ;;  %v5381_v47 = vadd.f32 %v6855_v17, %v9424_v50 }
 0x8e0   :  { %v5372_v55 = vpop.f32.mrf.mxu0 }
 0x8e1   :  { %5507 = vst [vmem:[#allocation2 + $0x158] sm:$0xff] %v5381_v47  ;;  %v5373_v38 = vadd.f32 %v5372_v55, %v9424_v50 }
 0x8e3   :  { %5505 = vst [vmem:[#allocation2 + $0x148] sm:$0xff] %v5373_v38 }
 0x8ea   :  { %v6858_v14 = vpop.f32.mrf.mxu0 }
 0x8eb   :  { %v5394_v23 = vadd.f32 %v6858_v14, %v9424_v50 }
 0x8ec   :  { %v5385_v58 = vpop.f32.mrf.mxu0 }
 0x8ed   :  { %5510 = vst [vmem:[#allocation2 + $0x170] sm:$0xff] %v5394_v23  ;;  %v5386_v1 = vadd.f32 %v5385_v58, %v9424_v50 }
 0x8ee   :  { %v6859_v5 = vpop.f32.mrf.mxu0 }
 0x8ef   :  { %5508 = vst [vmem:[#allocation2 + $0x160] sm:$0xff] %v5386_v1  ;;  %v5397_v56 = vadd.f32 %v6859_v5, %v9424_v50 }
 0x8f0   :  { %v5388_v60 = vpop.f32.mrf.mxu0 }
 0x8f1   :  { %5511 = vst [vmem:[#allocation2 + $0x178] sm:$0xff] %v5397_v56  ;;  %v5389_v37 = vadd.f32 %v5388_v60, %v9424_v50 }
 0x8f3   :  { %5509 = vst [vmem:[#allocation2 + $0x168] sm:$0xff] %v5389_v37 }
 0x8fa   :  { %v6862_v9 = vpop.f32.mrf.mxu0 }
 0x8fb   :  { %v5410_v59 = vadd.f32 %v6862_v9, %v9424_v50 }
 0x8fc   :  { %v5401_v51 = vpop.f32.mrf.mxu0 }
 0x8fd   :  { %5514 = vst [vmem:[#allocation2 + $0x190] sm:$0xff] %v5410_v59  ;;  %v5402_v13 = vadd.f32 %v5401_v51, %v9424_v50 }
 0x8fe   :  { %v6863_v12 = vpop.f32.mrf.mxu0 }
 0x8ff   :  { %5512 = vst [vmem:[#allocation2 + $0x180] sm:$0xff] %v5402_v13  ;;  %v5413_v53 = vadd.f32 %v6863_v12, %v9424_v50 }
 0x900   :  { %v5404_v20 = vpop.f32.mrf.mxu0 }
 0x901   :  { %5515 = vst [vmem:[#allocation2 + $0x198] sm:$0xff] %v5413_v53  ;;  %v5405_v19 = vadd.f32 %v5404_v20, %v9424_v50 }
 0x903   :  { %5513 = vst [vmem:[#allocation2 + $0x188] sm:$0xff] %v5405_v19 }
 0x90a   :  { %v6866_v11 = vpop.f32.mrf.mxu0 }
 0x90b   :  { %v5426_v57 = vadd.f32 %v6866_v11, %v9424_v50 }
 0x90c   :  { %v5417_v35 = vpop.f32.mrf.mxu0 }
 0x90d   :  { %5518 = vst [vmem:[#allocation2 + $0x1b0] sm:$0xff] %v5426_v57  ;;  %v5418_v21 = vadd.f32 %v5417_v35, %v9424_v50 }
 0x90e   :  { %v6867_v10 = vpop.f32.mrf.mxu0 }
 0x90f   :  { %5516 = vst [vmem:[#allocation2 + $0x1a0] sm:$0xff] %v5418_v21  ;;  %v5429_v32 = vadd.f32 %v6867_v10, %v9424_v50 }
 0x910   :  { %v5420_v6 = vpop.f32.mrf.mxu0 }
 0x911   :  { %5519 = vst [vmem:[#allocation2 + $0x1b8] sm:$0xff] %v5429_v32  ;;  %v5421_v62 = vadd.f32 %v5420_v6, %v9424_v50 }
 0x913   :  { %5517 = vst [vmem:[#allocation2 + $0x1a8] sm:$0xff] %v5421_v62 }
 0x91a   :  { %v6870_v33 = vpop.f32.mrf.mxu0 }
 0x91b   :  { %v5442_v41 = vadd.f32 %v6870_v33, %v9424_v50 }
 0x91c   :  { %v5433_v43 = vpop.f32.mrf.mxu0 }
 0x91d   :  { %5522 = vst [vmem:[#allocation2 + $0x1d0] sm:$0xff] %v5442_v41  ;;  %v5434_v3 = vadd.f32 %v5433_v43, %v9424_v50 }
 0x91e   :  { %v6871_v48 = vpop.f32.mrf.mxu0 }
 0x91f   :  { %5520 = vst [vmem:[#allocation2 + $0x1c0] sm:$0xff] %v5434_v3  ;;  %v5445_v28 = vadd.f32 %v6871_v48, %v9424_v50 }
 0x920   :  { %v5436_v54 = vpop.f32.mrf.mxu0 }
 0x921   :  { %5523 = vst [vmem:[#allocation2 + $0x1d8] sm:$0xff] %v5445_v28  ;;  %v5437_v30 = vadd.f32 %v5436_v54, %v9424_v50 }
 0x923   :  { %5521 = vst [vmem:[#allocation2 + $0x1c8] sm:$0xff] %v5437_v30 }
 0x92a   :  { %v6874_v0 = vpop.f32.mrf.mxu0 }
 0x92b   :  { %v5458_v36 = vadd.f32 %v6874_v0, %v9424_v50 }
 0x92c   :  { %v5449_v63 = vpop.f32.mrf.mxu0 }
 0x92d   :  { %5526 = vst [vmem:[#allocation2 + $0x1f0] sm:$0xff] %v5458_v36  ;;  %v5450_v25 = vadd.f32 %v5449_v63, %v9424_v50 }
 0x92e   :  { %v6875_v45 = vpop.f32.mrf.mxu0 }
 0x92f   :  { %5524 = vst [vmem:[#allocation2 + $0x1e0] sm:$0xff] %v5450_v25  ;;  %v5461_v44 = vadd.f32 %v6875_v45, %v9424_v50 }
 0x930   :  { %v5452_v18 = vpop.f32.mrf.mxu0 }
 0x931   :  { %5527 = vst [vmem:[#allocation2 + $0x1f8] sm:$0xff] %v5461_v44  ;;  %v5453_v61 = vadd.f32 %v5452_v18, %v9424_v50 }
 0x933   :  { %5525 = vst [vmem:[#allocation2 + $0x1e8] sm:$0xff] %v5453_v61 }
 0x934   :  { %7167 = shalt.err (!%p7164_p4)
}
 0x935   :  { %s7180_s13 = smov 128   ;;  %s7181_s3 = smov 8  }
 0x936   :  { %5539 = dma.vmem_to_hbm [thread:$0]  %s5534_s11, 8192, %s9500_s5, [#allocation3], %s7180_s13, %s7180_s13, %s7181_s3  }
 0x937   :  { %7176 = dma.done.wait [#allocation3], 8192  }
 0x938   :  { %7177 = vsyncadd [#allocation3], 4294959104 }
 0x939   :  { %5547 = vsyncpa [#allocation3], 1 }

</bundles_post_ra>
